<compile_context>
chip_gen: v7x
topology: tpu7x:2x2x1
jax: 0.10.0
libtpu: 0.0.40
codegen_flags: <defaults>
</compile_context>

<pallas_src>
import functools

import jax
import jax.numpy as jnp
from jax.experimental import pallas as pl
from jax.experimental.pallas import tpu as pltpu

CPAD = 128          # lane-dense channel padding (all real widths here are <= 128)
TM_DEFAULT = 256    # M tile: small enough for v7x's 64 MiB VMEM with double-buffering


def _round_up(x, m):
    return (x + m - 1) // m * m


# ----------------------------------------------------------------------------- kernels ---

def _mm_epilogue_kernel(a_ref, b_ref, scale_ref, bias_ref, *rest, act, has_short):
    """out = act((A @ B) * scale + bias [+ short]); A cast to bf16 for the MXU, epilogue f32."""
    if has_short:
        short_ref, o_ref = rest
    else:
        (o_ref,) = rest
    a = a_ref[...].astype(jnp.bfloat16)
    acc = jnp.dot(a, b_ref[...], preferred_element_type=jnp.float32)
    out = acc * scale_ref[...] + bias_ref[...]
    if has_short:
        out = out + short_ref[...]
    if act == "relu":
        out = jnp.maximum(out, 0.0)
    o_ref[...] = out


def matmul_epilogue(a, b, scale, bias, *, short=None, act=None, tm=TM_DEFAULT):
    """a: (M, K) f32, b: (K, N) bf16, scale/bias: (1, N) f32, short: (M, N) f32 or None.

    M-tiled ('parallel') grid, lane-dense N (caller pads N to CPAD). Returns (M, N) f32."""
    M, K = a.shape
    _, N = b.shape
    tm_eff = min(tm, _round_up(M, 8))
    Mp = _round_up(M, tm_eff)
    if Mp != M:
        a = jnp.pad(a, ((0, Mp - M), (0, 0)))
        if short is not None:
            short = jnp.pad(short, ((0, Mp - M), (0, 0)))
    in_specs = [
        pl.BlockSpec((tm_eff, K), lambda i: (i, 0)),
        pl.BlockSpec((K, N), lambda i: (0, 0)),
        pl.BlockSpec((1, N), lambda i: (0, 0)),
        pl.BlockSpec((1, N), lambda i: (0, 0)),
    ]
    args = [a, b, scale, bias]
    if short is not None:
        in_specs.append(pl.BlockSpec((tm_eff, N), lambda i: (i, 0)))
        args.append(short)
    out = pl.pallas_call(
        functools.partial(_mm_epilogue_kernel, act=act, has_short=short is not None),
        out_shape=jax.ShapeDtypeStruct((Mp, N), jnp.float32),
        grid=(Mp // tm_eff,),
        in_specs=in_specs,
        out_specs=pl.BlockSpec((tm_eff, N), lambda i: (i, 0)),
        compiler_params=pltpu.CompilerParams(
            dimension_semantics=("parallel",),
            vmem_limit_bytes=32 * 1024 * 1024,
        ),
    )(*args)
    return out if Mp == M else out[:M]


def _gap_fc_kernel(x_ref, w_ref, b_ref, o_ref):
    # global-average-pool over HW, then Linear: one kernel, one launch.
    pooled = jnp.mean(x_ref[...], axis=1)                                  # (N, C)
    o_ref[...] = jnp.dot(pooled, w_ref[...],
                         preferred_element_type=jnp.float32) + b_ref[...]


def gap_fc(x3, fc_w, fc_b, cin_real):
    """x3: (N, HW, CPAD) f32 -> logits (N, num_classes) f32 (GAP + Linear fused)."""
    n, hw, cp = x3.shape
    nc = fc_w.shape[0]
    w_pad = jnp.zeros((cp, CPAD), jnp.float32).at[:cin_real, :nc].set(fc_w.T)
    b_pad = jnp.zeros((1, CPAD), jnp.float32).at[0, :nc].set(fc_b)
    out = pl.pallas_call(
        _gap_fc_kernel,
        out_shape=jax.ShapeDtypeStruct((n, CPAD), jnp.float32),
        grid=(1,),
        in_specs=[
            pl.BlockSpec((n, hw, cp), lambda i: (0, 0, 0)),
            pl.BlockSpec((cp, CPAD), lambda i: (0, 0)),
            pl.BlockSpec((1, CPAD), lambda i: (0, 0)),
        ],
        out_specs=pl.BlockSpec((n, CPAD), lambda i: (0, 0)),
    )(x3, w_pad, b_pad)
    return out[:, :nc]


# -------------------------------------------------------------------------------- glue ---
# TODO(synk): patch extraction (im2col) is still done in XLA glue; moving the 9-position
#             accumulation inside the kernel (pl.ds-shifted reads) would remove the kh*kw
#             HBM expansion of the activations for the 3x3 convs.

def im2col(x, kh, kw, stride, padding):
    """x: (N, H, W, C) NHWC -> (N*Ho*Wo, kh*kw*C), Ho, Wo.  Kernel-position outer, C inner."""
    n, h, w, c = x.shape
    xp = jnp.pad(x, ((0, 0), (padding, padding), (padding, padding), (0, 0)))
    ho = (h + 2 * padding - kh) // stride + 1
    wo = (w + 2 * padding - kw) // stride + 1
    patches = []
    for i in range(kh):
        for j in range(kw):
            patches.append(
                xp[:, i:i + (ho - 1) * stride + 1:stride,
                      j:j + (wo - 1) * stride + 1:stride, :])
    cols = jnp.stack(patches, axis=3)                        # (N, Ho, Wo, kh*kw, C)
    return cols.reshape(n * ho * wo, kh * kw * c), ho, wo


def fold_bn_padded(bn, cout, eps=1e-5):
    scale = bn["gamma"] / jnp.sqrt(bn["var"] + eps)
    bias = bn["beta"] - bn["mean"] * scale
    sc = jnp.zeros((1, CPAD), jnp.float32).at[0, :cout].set(scale)
    bi = jnp.zeros((1, CPAD), jnp.float32).at[0, :cout].set(bias)
    return sc, bi


def expand_grouped_weight(w, groups):
    """Grouped (cout, cin//groups, kh, kw) -> block-diagonal dense (cout, cin, kh, kw)."""
    cout, cin_g, kh, kw = w.shape
    cout_g = cout // groups
    wd = jnp.zeros((cout, cin_g * groups, kh, kw), w.dtype)
    for g in range(groups):
        wd = wd.at[g * cout_g:(g + 1) * cout_g, g * cin_g:(g + 1) * cin_g].set(
            w[g * cout_g:(g + 1) * cout_g])
    return wd


def conv_kxk_bn_act(x_real, w_dense, sc_pad, bi_pad, *, stride, padding, act=None):
    """kxk conv (possibly block-diag-expanded grouped weight) via im2col + ONE fused matmul."""
    n, h, w_, cin = x_real.shape
    cout, _, kh, kw = w_dense.shape
    cols, ho, wo = im2col(x_real, kh, kw, stride, padding)          # (M, kh*kw*cin)
    K = kh * kw * cin
    Kp = _round_up(K, 8)
    if Kp != K:
        cols = jnp.pad(cols, ((0, 0), (0, Kp - K)))
    bmat = jnp.transpose(w_dense, (2, 3, 1, 0)).reshape(K, cout)
    bmat = jnp.pad(bmat, ((0, Kp - K), (0, CPAD - cout))).astype(jnp.bfloat16)
    out = matmul_epilogue(cols, bmat, sc_pad, bi_pad, act=act)
    return out.reshape(n, ho, wo, CPAD)


def conv1x1_bn_act(x_pad, w, cin_real, sc_pad, bi_pad, *, stride=1, act=None, short=None):
    """1x1 conv on a channel-padded NHWC activation: pure matmul, no im2col expansion."""
    if stride > 1:
        x_pad = x_pad[:, ::stride, ::stride, :]
    n, h, w_, cp = x_pad.shape
    cout = w.shape[0]
    a = x_pad.reshape(n * h * w_, cp)
    bmat = (jnp.zeros((cp, CPAD), jnp.float32)
            .at[:cin_real, :cout].set(w[:, :, 0, 0].T)).astype(jnp.bfloat16)
    out = matmul_epilogue(a, bmat, sc_pad, bi_pad, short=short, act=act)
    return out.reshape(n, h, w_, CPAD)


# --------------------------------------------------------------------------- parameters ---

def _conv_w(key, cout, cin, kh, kw):
    fan_in = cin * kh * kw
    return jax.random.normal(key, (cout, cin, kh, kw), jnp.float32) / jnp.sqrt(float(fan_in))


def _bn(key, c):
    k1, k2 = jax.random.split(key)
    return dict(
        gamma=1.0 + 0.1 * jax.random.normal(k1, (c,), jnp.float32),
        beta=0.1 * jax.random.normal(k2, (c,), jnp.float32),
        mean=jnp.zeros((c,), jnp.float32),
        var=jnp.ones((c,), jnp.float32),
    )


def init_params(key):
    """Tiny RegNetX: stem 3->16 (s2), stage widths [16, 32], depths [1, 1], group width 8."""
    stem_w, widths, group_w, num_classes = 16, (16, 32), 8, 3
    keys = iter(jax.random.split(key, 64))
    params = {"stem": {"w": _conv_w(next(keys), stem_w, 3, 3, 3), "bn": _bn(next(keys), stem_w)}}
    blocks = []
    cin = stem_w
    for cout in widths:
        groups = cout // group_w
        blk = {
            "stride": 2,
            "groups": groups,
            "conv1_w": _conv_w(next(keys), cout, cin, 1, 1),
            "bn1": _bn(next(keys), cout),
            "conv2_w": _conv_w(next(keys), cout, cout // groups, 3, 3),
            "bn2": _bn(next(keys), cout),
            "conv3_w": _conv_w(next(keys), cout, cout, 1, 1),
            "bn3": _bn(next(keys), cout),
            "down_w": _conv_w(next(keys), cout, cin, 1, 1),
            "down_bn": _bn(next(keys), cout),
        }
        blocks.append(blk)
        cin = cout
    params["blocks"] = blocks
    params["fc"] = {
        "w": 0.05 * jax.random.normal(next(keys), (num_classes, cin), jnp.float32),
        "b": 0.01 * jax.random.normal(next(keys), (num_classes,), jnp.float32),
    }
    return params


# ------------------------------------------------------------------------------ forward ---

def block_forward(x, p, cin_real):
    """Bottleneck block; x is (N,H,W,CPAD) with `cin_real` valid channels (rest zero)."""
    cout = p["conv1_w"].shape[0]

    sc1, b1 = fold_bn_padded(p["bn1"], cout)
    out = conv1x1_bn_act(x, p["conv1_w"], cin_real, sc1, b1, stride=1, act="relu")

    sc2, b2 = fold_bn_padded(p["bn2"], cout)
    w2_dense = expand_grouped_weight(p["conv2_w"], p["groups"])      # block-diag dense weight
    out = conv_kxk_bn_act(out[..., :cout], w2_dense, sc2, b2,
                          stride=p["stride"], padding=1, act="relu")

    scd, bd = fold_bn_padded(p["down_bn"], cout)
    short = conv1x1_bn_act(x, p["down_w"], cin_real, scd, bd, stride=p["stride"], act=None)

    n, h, w_, _ = out.shape
    sc3, b3 = fold_bn_padded(p["bn3"], cout)
    # conv3 + BN + residual add + ReLU fused into one kernel epilogue.
    out = conv1x1_bn_act(out, p["conv3_w"], cout, sc3, b3, stride=1, act="relu",
                         short=short.reshape(n * h * w_, CPAD))
    return out, cout


def forward(params, x_nchw):
    x = jnp.transpose(x_nchw, (0, 2, 3, 1)).astype(jnp.float32)      # NCHW -> NHWC
    stem_w_arr = params["stem"]["w"]
    cin = stem_w_arr.shape[0]
    scs, bss = fold_bn_padded(params["stem"]["bn"], cin)
    x = conv_kxk_bn_act(x, stem_w_arr, scs, bss, stride=2, padding=1, act="relu")
    for bp in params["blocks"]:
        x, cin = block_forward(x, bp, cin)
    n, h, w_, _ = x.shape
    logits = gap_fc(x.reshape(n, h * w_, CPAD), params["fc"]["w"], params["fc"]["b"], cin)
    return logits                                                    # (N, 3)

# TODO(synk): pretrained timm weights cannot be loaded; SE blocks (RegNetY variants) and
#             drop_path (rate=0, a no-op here) are not modeled since encoder_name is unspecified.


if __name__ == "__main__":
    key = jax.random.PRNGKey(0)
    kp, kx = jax.random.split(key)
    params = init_params(kp)
    x = jax.random.normal(kx, (2, 3, 32, 32), jnp.float32)           # NCHW like PyTorch
    fwd = jax.jit(functools.partial(forward, params))
    y = jax.block_until_ready(fwd(x))
    assert y.shape == (2, 3) and y.dtype == jnp.float32
    print("KERNEL_OK")
</pallas_src>

<mosaic_0001>
module attributes {stable_mosaic.version = 11 : i64} {
  func.func @_mm_epilogue_kernel(%arg0: i32, %arg1: memref<256x32xf32, #tpu.memory_space<vmem>>, %arg2: memref<32x128xbf16, #tpu.memory_space<vmem>>, %arg3: memref<1x128xf32, #tpu.memory_space<vmem>>, %arg4: memref<1x128xf32, #tpu.memory_space<vmem>>, %arg5: memref<256x128xf32, #tpu.memory_space<vmem>>) attributes {dimension_semantics = [#tpu.dimension_semantics<parallel>], iteration_bounds = array<i64: 2>, scalar_prefetch = 0 : i64, scratch_operands = 0 : i64, tpu.core_type = #tpu.core_type<tc>, window_params = [{transform_indices = @transform_0, window_bounds = array<i64: 256, 32>}, {pipeline_mode = #tpu.pipeline_mode<synchronous>, transform_indices = @transform_1, window_bounds = array<i64: 32, 128>}, {pipeline_mode = #tpu.pipeline_mode<synchronous>, transform_indices = @transform_2, window_bounds = array<i64: 1, 128>}, {pipeline_mode = #tpu.pipeline_mode<synchronous>, transform_indices = @transform_3, window_bounds = array<i64: 1, 128>}, {transform_indices = @transform_4, window_bounds = array<i64: 256, 128>}]} {
    %c0 = arith.constant 0 : index
    %c0_0 = arith.constant 0 : index
    %0 = vector.load %arg1[%c0, %c0_0] : memref<256x32xf32, #tpu.memory_space<vmem>>, vector<256x32xf32>
    %1 = arith.truncf %0 : vector<256x32xf32> to vector<256x32xbf16>
    %c0_1 = arith.constant 0 : index
    %c0_2 = arith.constant 0 : index
    %2 = vector.load %arg2[%c0_1, %c0_2] : memref<32x128xbf16, #tpu.memory_space<vmem>>, vector<32x128xbf16>
    %cst = arith.constant dense<0.000000e+00> : vector<256x128xf32>
    %3 = tpu.matmul %1, %2, %cst {dimension_numbers = #tpu.dot_dimension_numbers<[1], [0], [0], [1], [0, 0, 1, 1], [], []>} : vector<256x32xbf16>, vector<32x128xbf16>, vector<256x128xf32> -> vector<256x128xf32>
    %c0_3 = arith.constant 0 : index
    %c0_4 = arith.constant 0 : index
    %4 = vector.load %arg3[%c0_3, %c0_4] : memref<1x128xf32, #tpu.memory_space<vmem>>, vector<1x128xf32>
    %5 = vector.broadcast %4 : vector<1x128xf32> to vector<256x128xf32>
    %6 = arith.mulf %3, %5 : vector<256x128xf32>
    %c0_5 = arith.constant 0 : index
    %c0_6 = arith.constant 0 : index
    %7 = vector.load %arg4[%c0_5, %c0_6] : memref<1x128xf32, #tpu.memory_space<vmem>>, vector<1x128xf32>
    %8 = vector.broadcast %7 : vector<1x128xf32> to vector<256x128xf32>
    %9 = arith.addf %6, %8 : vector<256x128xf32>
    %cst_7 = arith.constant 0.000000e+00 : f32
    %10 = vector.broadcast %cst_7 : f32 to vector<256x128xf32>
    %11 = arith.maximumf %9, %10 : vector<256x128xf32>
    %c0_8 = arith.constant 0 : index
    %c0_9 = arith.constant 0 : index
    %12 = vector.load %arg5[%c0_8, %c0_9] : memref<256x128xf32, #tpu.memory_space<vmem>>, vector<256x128xf32>
    tpu.vector_store %arg5[%c0_8, %c0_9], %11 {strides = array<i32>} : memref<256x128xf32, #tpu.memory_space<vmem>>, vector<256x128xf32>,
    return
  }
  func.func @transform_0(%arg0: i32) -> (i32, i32) {
    %c0_i32 = arith.constant 0 : i32
    %c0_i32_0 = arith.constant 0 : i32
    return %arg0, %c0_i32 : i32, i32
  }
  func.func @transform_1(%arg0: i32) -> (i32, i32) {
    %c0_i32 = arith.constant 0 : i32
    %c0_i32_0 = arith.constant 0 : i32
    %c0_i32_1 = arith.constant 0 : i32
    return %c0_i32, %c0_i32_0 : i32, i32
  }
  func.func @transform_2(%arg0: i32) -> (i32, i32) {
    %c0_i32 = arith.constant 0 : i32
    %c0_i32_0 = arith.constant 0 : i32
    %c0_i32_1 = arith.constant 0 : i32
    return %c0_i32, %c0_i32_0 : i32, i32
  }
  func.func @transform_3(%arg0: i32) -> (i32, i32) {
    %c0_i32 = arith.constant 0 : i32
    %c0_i32_0 = arith.constant 0 : i32
    %c0_i32_1 = arith.constant 0 : i32
    return %c0_i32, %c0_i32_0 : i32, i32
  }
  func.func @transform_4(%arg0: i32) -> (i32, i32) {
    %c0_i32 = arith.constant 0 : i32
    %c0_i32_0 = arith.constant 0 : i32
    return %arg0, %c0_i32 : i32, i32
  }
}

module attributes {stable_mosaic.version = 11 : i64} {
  func.func @_mm_epilogue_kernel(%arg0: i32, %arg1: memref<256x128xf32, #tpu.memory_space<vmem>>, %arg2: memref<128x128xbf16, #tpu.memory_space<vmem>>, %arg3: memref<1x128xf32, #tpu.memory_space<vmem>>, %arg4: memref<1x128xf32, #tpu.memory_space<vmem>>, %arg5: memref<256x128xf32, #tpu.memory_space<vmem>>) attributes {dimension_semantics = [#tpu.dimension_semantics<parallel>], iteration_bounds = array<i64: 2>, scalar_prefetch = 0 : i64, scratch_operands = 0 : i64, tpu.core_type = #tpu.core_type<tc>, window_params = [{transform_indices = @transform_0, window_bounds = array<i64: 256, 128>}, {pipeline_mode = #tpu.pipeline_mode<synchronous>, transform_indices = @transform_1, window_bounds = array<i64: 128, 128>}, {pipeline_mode = #tpu.pipeline_mode<synchronous>, transform_indices = @transform_2, window_bounds = array<i64: 1, 128>}, {pipeline_mode = #tpu.pipeline_mode<synchronous>, transform_indices = @transform_3, window_bounds = array<i64: 1, 128>}, {transform_indices = @transform_4, window_bounds = array<i64: 256, 128>}]} {
    %c0 = arith.constant 0 : index
    %c0_0 = arith.constant 0 : index
    %0 = vector.load %arg1[%c0, %c0_0] : memref<256x128xf32, #tpu.memory_space<vmem>>, vector<256x128xf32>
    %1 = arith.truncf %0 : vector<256x128xf32> to vector<256x128xbf16>
    %c0_1 = arith.constant 0 : index
    %c0_2 = arith.constant 0 : index
    %2 = vector.load %arg2[%c0_1, %c0_2] : memref<128x128xbf16, #tpu.memory_space<vmem>>, vector<128x128xbf16>
    %cst = arith.constant dense<0.000000e+00> : vector<256x128xf32>
    %3 = tpu.matmul %1, %2, %cst {dimension_numbers = #tpu.dot_dimension_numbers<[1], [0], [0], [1], [0, 0, 1, 1], [], []>} : vector<256x128xbf16>, vector<128x128xbf16>, vector<256x128xf32> -> vector<256x128xf32>
    %c0_3 = arith.constant 0 : index
    %c0_4 = arith.constant 0 : index
    %4 = vector.load %arg3[%c0_3, %c0_4] : memref<1x128xf32, #tpu.memory_space<vmem>>, vector<1x128xf32>
    %5 = vector.broadcast %4 : vector<1x128xf32> to vector<256x128xf32>
    %6 = arith.mulf %3, %5 : vector<256x128xf32>
    %c0_5 = arith.constant 0 : index
    %c0_6 = arith.constant 0 : index
    %7 = vector.load %arg4[%c0_5, %c0_6] : memref<1x128xf32, #tpu.memory_space<vmem>>, vector<1x128xf32>
    %8 = vector.broadcast %7 : vector<1x128xf32> to vector<256x128xf32>
    %9 = arith.addf %6, %8 : vector<256x128xf32>
    %cst_7 = arith.constant 0.000000e+00 : f32
    %10 = vector.broadcast %cst_7 : f32 to vector<256x128xf32>
    %11 = arith.maximumf %9, %10 : vector<256x128xf32>
    %c0_8 = arith.constant 0 : index
    %c0_9 = arith.constant 0 : index
    %12 = vector.load %arg5[%c0_8, %c0_9] : memref<256x128xf32, #tpu.memory_space<vmem>>, vector<256x128xf32>
    tpu.vector_store %arg5[%c0_8, %c0_9], %11 {strides = array<i32>} : memref<256x128xf32, #tpu.memory_space<vmem>>, vector<256x128xf32>,
    return
  }
  func.func @transform_0(%arg0: i32) -> (i32, i32) {
    %c0_i32 = arith.constant 0 : i32
    %c0_i32_0 = arith.constant 0 : i32
    return %arg0, %c0_i32 : i32, i32
  }
  func.func @transform_1(%arg0: i32) -> (i32, i32) {
    %c0_i32 = arith.constant 0 : i32
    %c0_i32_0 = arith.constant 0 : i32
    %c0_i32_1 = arith.constant 0 : i32
    return %c0_i32, %c0_i32_0 : i32, i32
  }
  func.func @transform_2(%arg0: i32) -> (i32, i32) {
    %c0_i32 = arith.constant 0 : i32
    %c0_i32_0 = arith.constant 0 : i32
    %c0_i32_1 = arith.constant 0 : i32
    return %c0_i32, %c0_i32_0 : i32, i32
  }
  func.func @transform_3(%arg0: i32) -> (i32, i32) {
    %c0_i32 = arith.constant 0 : i32
    %c0_i32_0 = arith.constant 0 : i32
    %c0_i32_1 = arith.constant 0 : i32
    return %c0_i32, %c0_i32_0 : i32, i32
  }
  func.func @transform_4(%arg0: i32) -> (i32, i32) {
    %c0_i32 = arith.constant 0 : i32
    %c0_i32_0 = arith.constant 0 : i32
    return %arg0, %c0_i32 : i32, i32
  }
}

module attributes {stable_mosaic.version = 11 : i64} {
  func.func @_mm_epilogue_kernel(%arg0: i32, %arg1: memref<128x128xf32, #tpu.memory_space<vmem>>, %arg2: memref<128x128xbf16, #tpu.memory_space<vmem>>, %arg3: memref<1x128xf32, #tpu.memory_space<vmem>>, %arg4: memref<1x128xf32, #tpu.memory_space<vmem>>, %arg5: memref<128x128xf32, #tpu.memory_space<vmem>>) attributes {dimension_semantics = [#tpu.dimension_semantics<parallel>], iteration_bounds = array<i64: 1>, scalar_prefetch = 0 : i64, scratch_operands = 0 : i64, tpu.core_type = #tpu.core_type<tc>, window_params = [{transform_indices = @transform_0, window_bounds = array<i64: 128, 128>}, {pipeline_mode = #tpu.pipeline_mode<synchronous>, transform_indices = @transform_1, window_bounds = array<i64: 128, 128>}, {pipeline_mode = #tpu.pipeline_mode<synchronous>, transform_indices = @transform_2, window_bounds = array<i64: 1, 128>}, {pipeline_mode = #tpu.pipeline_mode<synchronous>, transform_indices = @transform_3, window_bounds = array<i64: 1, 128>}, {transform_indices = @transform_4, window_bounds = array<i64: 128, 128>}]} {
    %c0 = arith.constant 0 : index
    %c0_0 = arith.constant 0 : index
    %0 = vector.load %arg1[%c0, %c0_0] : memref<128x128xf32, #tpu.memory_space<vmem>>, vector<128x128xf32>
    %1 = arith.truncf %0 : vector<128x128xf32> to vector<128x128xbf16>
    %c0_1 = arith.constant 0 : index
    %c0_2 = arith.constant 0 : index
    %2 = vector.load %arg2[%c0_1, %c0_2] : memref<128x128xbf16, #tpu.memory_space<vmem>>, vector<128x128xbf16>
    %cst = arith.constant dense<0.000000e+00> : vector<128x128xf32>
    %3 = tpu.matmul %1, %2, %cst {dimension_numbers = #tpu.dot_dimension_numbers<[1], [0], [0], [1], [0, 0, 1, 1], [], []>} : vector<128x128xbf16>, vector<128x128xbf16>, vector<128x128xf32> -> vector<128x128xf32>
    %c0_3 = arith.constant 0 : index
    %c0_4 = arith.constant 0 : index
    %4 = vector.load %arg3[%c0_3, %c0_4] : memref<1x128xf32, #tpu.memory_space<vmem>>, vector<1x128xf32>
    %5 = vector.broadcast %4 : vector<1x128xf32> to vector<128x128xf32>
    %6 = arith.mulf %3, %5 : vector<128x128xf32>
    %c0_5 = arith.constant 0 : index
    %c0_6 = arith.constant 0 : index
    %7 = vector.load %arg4[%c0_5, %c0_6] : memref<1x128xf32, #tpu.memory_space<vmem>>, vector<1x128xf32>
    %8 = vector.broadcast %7 : vector<1x128xf32> to vector<128x128xf32>
    %9 = arith.addf %6, %8 : vector<128x128xf32>
    %c0_7 = arith.constant 0 : index
    %c0_8 = arith.constant 0 : index
    %10 = vector.load %arg5[%c0_7, %c0_8] : memref<128x128xf32, #tpu.memory_space<vmem>>, vector<128x128xf32>
    tpu.vector_store %arg5[%c0_7, %c0_8], %9 {strides = array<i32>} : memref<128x128xf32, #tpu.memory_space<vmem>>, vector<128x128xf32>,
    return
  }
  func.func @transform_0(%arg0: i32) -> (i32, i32) {
    %c0_i32 = arith.constant 0 : i32
    %c0_i32_0 = arith.constant 0 : i32
    return %arg0, %c0_i32 : i32, i32
  }
  func.func @transform_1(%arg0: i32) -> (i32, i32) {
    %c0_i32 = arith.constant 0 : i32
    %c0_i32_0 = arith.constant 0 : i32
    %c0_i32_1 = arith.constant 0 : i32
    return %c0_i32, %c0_i32_0 : i32, i32
  }
  func.func @transform_2(%arg0: i32) -> (i32, i32) {
    %c0_i32 = arith.constant 0 : i32
    %c0_i32_0 = arith.constant 0 : i32
    %c0_i32_1 = arith.constant 0 : i32
    return %c0_i32, %c0_i32_0 : i32, i32
  }
  func.func @transform_3(%arg0: i32) -> (i32, i32) {
    %c0_i32 = arith.constant 0 : i32
    %c0_i32_0 = arith.constant 0 : i32
    %c0_i32_1 = arith.constant 0 : i32
    return %c0_i32, %c0_i32_0 : i32, i32
  }
  func.func @transform_4(%arg0: i32) -> (i32, i32) {
    %c0_i32 = arith.constant 0 : i32
    %c0_i32_0 = arith.constant 0 : i32
    return %arg0, %c0_i32 : i32, i32
  }
}

module attributes {stable_mosaic.version = 11 : i64} {
  func.func @_mm_epilogue_kernel(%arg0: i32, %arg1: memref<128x144xf32, #tpu.memory_space<vmem>>, %arg2: memref<144x128xbf16, #tpu.memory_space<vmem>>, %arg3: memref<1x128xf32, #tpu.memory_space<vmem>>, %arg4: memref<1x128xf32, #tpu.memory_space<vmem>>, %arg5: memref<128x128xf32, #tpu.memory_space<vmem>>) attributes {dimension_semantics = [#tpu.dimension_semantics<parallel>], iteration_bounds = array<i64: 1>, scalar_prefetch = 0 : i64, scratch_operands = 0 : i64, tpu.core_type = #tpu.core_type<tc>, window_params = [{transform_indices = @transform_0, window_bounds = array<i64: 128, 144>}, {pipeline_mode = #tpu.pipeline_mode<synchronous>, transform_indices = @transform_1, window_bounds = array<i64: 144, 128>}, {pipeline_mode = #tpu.pipeline_mode<synchronous>, transform_indices = @transform_2, window_bounds = array<i64: 1, 128>}, {pipeline_mode = #tpu.pipeline_mode<synchronous>, transform_indices = @transform_3, window_bounds = array<i64: 1, 128>}, {transform_indices = @transform_4, window_bounds = array<i64: 128, 128>}]} {
    %c0 = arith.constant 0 : index
    %c0_0 = arith.constant 0 : index
    %0 = vector.load %arg1[%c0, %c0_0] : memref<128x144xf32, #tpu.memory_space<vmem>>, vector<128x144xf32>
    %1 = arith.truncf %0 : vector<128x144xf32> to vector<128x144xbf16>
    %c0_1 = arith.constant 0 : index
    %c0_2 = arith.constant 0 : index
    %2 = vector.load %arg2[%c0_1, %c0_2] : memref<144x128xbf16, #tpu.memory_space<vmem>>, vector<144x128xbf16>
    %cst = arith.constant dense<0.000000e+00> : vector<128x128xf32>
    %3 = tpu.matmul %1, %2, %cst {dimension_numbers = #tpu.dot_dimension_numbers<[1], [0], [0], [1], [0, 0, 1, 1], [], []>} : vector<128x144xbf16>, vector<144x128xbf16>, vector<128x128xf32> -> vector<128x128xf32>
    %c0_3 = arith.constant 0 : index
    %c0_4 = arith.constant 0 : index
    %4 = vector.load %arg3[%c0_3, %c0_4] : memref<1x128xf32, #tpu.memory_space<vmem>>, vector<1x128xf32>
    %5 = vector.broadcast %4 : vector<1x128xf32> to vector<128x128xf32>
    %6 = arith.mulf %3, %5 : vector<128x128xf32>
    %c0_5 = arith.constant 0 : index
    %c0_6 = arith.constant 0 : index
    %7 = vector.load %arg4[%c0_5, %c0_6] : memref<1x128xf32, #tpu.memory_space<vmem>>, vector<1x128xf32>
    %8 = vector.broadcast %7 : vector<1x128xf32> to vector<128x128xf32>
    %9 = arith.addf %6, %8 : vector<128x128xf32>
    %cst_7 = arith.constant 0.000000e+00 : f32
    %10 = vector.broadcast %cst_7 : f32 to vector<128x128xf32>
    %11 = arith.maximumf %9, %10 : vector<128x128xf32>
    %c0_8 = arith.constant 0 : index
    %c0_9 = arith.constant 0 : index
    %12 = vector.load %arg5[%c0_8, %c0_9] : memref<128x128xf32, #tpu.memory_space<vmem>>, vector<128x128xf32>
    tpu.vector_store %arg5[%c0_8, %c0_9], %11 {strides = array<i32>} : memref<128x128xf32, #tpu.memory_space<vmem>>, vector<128x128xf32>,
    return
  }
  func.func @transform_0(%arg0: i32) -> (i32, i32) {
    %c0_i32 = arith.constant 0 : i32
    %c0_i32_0 = arith.constant 0 : i32
    return %arg0, %c0_i32 : i32, i32
  }
  func.func @transform_1(%arg0: i32) -> (i32, i32) {
    %c0_i32 = arith.constant 0 : i32
    %c0_i32_0 = arith.constant 0 : i32
    %c0_i32_1 = arith.constant 0 : i32
    return %c0_i32, %c0_i32_0 : i32, i32
  }
  func.func @transform_2(%arg0: i32) -> (i32, i32) {
    %c0_i32 = arith.constant 0 : i32
    %c0_i32_0 = arith.constant 0 : i32
    %c0_i32_1 = arith.constant 0 : i32
    return %c0_i32, %c0_i32_0 : i32, i32
  }
  func.func @transform_3(%arg0: i32) -> (i32, i32) {
    %c0_i32 = arith.constant 0 : i32
    %c0_i32_0 = arith.constant 0 : i32
    %c0_i32_1 = arith.constant 0 : i32
    return %c0_i32, %c0_i32_0 : i32, i32
  }
  func.func @transform_4(%arg0: i32) -> (i32, i32) {
    %c0_i32 = arith.constant 0 : i32
    %c0_i32_0 = arith.constant 0 : i32
    return %arg0, %c0_i32 : i32, i32
  }
}

module attributes {stable_mosaic.version = 11 : i64} {
  func.func @_mm_epilogue_kernel(%arg0: i32, %arg1: memref<128x128xf32, #tpu.memory_space<vmem>>, %arg2: memref<128x128xbf16, #tpu.memory_space<vmem>>, %arg3: memref<1x128xf32, #tpu.memory_space<vmem>>, %arg4: memref<1x128xf32, #tpu.memory_space<vmem>>, %arg5: memref<128x128xf32, #tpu.memory_space<vmem>>, %arg6: memref<128x128xf32, #tpu.memory_space<vmem>>) attributes {dimension_semantics = [#tpu.dimension_semantics<parallel>], iteration_bounds = array<i64: 1>, scalar_prefetch = 0 : i64, scratch_operands = 0 : i64, tpu.core_type = #tpu.core_type<tc>, window_params = [{transform_indices = @transform_0, window_bounds = array<i64: 128, 128>}, {pipeline_mode = #tpu.pipeline_mode<synchronous>, transform_indices = @transform_1, window_bounds = array<i64: 128, 128>}, {pipeline_mode = #tpu.pipeline_mode<synchronous>, transform_indices = @transform_2, window_bounds = array<i64: 1, 128>}, {pipeline_mode = #tpu.pipeline_mode<synchronous>, transform_indices = @transform_3, window_bounds = array<i64: 1, 128>}, {transform_indices = @transform_4, window_bounds = array<i64: 128, 128>}, {transform_indices = @transform_5, window_bounds = array<i64: 128, 128>}]} {
    %c0 = arith.constant 0 : index
    %c0_0 = arith.constant 0 : index
    %0 = vector.load %arg1[%c0, %c0_0] : memref<128x128xf32, #tpu.memory_space<vmem>>, vector<128x128xf32>
    %1 = arith.truncf %0 : vector<128x128xf32> to vector<128x128xbf16>
    %c0_1 = arith.constant 0 : index
    %c0_2 = arith.constant 0 : index
    %2 = vector.load %arg2[%c0_1, %c0_2] : memref<128x128xbf16, #tpu.memory_space<vmem>>, vector<128x128xbf16>
    %cst = arith.constant dense<0.000000e+00> : vector<128x128xf32>
    %3 = tpu.matmul %1, %2, %cst {dimension_numbers = #tpu.dot_dimension_numbers<[1], [0], [0], [1], [0, 0, 1, 1], [], []>} : vector<128x128xbf16>, vector<128x128xbf16>, vector<128x128xf32> -> vector<128x128xf32>
    %c0_3 = arith.constant 0 : index
    %c0_4 = arith.constant 0 : index
    %4 = vector.load %arg3[%c0_3, %c0_4] : memref<1x128xf32, #tpu.memory_space<vmem>>, vector<1x128xf32>
    %5 = vector.broadcast %4 : vector<1x128xf32> to vector<128x128xf32>
    %6 = arith.mulf %3, %5 : vector<128x128xf32>
    %c0_5 = arith.constant 0 : index
    %c0_6 = arith.constant 0 : index
    %7 = vector.load %arg4[%c0_5, %c0_6] : memref<1x128xf32, #tpu.memory_space<vmem>>, vector<1x128xf32>
    %8 = vector.broadcast %7 : vector<1x128xf32> to vector<128x128xf32>
    %9 = arith.addf %6, %8 : vector<128x128xf32>
    %c0_7 = arith.constant 0 : index
    %c0_8 = arith.constant 0 : index
    %10 = vector.load %arg5[%c0_7, %c0_8] : memref<128x128xf32, #tpu.memory_space<vmem>>, vector<128x128xf32>
    %11 = arith.addf %9, %10 : vector<128x128xf32>
    %cst_9 = arith.constant 0.000000e+00 : f32
    %12 = vector.broadcast %cst_9 : f32 to vector<128x128xf32>
    %13 = arith.maximumf %11, %12 : vector<128x128xf32>
    %c0_10 = arith.constant 0 : index
    %c0_11 = arith.constant 0 : index
    %14 = vector.load %arg6[%c0_10, %c0_11] : memref<128x128xf32, #tpu.memory_space<vmem>>, vector<128x128xf32>
    tpu.vector_store %arg6[%c0_10, %c0_11], %13 {strides = array<i32>} : memref<128x128xf32, #tpu.memory_space<vmem>>, vector<128x128xf32>,
    return
  }
  func.func @transform_0(%arg0: i32) -> (i32, i32) {
    %c0_i32 = arith.constant 0 : i32
    %c0_i32_0 = arith.constant 0 : i32
    return %arg0, %c0_i32 : i32, i32
  }
  func.func @transform_1(%arg0: i32) -> (i32, i32) {
    %c0_i32 = arith.constant 0 : i32
    %c0_i32_0 = arith.constant 0 : i32
    %c0_i32_1 = arith.constant 0 : i32
    return %c0_i32, %c0_i32_0 : i32, i32
  }
  func.func @transform_2(%arg0: i32) -> (i32, i32) {
    %c0_i32 = arith.constant 0 : i32
    %c0_i32_0 = arith.constant 0 : i32
    %c0_i32_1 = arith.constant 0 : i32
    return %c0_i32, %c0_i32_0 : i32, i32
  }
  func.func @transform_3(%arg0: i32) -> (i32, i32) {
    %c0_i32 = arith.constant 0 : i32
    %c0_i32_0 = arith.constant 0 : i32
    %c0_i32_1 = arith.constant 0 : i32
    return %c0_i32, %c0_i32_0 : i32, i32
  }
  func.func @transform_4(%arg0: i32) -> (i32, i32) {
    %c0_i32 = arith.constant 0 : i32
    %c0_i32_0 = arith.constant 0 : i32
    return %arg0, %c0_i32 : i32, i32
  }
  func.func @transform_5(%arg0: i32) -> (i32, i32) {
    %c0_i32 = arith.constant 0 : i32
    %c0_i32_0 = arith.constant 0 : i32
    return %arg0, %c0_i32 : i32, i32
  }
}

module attributes {stable_mosaic.version = 11 : i64} {
  func.func @_mm_epilogue_kernel(%arg0: i32, %arg1: memref<32x128xf32, #tpu.memory_space<vmem>>, %arg2: memref<128x128xbf16, #tpu.memory_space<vmem>>, %arg3: memref<1x128xf32, #tpu.memory_space<vmem>>, %arg4: memref<1x128xf32, #tpu.memory_space<vmem>>, %arg5: memref<32x128xf32, #tpu.memory_space<vmem>>) attributes {dimension_semantics = [#tpu.dimension_semantics<parallel>], iteration_bounds = array<i64: 1>, scalar_prefetch = 0 : i64, scratch_operands = 0 : i64, tpu.core_type = #tpu.core_type<tc>, window_params = [{transform_indices = @transform_0, window_bounds = array<i64: 32, 128>}, {pipeline_mode = #tpu.pipeline_mode<synchronous>, transform_indices = @transform_1, window_bounds = array<i64: 128, 128>}, {pipeline_mode = #tpu.pipeline_mode<synchronous>, transform_indices = @transform_2, window_bounds = array<i64: 1, 128>}, {pipeline_mode = #tpu.pipeline_mode<synchronous>, transform_indices = @transform_3, window_bounds = array<i64: 1, 128>}, {transform_indices = @transform_4, window_bounds = array<i64: 32, 128>}]} {
    %c0 = arith.constant 0 : index
    %c0_0 = arith.constant 0 : index
    %0 = vector.load %arg1[%c0, %c0_0] : memref<32x128xf32, #tpu.memory_space<vmem>>, vector<32x128xf32>
    %1 = arith.truncf %0 : vector<32x128xf32> to vector<32x128xbf16>
    %c0_1 = arith.constant 0 : index
    %c0_2 = arith.constant 0 : index
    %2 = vector.load %arg2[%c0_1, %c0_2] : memref<128x128xbf16, #tpu.memory_space<vmem>>, vector<128x128xbf16>
    %cst = arith.constant dense<0.000000e+00> : vector<32x128xf32>
    %3 = tpu.matmul %1, %2, %cst {dimension_numbers = #tpu.dot_dimension_numbers<[1], [0], [0], [1], [0, 0, 1, 1], [], []>} : vector<32x128xbf16>, vector<128x128xbf16>, vector<32x128xf32> -> vector<32x128xf32>
    %c0_3 = arith.constant 0 : index
    %c0_4 = arith.constant 0 : index
    %4 = vector.load %arg3[%c0_3, %c0_4] : memref<1x128xf32, #tpu.memory_space<vmem>>, vector<1x128xf32>
    %5 = vector.broadcast %4 : vector<1x128xf32> to vector<32x128xf32>
    %6 = arith.mulf %3, %5 : vector<32x128xf32>
    %c0_5 = arith.constant 0 : index
    %c0_6 = arith.constant 0 : index
    %7 = vector.load %arg4[%c0_5, %c0_6] : memref<1x128xf32, #tpu.memory_space<vmem>>, vector<1x128xf32>
    %8 = vector.broadcast %7 : vector<1x128xf32> to vector<32x128xf32>
    %9 = arith.addf %6, %8 : vector<32x128xf32>
    %c0_7 = arith.constant 0 : index
    %c0_8 = arith.constant 0 : index
    %10 = vector.load %arg5[%c0_7, %c0_8] : memref<32x128xf32, #tpu.memory_space<vmem>>, vector<32x128xf32>
    tpu.vector_store %arg5[%c0_7, %c0_8], %9 {strides = array<i32>} : memref<32x128xf32, #tpu.memory_space<vmem>>, vector<32x128xf32>,
    return
  }
  func.func @transform_0(%arg0: i32) -> (i32, i32) {
    %c0_i32 = arith.constant 0 : i32
    %c0_i32_0 = arith.constant 0 : i32
    return %arg0, %c0_i32 : i32, i32
  }
  func.func @transform_1(%arg0: i32) -> (i32, i32) {
    %c0_i32 = arith.constant 0 : i32
    %c0_i32_0 = arith.constant 0 : i32
    %c0_i32_1 = arith.constant 0 : i32
    return %c0_i32, %c0_i32_0 : i32, i32
  }
  func.func @transform_2(%arg0: i32) -> (i32, i32) {
    %c0_i32 = arith.constant 0 : i32
    %c0_i32_0 = arith.constant 0 : i32
    %c0_i32_1 = arith.constant 0 : i32
    return %c0_i32, %c0_i32_0 : i32, i32
  }
  func.func @transform_3(%arg0: i32) -> (i32, i32) {
    %c0_i32 = arith.constant 0 : i32
    %c0_i32_0 = arith.constant 0 : i32
    %c0_i32_1 = arith.constant 0 : i32
    return %c0_i32, %c0_i32_0 : i32, i32
  }
  func.func @transform_4(%arg0: i32) -> (i32, i32) {
    %c0_i32 = arith.constant 0 : i32
    %c0_i32_0 = arith.constant 0 : i32
    return %arg0, %c0_i32 : i32, i32
  }
}

module attributes {stable_mosaic.version = 11 : i64} {
  func.func @_mm_epilogue_kernel(%arg0: i32, %arg1: memref<128x128xf32, #tpu.memory_space<vmem>>, %arg2: memref<128x128xbf16, #tpu.memory_space<vmem>>, %arg3: memref<1x128xf32, #tpu.memory_space<vmem>>, %arg4: memref<1x128xf32, #tpu.memory_space<vmem>>, %arg5: memref<128x128xf32, #tpu.memory_space<vmem>>) attributes {dimension_semantics = [#tpu.dimension_semantics<parallel>], iteration_bounds = array<i64: 1>, scalar_prefetch = 0 : i64, scratch_operands = 0 : i64, tpu.core_type = #tpu.core_type<tc>, window_params = [{transform_indices = @transform_0, window_bounds = array<i64: 128, 128>}, {pipeline_mode = #tpu.pipeline_mode<synchronous>, transform_indices = @transform_1, window_bounds = array<i64: 128, 128>}, {pipeline_mode = #tpu.pipeline_mode<synchronous>, transform_indices = @transform_2, window_bounds = array<i64: 1, 128>}, {pipeline_mode = #tpu.pipeline_mode<synchronous>, transform_indices = @transform_3, window_bounds = array<i64: 1, 128>}, {transform_indices = @transform_4, window_bounds = array<i64: 128, 128>}]} {
    %c0 = arith.constant 0 : index
    %c0_0 = arith.constant 0 : index
    %0 = vector.load %arg1[%c0, %c0_0] : memref<128x128xf32, #tpu.memory_space<vmem>>, vector<128x128xf32>
    %1 = arith.truncf %0 : vector<128x128xf32> to vector<128x128xbf16>
    %c0_1 = arith.constant 0 : index
    %c0_2 = arith.constant 0 : index
    %2 = vector.load %arg2[%c0_1, %c0_2] : memref<128x128xbf16, #tpu.memory_space<vmem>>, vector<128x128xbf16>
    %cst = arith.constant dense<0.000000e+00> : vector<128x128xf32>
    %3 = tpu.matmul %1, %2, %cst {dimension_numbers = #tpu.dot_dimension_numbers<[1], [0], [0], [1], [0, 0, 1, 1], [], []>} : vector<128x128xbf16>, vector<128x128xbf16>, vector<128x128xf32> -> vector<128x128xf32>
    %c0_3 = arith.constant 0 : index
    %c0_4 = arith.constant 0 : index
    %4 = vector.load %arg3[%c0_3, %c0_4] : memref<1x128xf32, #tpu.memory_space<vmem>>, vector<1x128xf32>
    %5 = vector.broadcast %4 : vector<1x128xf32> to vector<128x128xf32>
    %6 = arith.mulf %3, %5 : vector<128x128xf32>
    %c0_5 = arith.constant 0 : index
    %c0_6 = arith.constant 0 : index
    %7 = vector.load %arg4[%c0_5, %c0_6] : memref<1x128xf32, #tpu.memory_space<vmem>>, vector<1x128xf32>
    %8 = vector.broadcast %7 : vector<1x128xf32> to vector<128x128xf32>
    %9 = arith.addf %6, %8 : vector<128x128xf32>
    %cst_7 = arith.constant 0.000000e+00 : f32
    %10 = vector.broadcast %cst_7 : f32 to vector<128x128xf32>
    %11 = arith.maximumf %9, %10 : vector<128x128xf32>
    %c0_8 = arith.constant 0 : index
    %c0_9 = arith.constant 0 : index
    %12 = vector.load %arg5[%c0_8, %c0_9] : memref<128x128xf32, #tpu.memory_space<vmem>>, vector<128x128xf32>
    tpu.vector_store %arg5[%c0_8, %c0_9], %11 {strides = array<i32>} : memref<128x128xf32, #tpu.memory_space<vmem>>, vector<128x128xf32>,
    return
  }
  func.func @transform_0(%arg0: i32) -> (i32, i32) {
    %c0_i32 = arith.constant 0 : i32
    %c0_i32_0 = arith.constant 0 : i32
    return %arg0, %c0_i32 : i32, i32
  }
  func.func @transform_1(%arg0: i32) -> (i32, i32) {
    %c0_i32 = arith.constant 0 : i32
    %c0_i32_0 = arith.constant 0 : i32
    %c0_i32_1 = arith.constant 0 : i32
    return %c0_i32, %c0_i32_0 : i32, i32
  }
  func.func @transform_2(%arg0: i32) -> (i32, i32) {
    %c0_i32 = arith.constant 0 : i32
    %c0_i32_0 = arith.constant 0 : i32
    %c0_i32_1 = arith.constant 0 : i32
    return %c0_i32, %c0_i32_0 : i32, i32
  }
  func.func @transform_3(%arg0: i32) -> (i32, i32) {
    %c0_i32 = arith.constant 0 : i32
    %c0_i32_0 = arith.constant 0 : i32
    %c0_i32_1 = arith.constant 0 : i32
    return %c0_i32, %c0_i32_0 : i32, i32
  }
  func.func @transform_4(%arg0: i32) -> (i32, i32) {
    %c0_i32 = arith.constant 0 : i32
    %c0_i32_0 = arith.constant 0 : i32
    return %arg0, %c0_i32 : i32, i32
  }
}

module attributes {stable_mosaic.version = 11 : i64} {
  func.func @_mm_epilogue_kernel(%arg0: i32, %arg1: memref<32x288xf32, #tpu.memory_space<vmem>>, %arg2: memref<288x128xbf16, #tpu.memory_space<vmem>>, %arg3: memref<1x128xf32, #tpu.memory_space<vmem>>, %arg4: memref<1x128xf32, #tpu.memory_space<vmem>>, %arg5: memref<32x128xf32, #tpu.memory_space<vmem>>) attributes {dimension_semantics = [#tpu.dimension_semantics<parallel>], iteration_bounds = array<i64: 1>, scalar_prefetch = 0 : i64, scratch_operands = 0 : i64, tpu.core_type = #tpu.core_type<tc>, window_params = [{transform_indices = @transform_0, window_bounds = array<i64: 32, 288>}, {pipeline_mode = #tpu.pipeline_mode<synchronous>, transform_indices = @transform_1, window_bounds = array<i64: 288, 128>}, {pipeline_mode = #tpu.pipeline_mode<synchronous>, transform_indices = @transform_2, window_bounds = array<i64: 1, 128>}, {pipeline_mode = #tpu.pipeline_mode<synchronous>, transform_indices = @transform_3, window_bounds = array<i64: 1, 128>}, {transform_indices = @transform_4, window_bounds = array<i64: 32, 128>}]} {
    %c0 = arith.constant 0 : index
    %c0_0 = arith.constant 0 : index
    %0 = vector.load %arg1[%c0, %c0_0] : memref<32x288xf32, #tpu.memory_space<vmem>>, vector<32x288xf32>
    %1 = arith.truncf %0 : vector<32x288xf32> to vector<32x288xbf16>
    %c0_1 = arith.constant 0 : index
    %c0_2 = arith.constant 0 : index
    %2 = vector.load %arg2[%c0_1, %c0_2] : memref<288x128xbf16, #tpu.memory_space<vmem>>, vector<288x128xbf16>
    %cst = arith.constant dense<0.000000e+00> : vector<32x128xf32>
    %3 = tpu.matmul %1, %2, %cst {dimension_numbers = #tpu.dot_dimension_numbers<[1], [0], [0], [1], [0, 0, 1, 1], [], []>} : vector<32x288xbf16>, vector<288x128xbf16>, vector<32x128xf32> -> vector<32x128xf32>
    %c0_3 = arith.constant 0 : index
    %c0_4 = arith.constant 0 : index
    %4 = vector.load %arg3[%c0_3, %c0_4] : memref<1x128xf32, #tpu.memory_space<vmem>>, vector<1x128xf32>
    %5 = vector.broadcast %4 : vector<1x128xf32> to vector<32x128xf32>
    %6 = arith.mulf %3, %5 : vector<32x128xf32>
    %c0_5 = arith.constant 0 : index
    %c0_6 = arith.constant 0 : index
    %7 = vector.load %arg4[%c0_5, %c0_6] : memref<1x128xf32, #tpu.memory_space<vmem>>, vector<1x128xf32>
    %8 = vector.broadcast %7 : vector<1x128xf32> to vector<32x128xf32>
    %9 = arith.addf %6, %8 : vector<32x128xf32>
    %cst_7 = arith.constant 0.000000e+00 : f32
    %10 = vector.broadcast %cst_7 : f32 to vector<32x128xf32>
    %11 = arith.maximumf %9, %10 : vector<32x128xf32>
    %c0_8 = arith.constant 0 : index
    %c0_9 = arith.constant 0 : index
    %12 = vector.load %arg5[%c0_8, %c0_9] : memref<32x128xf32, #tpu.memory_space<vmem>>, vector<32x128xf32>
    tpu.vector_store %arg5[%c0_8, %c0_9], %11 {strides = array<i32>} : memref<32x128xf32, #tpu.memory_space<vmem>>, vector<32x128xf32>,
    return
  }
  func.func @transform_0(%arg0: i32) -> (i32, i32) {
    %c0_i32 = arith.constant 0 : i32
    %c0_i32_0 = arith.constant 0 : i32
    return %arg0, %c0_i32 : i32, i32
  }
  func.func @transform_1(%arg0: i32) -> (i32, i32) {
    %c0_i32 = arith.constant 0 : i32
    %c0_i32_0 = arith.constant 0 : i32
    %c0_i32_1 = arith.constant 0 : i32
    return %c0_i32, %c0_i32_0 : i32, i32
  }
  func.func @transform_2(%arg0: i32) -> (i32, i32) {
    %c0_i32 = arith.constant 0 : i32
    %c0_i32_0 = arith.constant 0 : i32
    %c0_i32_1 = arith.constant 0 : i32
    return %c0_i32, %c0_i32_0 : i32, i32
  }
  func.func @transform_3(%arg0: i32) -> (i32, i32) {
    %c0_i32 = arith.constant 0 : i32
    %c0_i32_0 = arith.constant 0 : i32
    %c0_i32_1 = arith.constant 0 : i32
    return %c0_i32, %c0_i32_0 : i32, i32
  }
  func.func @transform_4(%arg0: i32) -> (i32, i32) {
    %c0_i32 = arith.constant 0 : i32
    %c0_i32_0 = arith.constant 0 : i32
    return %arg0, %c0_i32 : i32, i32
  }
}

module attributes {stable_mosaic.version = 11 : i64} {
  func.func @_mm_epilogue_kernel(%arg0: i32, %arg1: memref<32x128xf32, #tpu.memory_space<vmem>>, %arg2: memref<128x128xbf16, #tpu.memory_space<vmem>>, %arg3: memref<1x128xf32, #tpu.memory_space<vmem>>, %arg4: memref<1x128xf32, #tpu.memory_space<vmem>>, %arg5: memref<32x128xf32, #tpu.memory_space<vmem>>, %arg6: memref<32x128xf32, #tpu.memory_space<vmem>>) attributes {dimension_semantics = [#tpu.dimension_semantics<parallel>], iteration_bounds = array<i64: 1>, scalar_prefetch = 0 : i64, scratch_operands = 0 : i64, tpu.core_type = #tpu.core_type<tc>, window_params = [{transform_indices = @transform_0, window_bounds = array<i64: 32, 128>}, {pipeline_mode = #tpu.pipeline_mode<synchronous>, transform_indices = @transform_1, window_bounds = array<i64: 128, 128>}, {pipeline_mode = #tpu.pipeline_mode<synchronous>, transform_indices = @transform_2, window_bounds = array<i64: 1, 128>}, {pipeline_mode = #tpu.pipeline_mode<synchronous>, transform_indices = @transform_3, window_bounds = array<i64: 1, 128>}, {transform_indices = @transform_4, window_bounds = array<i64: 32, 128>}, {transform_indices = @transform_5, window_bounds = array<i64: 32, 128>}]} {
    %c0 = arith.constant 0 : index
    %c0_0 = arith.constant 0 : index
    %0 = vector.load %arg1[%c0, %c0_0] : memref<32x128xf32, #tpu.memory_space<vmem>>, vector<32x128xf32>
    %1 = arith.truncf %0 : vector<32x128xf32> to vector<32x128xbf16>
    %c0_1 = arith.constant 0 : index
    %c0_2 = arith.constant 0 : index
    %2 = vector.load %arg2[%c0_1, %c0_2] : memref<128x128xbf16, #tpu.memory_space<vmem>>, vector<128x128xbf16>
    %cst = arith.constant dense<0.000000e+00> : vector<32x128xf32>
    %3 = tpu.matmul %1, %2, %cst {dimension_numbers = #tpu.dot_dimension_numbers<[1], [0], [0], [1], [0, 0, 1, 1], [], []>} : vector<32x128xbf16>, vector<128x128xbf16>, vector<32x128xf32> -> vector<32x128xf32>
    %c0_3 = arith.constant 0 : index
    %c0_4 = arith.constant 0 : index
    %4 = vector.load %arg3[%c0_3, %c0_4] : memref<1x128xf32, #tpu.memory_space<vmem>>, vector<1x128xf32>
    %5 = vector.broadcast %4 : vector<1x128xf32> to vector<32x128xf32>
    %6 = arith.mulf %3, %5 : vector<32x128xf32>
    %c0_5 = arith.constant 0 : index
    %c0_6 = arith.constant 0 : index
    %7 = vector.load %arg4[%c0_5, %c0_6] : memref<1x128xf32, #tpu.memory_space<vmem>>, vector<1x128xf32>
    %8 = vector.broadcast %7 : vector<1x128xf32> to vector<32x128xf32>
    %9 = arith.addf %6, %8 : vector<32x128xf32>
    %c0_7 = arith.constant 0 : index
    %c0_8 = arith.constant 0 : index
    %10 = vector.load %arg5[%c0_7, %c0_8] : memref<32x128xf32, #tpu.memory_space<vmem>>, vector<32x128xf32>
    %11 = arith.addf %9, %10 : vector<32x128xf32>
    %cst_9 = arith.constant 0.000000e+00 : f32
    %12 = vector.broadcast %cst_9 : f32 to vector<32x128xf32>
    %13 = arith.maximumf %11, %12 : vector<32x128xf32>
    %c0_10 = arith.constant 0 : index
    %c0_11 = arith.constant 0 : index
    %14 = vector.load %arg6[%c0_10, %c0_11] : memref<32x128xf32, #tpu.memory_space<vmem>>, vector<32x128xf32>
    tpu.vector_store %arg6[%c0_10, %c0_11], %13 {strides = array<i32>} : memref<32x128xf32, #tpu.memory_space<vmem>>, vector<32x128xf32>,
    return
  }
  func.func @transform_0(%arg0: i32) -> (i32, i32) {
    %c0_i32 = arith.constant 0 : i32
    %c0_i32_0 = arith.constant 0 : i32
    return %arg0, %c0_i32 : i32, i32
  }
  func.func @transform_1(%arg0: i32) -> (i32, i32) {
    %c0_i32 = arith.constant 0 : i32
    %c0_i32_0 = arith.constant 0 : i32
    %c0_i32_1 = arith.constant 0 : i32
    return %c0_i32, %c0_i32_0 : i32, i32
  }
  func.func @transform_2(%arg0: i32) -> (i32, i32) {
    %c0_i32 = arith.constant 0 : i32
    %c0_i32_0 = arith.constant 0 : i32
    %c0_i32_1 = arith.constant 0 : i32
    return %c0_i32, %c0_i32_0 : i32, i32
  }
  func.func @transform_3(%arg0: i32) -> (i32, i32) {
    %c0_i32 = arith.constant 0 : i32
    %c0_i32_0 = arith.constant 0 : i32
    %c0_i32_1 = arith.constant 0 : i32
    return %c0_i32, %c0_i32_0 : i32, i32
  }
  func.func @transform_4(%arg0: i32) -> (i32, i32) {
    %c0_i32 = arith.constant 0 : i32
    %c0_i32_0 = arith.constant 0 : i32
    return %arg0, %c0_i32 : i32, i32
  }
  func.func @transform_5(%arg0: i32) -> (i32, i32) {
    %c0_i32 = arith.constant 0 : i32
    %c0_i32_0 = arith.constant 0 : i32
    return %arg0, %c0_i32 : i32, i32
  }
}

module attributes {stable_mosaic.version = 11 : i64} {
  func.func @_gap_fc_kernel(%arg0: i32, %arg1: memref<2x16x128xf32, #tpu.memory_space<vmem>>, %arg2: memref<128x128xf32, #tpu.memory_space<vmem>>, %arg3: memref<1x128xf32, #tpu.memory_space<vmem>>, %arg4: memref<2x128xf32, #tpu.memory_space<vmem>>) attributes {dimension_semantics = [#tpu.dimension_semantics<arbitrary>], iteration_bounds = array<i64: 1>, scalar_prefetch = 0 : i64, scratch_operands = 0 : i64, tpu.core_type = #tpu.core_type<tc>, window_params = [{pipeline_mode = #tpu.pipeline_mode<synchronous>, transform_indices = @transform_0, window_bounds = array<i64: 2, 16, 128>}, {pipeline_mode = #tpu.pipeline_mode<synchronous>, transform_indices = @transform_1, window_bounds = array<i64: 128, 128>}, {pipeline_mode = #tpu.pipeline_mode<synchronous>, transform_indices = @transform_2, window_bounds = array<i64: 1, 128>}, {pipeline_mode = #tpu.pipeline_mode<synchronous>, transform_indices = @transform_3, window_bounds = array<i64: 2, 128>}]} {
    %c0 = arith.constant 0 : index
    %c0_0 = arith.constant 0 : index
    %c0_1 = arith.constant 0 : index
    %0 = vector.load %arg1[%c0, %c0_0, %c0_1] : memref<2x16x128xf32, #tpu.memory_space<vmem>>, vector<2x16x128xf32>
    %cst = arith.constant dense<0.000000e+00> : vector<2x128xf32>
    %1 = vector.multi_reduction <add>, %0, %cst [1] : vector<2x16x128xf32> to vector<2x128xf32>
    %cst_2 = arith.constant 1.600000e+01 : f32
    %2 = vector.broadcast %cst_2 : f32 to vector<2x128xf32>
    %3 = arith.divf %1, %2 : vector<2x128xf32>
    %c0_3 = arith.constant 0 : index
    %c0_4 = arith.constant 0 : index
    %4 = vector.load %arg2[%c0_3, %c0_4] : memref<128x128xf32, #tpu.memory_space<vmem>>, vector<128x128xf32>
    %cst_5 = arith.constant dense<0.000000e+00> : vector<2x128xf32>
    %5 = tpu.matmul %3, %4, %cst_5 {dimension_numbers = #tpu.dot_dimension_numbers<[1], [0], [0], [1], [0, 0, 1, 1], [], []>} : vector<2x128xf32>, vector<128x128xf32>, vector<2x128xf32> -> vector<2x128xf32>
    %c0_6 = arith.constant 0 : index
    %c0_7 = arith.constant 0 : index
    %6 = vector.load %arg3[%c0_6, %c0_7] : memref<1x128xf32, #tpu.memory_space<vmem>>, vector<1x128xf32>
    %7 = vector.broadcast %6 : vector<1x128xf32> to vector<2x128xf32>
    %8 = arith.addf %5, %7 : vector<2x128xf32>
    %c0_8 = arith.constant 0 : index
    %c0_9 = arith.constant 0 : index
    %9 = vector.load %arg4[%c0_8, %c0_9] : memref<2x128xf32, #tpu.memory_space<vmem>>, vector<2x128xf32>
    tpu.vector_store %arg4[%c0_8, %c0_9], %8 {strides = array<i32>} : memref<2x128xf32, #tpu.memory_space<vmem>>, vector<2x128xf32>,
    return
  }
  func.func @transform_0(%arg0: i32) -> (i32, i32, i32) {
    %c0_i32 = arith.constant 0 : i32
    %c0_i32_0 = arith.constant 0 : i32
    %c0_i32_1 = arith.constant 0 : i32
    %c0_i32_2 = arith.constant 0 : i32
    return %c0_i32, %c0_i32_0, %c0_i32_1 : i32, i32, i32
  }
  func.func @transform_1(%arg0: i32) -> (i32, i32) {
    %c0_i32 = arith.constant 0 : i32
    %c0_i32_0 = arith.constant 0 : i32
    %c0_i32_1 = arith.constant 0 : i32
    return %c0_i32, %c0_i32_0 : i32, i32
  }
  func.func @transform_2(%arg0: i32) -> (i32, i32) {
    %c0_i32 = arith.constant 0 : i32
    %c0_i32_0 = arith.constant 0 : i32
    %c0_i32_1 = arith.constant 0 : i32
    return %c0_i32, %c0_i32_0 : i32, i32
  }
  func.func @transform_3(%arg0: i32) -> (i32, i32) {
    %c0_i32 = arith.constant 0 : i32
    %c0_i32_0 = arith.constant 0 : i32
    %c0_i32_1 = arith.constant 0 : i32
    return %c0_i32, %c0_i32_0 : i32, i32
  }
}

</mosaic_0001>

<bundles_post_ra>
// kernel: forward.13
= control target key start
LH: loop header
LB: loop body
LE: loop exit
PB: predicated region body
PF: predicated region fallthrough
CT: control target
= control target key end

     0   :  { %s502_s1 = inlined_call_operand.vmem [shape: bf16[128,128], index: 1, kind: input, shape index: {}]   ;;  %s503_s0 = inlined_call_operand.vmem [shape: f32[128,128], index: 0, kind: input, shape index: {}]   ;;  %s504_s2 = inlined_call_operand.vmem [shape: f32[1,128], index: 2, kind: input, shape index: {}]   ;;  %s505_s3 = inlined_call_operand.vmem [shape: f32[1,128], index: 3, kind: input, shape index: {}]   ;;  %s506_s4 = inlined_call_operand.vmem [shape: f32[128,128], index: 4, kind: output, shape index: {}]  }
   0x1   :  { %v343_v0 = vld [vmem:[%s502_s1] sm:$0xff]   ;;  %v344_v1 = vld [vmem:[%s502_s1 + $0x8] sm:$0xff]   ;;  %v345_v2 = vld [vmem:[%s502_s1 + $0x10] sm:$0xff]  }
   0x2   :  { %295 = vmatprep.subr.bf16.mxu0 %v343_v0  ;;  %327 = vmatprep.subr.bf16.mxu1 %v343_v0  ;;  %v346_v3 = vld [vmem:[%s502_s1 + $0x18] sm:$0xff]   ;;  %v18_v4 = vld [vmem:[%s503_s0] sm:$0xff]  ;;  %v19_v5 = vld [vmem:[%s503_s0 + $0x8] sm:$0xff] }
   0x3   :  { %296 = vmatpush3.bf16.msra.mxu0 %v343_v0  ;;  %335 = vmatpush3.bf16.msra.mxu1 %v343_v0  ;;  %v26_v6 = vld [vmem:[%s503_s0 + $0x40] sm:$0xff]  ;;  %v34_v7 = vpack.c.bf16 %v19_v5, %v18_v4  ;;  %v27_v8 = vld [vmem:[%s503_s0 + $0x48] sm:$0xff]  ;;  %v349_v12 = vld [vmem:[%s502_s1 + $0x30] sm:$0xff]  }
   0x4   :  { %297 = vmatprep.subr.bf16.mxu0 %v344_v1  ;;  %328 = vmatprep.subr.bf16.mxu1 %v344_v1  ;;  %v38_v9 = vpack.c.bf16 %v27_v8, %v26_v6  ;;  %v347_v10 = vld [vmem:[%s502_s1 + $0x20] sm:$0xff]   ;;  %v348_v11 = vld [vmem:[%s502_s1 + $0x28] sm:$0xff]   ;;  %v350_v13 = vld [vmem:[%s502_s1 + $0x38] sm:$0xff]  }
   0x5   :  { %311 = vmatprep.mubr.bf16.mxu0 %v34_v7  ;;  %v20_v14 = vld [vmem:[%s503_s0 + $0x10] sm:$0xff]  ;;  %v21_v15 = vld [vmem:[%s503_s0 + $0x18] sm:$0xff]  ;;  %v22_v18 = vld [vmem:[%s503_s0 + $0x20] sm:$0xff] }
   0x6   :  { %319 = vmatprep.mubr.bf16.mxu1 %v38_v9  ;;  %v28_v16 = vld [vmem:[%s503_s0 + $0x50] sm:$0xff]  ;;  %v29_v17 = vld [vmem:[%s503_s0 + $0x58] sm:$0xff]  ;;  %v23_v19 = vld [vmem:[%s503_s0 + $0x28] sm:$0xff]  ;;  %v35_v22 = vpack.c.bf16 %v21_v15, %v20_v14 }
   0x7   :  { %298 = vmatpush3.bf16.msra.mxu0 %v344_v1  ;;  %336 = vmatpush3.bf16.msra.mxu1 %v344_v1  ;;  %v30_v20 = vld [vmem:[%s503_s0 + $0x60] sm:$0xff]  ;;  %v31_v21 = vld [vmem:[%s503_s0 + $0x68] sm:$0xff]  ;;  %v39_v23 = vpack.c.bf16 %v29_v17, %v28_v16  ;;  %v36_v24 = vpack.c.bf16 %v23_v19, %v22_v18  ;;  %v24_v26 = vld [vmem:[%s503_s0 + $0x30] sm:$0xff] }
   0x8   :  { %299 = vmatprep.subr.bf16.mxu0 %v345_v2  ;;  %329 = vmatprep.subr.bf16.mxu1 %v345_v2  ;;  %v40_v25 = vpack.c.bf16 %v31_v21, %v30_v20  ;;  %v25_v27 = vld [vmem:[%s503_s0 + $0x38] sm:$0xff]  ;;  %v32_v28 = vld [vmem:[%s503_s0 + $0x70] sm:$0xff]  ;;  %v277_v32 = vld [vmem:[%s504_s2] ss:$0 sm:$0xff] }
   0x9   :  { %v33_v29 = vld [vmem:[%s503_s0 + $0x78] sm:$0xff]  ;;  %v37_v30 = vpack.c.bf16 %v25_v27, %v24_v26  ;;  %v278_v34 = vld [vmem:[%s505_s3] ss:$0 sm:$0xff] }
   0xa   :  { %v41_v31 = vpack.c.bf16 %v33_v29, %v32_v28 }
   0xb   :  { %300 = vmatpush3.bf16.msra.mxu0 %v345_v2  ;;  %337 = vmatpush3.bf16.msra.mxu1 %v345_v2 }
   0xc   :  { %301 = vmatprep.subr.bf16.mxu0 %v346_v3  ;;  %330 = vmatprep.subr.bf16.mxu1 %v346_v3 }
   0xf   :  { %302 = vmatpush3.bf16.msra.mxu0 %v346_v3  ;;  %338 = vmatpush3.bf16.msra.mxu1 %v346_v3 }
  0x10   :  { %303 = vmatprep.subr.bf16.mxu0 %v347_v10  ;;  %331 = vmatprep.subr.bf16.mxu1 %v347_v10 }
  0x13   :  { %304 = vmatpush3.bf16.msra.mxu0 %v347_v10  ;;  %339 = vmatpush3.bf16.msra.mxu1 %v347_v10 }
  0x14   :  { %305 = vmatprep.subr.bf16.mxu0 %v348_v11  ;;  %332 = vmatprep.subr.bf16.mxu1 %v348_v11 }
  0x17   :  { %306 = vmatpush3.bf16.msra.mxu0 %v348_v11  ;;  %340 = vmatpush3.bf16.msra.mxu1 %v348_v11 }
  0x18   :  { %307 = vmatprep.subr.bf16.mxu0 %v349_v12  ;;  %333 = vmatprep.subr.bf16.mxu1 %v349_v12 }
  0x1b   :  { %308 = vmatpush3.bf16.msra.mxu0 %v349_v12  ;;  %341 = vmatpush3.bf16.msra.mxu1 %v349_v12 }
  0x1c   :  { %309 = vmatprep.subr.bf16.mxu0 %v350_v13  ;;  %334 = vmatprep.subr.bf16.mxu1 %v350_v13 }
  0x1f   :  { %310 = vmatpush3.bf16.msra.mxu0 %v350_v13  ;;  %342 = vmatpush3.bf16.msra.mxu1 %v350_v13 }
  0x22   :  { %312 = vmatmul.mubr.bf16.vlgmr.msra.gmra.mrb[0].mxu0 %v35_v22  ;;  %320 = vmatmul.mubr.bf16.vlgmr.msra.gmra.mrb[0].mxu1 %v39_v23 }
  0x23   :  { %315 = vmatprep.mubr.bf16.mxu0 %v36_v24  ;;  %323 = vmatprep.mubr.bf16.mxu1 %v40_v25 }
  0x2a   :  { %316 = vmatmul.mubr.bf16.gmra.mrb[4].mxu0 %v37_v30  ;;  %324 = vmatmul.mubr.bf16.gmra.mrb[4].mxu1 %v41_v31 }
  0xf5   :  { %v313_v33 = vpop.f32.mrb[0].mxu0  ;;  %v321_v35 = vpop.f32.mrb[0].mxu1 }
  0xf6   :  { %v212_v36 = vmul.f32 %v313_v33, %v277_v32  ;;  %v220_v37 = vmul.f32 %v321_v35, %v277_v32  ;;  %v140_v38 = vpop.f32.mrb[1].mxu0  ;;  %v172_v39 = vpop.f32.mrb[1].mxu1 }
  0xf7   :  { %v210_v40 = vmul.f32 %v277_v32, %v140_v38  ;;  %v218_v41 = vmul.f32 %v277_v32, %v172_v39  ;;  %v314_v42 = vpop.f32.mrb[2].mxu0  ;;  %v322_v43 = vpop.f32.mrb[2].mxu1 }
  0xf8   :  { %v235_v44 = vadd.f32 %v278_v34, %v212_v36  ;;  %v243_v45 = vadd.f32 %v278_v34, %v220_v37  ;;  %v213_v46 = vmul.f32 %v314_v42, %v277_v32  ;;  %v221_v47 = vmul.f32 %v322_v43, %v277_v32  ;;  %v143_v48 = vpop.f32.mrb[3].mxu0  ;;  %v175_v49 = vpop.f32.mrb[3].mxu1 }
  0xf9   :  { %v233_v50 = vadd.f32 %v278_v34, %v210_v40  ;;  %v241_v51 = vadd.f32 %v278_v34, %v218_v41  ;;  %v211_v52 = vmul.f32 %v277_v32, %v143_v48  ;;  %v219_v53 = vmul.f32 %v277_v32, %v175_v49 }
  0xfa   :  { %251 = vst [vmem:[%s506_s4 + $0x10] sm:$0xff] %v235_v44  ;;  %259 = vst [vmem:[%s506_s4 + $0x50] sm:$0xff] %v243_v45  ;;  %v236_v54 = vadd.f32 %v278_v34, %v213_v46  ;;  %v244_v55 = vadd.f32 %v278_v34, %v221_v47 }
  0xfb   :  { %249 = vst [vmem:[%s506_s4] sm:$0xff] %v233_v50  ;;  %257 = vst [vmem:[%s506_s4 + $0x40] sm:$0xff] %v241_v51  ;;  %v234_v56 = vadd.f32 %v278_v34, %v211_v52  ;;  %v242_v57 = vadd.f32 %v278_v34, %v219_v53 }
  0xfc   :  { %252 = vst [vmem:[%s506_s4 + $0x18] sm:$0xff] %v236_v54  ;;  %260 = vst [vmem:[%s506_s4 + $0x58] sm:$0xff] %v244_v55 }
  0xfd   :  { %250 = vst [vmem:[%s506_s4 + $0x8] sm:$0xff] %v234_v56  ;;  %258 = vst [vmem:[%s506_s4 + $0x48] sm:$0xff] %v242_v57  ;;  %v317_v58 = vpop.f32.mrb[4].mxu0  ;;  %v325_v59 = vpop.f32.mrb[4].mxu1 }
  0xfe   :  { %v216_v60 = vmul.f32 %v317_v58, %v277_v32  ;;  %v224_v61 = vmul.f32 %v325_v59, %v277_v32  ;;  %v156_v62 = vpop.f32.mrb[5].mxu0  ;;  %v188_v63 = vpop.f32.mrb[5].mxu1 }
  0xff   :  { %v214_v0 = vmul.f32 %v277_v32, %v156_v62  ;;  %v222_v1 = vmul.f32 %v277_v32, %v188_v63  ;;  %v318_v2 = vpop.f32.mrb[6].mxu0  ;;  %v326_v3 = vpop.f32.mrb[6].mxu1 }
 0x100   :  { %v239_v4 = vadd.f32 %v278_v34, %v216_v60  ;;  %v247_v5 = vadd.f32 %v278_v34, %v224_v61  ;;  %v217_v6 = vmul.f32 %v318_v2, %v277_v32  ;;  %v225_v7 = vmul.f32 %v326_v3, %v277_v32  ;;  %v159_v8 = vpop.f32.mrb[7].mxu0  ;;  %v191_v9 = vpop.f32.mrb[7].mxu1 }
 0x101   :  { %v237_v10 = vadd.f32 %v278_v34, %v214_v0  ;;  %v245_v11 = vadd.f32 %v278_v34, %v222_v1  ;;  %v215_v12 = vmul.f32 %v277_v32, %v159_v8  ;;  %v223_v13 = vmul.f32 %v277_v32, %v191_v9 }
 0x102   :  { %255 = vst [vmem:[%s506_s4 + $0x30] sm:$0xff] %v239_v4  ;;  %263 = vst [vmem:[%s506_s4 + $0x70] sm:$0xff] %v247_v5  ;;  %v240_v14 = vadd.f32 %v278_v34, %v217_v6  ;;  %v248_v15 = vadd.f32 %v278_v34, %v225_v7 }
 0x103   :  { %253 = vst [vmem:[%s506_s4 + $0x20] sm:$0xff] %v237_v10  ;;  %261 = vst [vmem:[%s506_s4 + $0x60] sm:$0xff] %v245_v11  ;;  %v238_v16 = vadd.f32 %v278_v34, %v215_v12  ;;  %v246_v17 = vadd.f32 %v278_v34, %v223_v13 }
 0x104   :  { %256 = vst [vmem:[%s506_s4 + $0x38] sm:$0xff] %v240_v14  ;;  %264 = vst [vmem:[%s506_s4 + $0x78] sm:$0xff] %v248_v15 }
 0x105   :  { %254 = vst [vmem:[%s506_s4 + $0x28] sm:$0xff] %v238_v16  ;;  %262 = vst [vmem:[%s506_s4 + $0x68] sm:$0xff] %v246_v17 }

// kernel: forward.11
= control target key start
LH: loop header
LB: loop body
LE: loop exit
PB: predicated region body
PF: predicated region fallthrough
CT: control target
= control target key end

     0   :  { %s831_s15 = smov 0   ;;  %s1021_s0 = inlined_call_operand.vmem [shape: f32[512,128], index: 0, kind: input, shape index: {}]   ;;  %s1022_s1 = inlined_call_operand.vmem [shape: bf16[128,128], index: 1, kind: input, shape index: {}]   ;;  %s1023_s2 = inlined_call_operand.vmem [shape: f32[1,128], index: 2, kind: input, shape index: {}]   ;;  %s1024_s3 = inlined_call_operand.vmem [shape: f32[1,128], index: 3, kind: input, shape index: {}]   ;;  %s1025_s4 = inlined_call_operand.vmem [shape: f32[512,128], index: 4, kind: output, shape index: {}]  }
   0x1 LB: > { %s673_s16 = sadd.s32 4294967295, %s804_s15   ;;  %p677_p0 = scmp.ge.s32.totalorder %s804_s15, 1  ;;  %s804_s15 = sphi %s831_s15, %s14_s15  }
   0x2   : > { %p163_p1 = scmp.lt.s32.totalorder %s804_s15, 3 }
   0x4   : > { %p164_p2 = pnand %p677_p0, %p163_p1 }
   0x5   : > { %v790_v0 = vld [vmem:[%s1022_s1] sm:$0xff] (!%p164_p2)   ;;  %s678_s19 = sshll.u32 (!%p164_p2), %s673_s16, 5  ;;  %v791_v1 = vld [vmem:[%s1022_s1 + $0x8] sm:$0xff] (!%p164_p2)   ;;  %v792_v2 = vld [vmem:[%s1022_s1 + $0x10] sm:$0xff] (!%p164_p2)  }
   0x6   : > { %167 = sbr.rel (%p164_p2) target bundleno = 285 (0x11d), region = 36  ;;  %p190_p3 = scmp.lt.s32.totalorder (!%p164_p2), %s678_s19, 63  ;;  %718 = vmatprep.subr.bf16.mxu0 (!%p164_p2), %v790_v0  ;;  %766 = vmatprep.subr.bf16.mxu1 (!%p164_p2), %v790_v0  ;;  %v793_v3 = vld [vmem:[%s1022_s1 + $0x18] sm:$0xff] (!%p164_p2)   ;;  %v794_v10 = vld [vmem:[%s1022_s1 + $0x20] sm:$0xff] (!%p164_p2)   ;;  %v795_v11 = vld [vmem:[%s1022_s1 + $0x28] sm:$0xff] (!%p164_p2)  }
   0x7   : > { %719 = vmatpush3.bf16.msra.mxu0 (!%p164_p2), %v790_v0  ;;  %774 = vmatpush3.bf16.msra.mxu1 (!%p164_p2), %v790_v0  ;;  %v796_v12 = vld [vmem:[%s1022_s1 + $0x30] sm:$0xff] (!%p164_p2)   ;;  %v797_v13 = vld [vmem:[%s1022_s1 + $0x38] sm:$0xff] (!%p164_p2)   ;;  %v908_v56 = vld [vmem:[%s1023_s2] ss:$0 sm:$0xff] (!%p164_p2) }
   0x8   : > { %720 = vmatprep.subr.bf16.mxu0 (!%p164_p2), %v791_v1  ;;  %767 = vmatprep.subr.bf16.mxu1 (!%p164_p2), %v791_v1  ;;  %v913_v58 = vld [vmem:[%s1024_s3] ss:$0 sm:$0xff] (!%p164_p2) }
   0xb   : > { %721 = vmatpush3.bf16.msra.mxu0 (!%p164_p2), %v791_v1  ;;  %775 = vmatpush3.bf16.msra.mxu1 (!%p164_p2), %v791_v1 }
   0xc   : > { %722 = vmatprep.subr.bf16.mxu0 (!%p164_p2), %v792_v2  ;;  %768 = vmatprep.subr.bf16.mxu1 (!%p164_p2), %v792_v2 }
   0xd   : > { %s1027_s19 = smov (!%p190_p3, %s678_s19), 63 }
   0xe   : > { %s679_s24 = sshll.u32 %s1027_s19, 3 }
   0xf   : > { %s856_s27 = scalar_lea.vmem %s1021_s0, %s679_s24  ;;  %723 = vmatpush3.bf16.msra.mxu0 %v792_v2  ;;  %776 = vmatpush3.bf16.msra.mxu1 %v792_v2  ;;  %s928_s20 = scalar_lea.vmem %s1025_s4, %s679_s24 }
  0x10   : > { %v202_v4 = vld [vmem:[%s856_s27] sm:$0xff]  ;;  %v203_v5 = vld [vmem:[%s856_s27 + $0x8] sm:$0xff]  ;;  %724 = vmatprep.subr.bf16.mxu0 %v793_v3  ;;  %769 = vmatprep.subr.bf16.mxu1 %v793_v3  ;;  %v204_v14 = vld [vmem:[%s856_s27 + $0x10] sm:$0xff] }
  0x11   : > { %v218_v6 = vld [vmem:[%s856_s27 + $0x80] sm:$0xff]  ;;  %v234_v7 = vpack.c.bf16 %v203_v5, %v202_v4  ;;  %v219_v8 = vld [vmem:[%s856_s27 + $0x88] sm:$0xff]  ;;  %v205_v15 = vld [vmem:[%s856_s27 + $0x18] sm:$0xff] }
  0x12   : > { %v242_v9 = vpack.c.bf16 %v219_v8, %v218_v6  ;;  %v220_v16 = vld [vmem:[%s856_s27 + $0x90] sm:$0xff]  ;;  %v221_v17 = vld [vmem:[%s856_s27 + $0x98] sm:$0xff]  ;;  %v206_v18 = vld [vmem:[%s856_s27 + $0x20] sm:$0xff]  ;;  %v235_v22 = vpack.c.bf16 %v205_v15, %v204_v14 }
  0x13   : > { %734 = vmatprep.mubr.bf16.mxu0 %v234_v7  ;;  %725 = vmatpush3.bf16.msra.mxu0 %v793_v3  ;;  %v207_v19 = vld [vmem:[%s856_s27 + $0x28] sm:$0xff]  ;;  %v222_v20 = vld [vmem:[%s856_s27 + $0xa0] sm:$0xff]  ;;  %v243_v23 = vpack.c.bf16 %v221_v17, %v220_v16  ;;  %v208_v26 = vld [vmem:[%s856_s27 + $0x30] sm:$0xff] }
  0x14   : > { %750 = vmatprep.mubr.bf16.mxu1 %v242_v9  ;;  %777 = vmatpush3.bf16.msra.mxu1 %v793_v3  ;;  %v223_v21 = vld [vmem:[%s856_s27 + $0xa8] sm:$0xff]  ;;  %v236_v24 = vpack.c.bf16 %v207_v19, %v206_v18  ;;  %v209_v27 = vld [vmem:[%s856_s27 + $0x38] sm:$0xff]  ;;  %v224_v28 = vld [vmem:[%s856_s27 + $0xb0] sm:$0xff] }
  0x15   : > { %726 = vmatprep.subr.bf16.mxu0 %v794_v10  ;;  %770 = vmatprep.subr.bf16.mxu1 %v794_v10  ;;  %v244_v25 = vpack.c.bf16 %v223_v21, %v222_v20  ;;  %v225_v29 = vld [vmem:[%s856_s27 + $0xb8] sm:$0xff]  ;;  %v210_v30 = vld [vmem:[%s856_s27 + $0x40] sm:$0xff]  ;;  %v211_v31 = vld [vmem:[%s856_s27 + $0x48] sm:$0xff]  ;;  %v237_v34 = vpack.c.bf16 %v209_v27, %v208_v26 }
  0x16   : > { %v226_v32 = vld [vmem:[%s856_s27 + $0xc0] sm:$0xff]  ;;  %v227_v33 = vld [vmem:[%s856_s27 + $0xc8] sm:$0xff]  ;;  %v245_v35 = vpack.c.bf16 %v225_v29, %v224_v28  ;;  %v238_v36 = vpack.c.bf16 %v211_v31, %v210_v30  ;;  %v212_v38 = vld [vmem:[%s856_s27 + $0x50] sm:$0xff] }
  0x17   : > { %727 = vmatpush3.bf16.msra.mxu0 %v794_v10  ;;  %v246_v37 = vpack.c.bf16 %v227_v33, %v226_v32  ;;  %v213_v39 = vld [vmem:[%s856_s27 + $0x58] sm:$0xff]  ;;  %v228_v40 = vld [vmem:[%s856_s27 + $0xd0] sm:$0xff]  ;;  %v214_v42 = vld [vmem:[%s856_s27 + $0x60] sm:$0xff] }
  0x18   : > { %778 = vmatpush3.bf16.msra.mxu1 %v794_v10  ;;  %728 = vmatprep.subr.bf16.mxu0 %v795_v11  ;;  %v229_v41 = vld [vmem:[%s856_s27 + $0xd8] sm:$0xff]  ;;  %v215_v43 = vld [vmem:[%s856_s27 + $0x68] sm:$0xff]  ;;  %v230_v44 = vld [vmem:[%s856_s27 + $0xe0] sm:$0xff]  ;;  %v239_v46 = vpack.c.bf16 %v213_v39, %v212_v38 }
  0x19   : > { %771 = vmatprep.subr.bf16.mxu1 %v795_v11  ;;  %v231_v45 = vld [vmem:[%s856_s27 + $0xe8] sm:$0xff]  ;;  %v247_v47 = vpack.c.bf16 %v229_v41, %v228_v40  ;;  %v240_v48 = vpack.c.bf16 %v215_v43, %v214_v42  ;;  %v216_v50 = vld [vmem:[%s856_s27 + $0x70] sm:$0xff]  ;;  %v217_v51 = vld [vmem:[%s856_s27 + $0x78] sm:$0xff] }
  0x1a   : > { %v248_v49 = vpack.c.bf16 %v231_v45, %v230_v44  ;;  %v232_v52 = vld [vmem:[%s856_s27 + $0xf0] sm:$0xff]  ;;  %v233_v53 = vld [vmem:[%s856_s27 + $0xf8] sm:$0xff]  ;;  %v241_v54 = vpack.c.bf16 %v217_v51, %v216_v50 }
  0x1b   : > { %729 = vmatpush3.bf16.msra.mxu0 %v795_v11  ;;  %v249_v55 = vpack.c.bf16 %v233_v53, %v232_v52 }
  0x1c   : > { %779 = vmatpush3.bf16.msra.mxu1 %v795_v11  ;;  %730 = vmatprep.subr.bf16.mxu0 %v796_v12 }
  0x1d   : > { %772 = vmatprep.subr.bf16.mxu1 %v796_v12 }
  0x1f   : > { %731 = vmatpush3.bf16.msra.mxu0 %v796_v12 }
  0x20   : > { %780 = vmatpush3.bf16.msra.mxu1 %v796_v12  ;;  %732 = vmatprep.subr.bf16.mxu0 %v797_v13 }
  0x21   : > { %773 = vmatprep.subr.bf16.mxu1 %v797_v13 }
  0x23   : > { %733 = vmatpush3.bf16.msra.mxu0 %v797_v13 }
  0x24   : > { %781 = vmatpush3.bf16.msra.mxu1 %v797_v13 }
  0x26   : > { %735 = vmatmul.mubr.bf16.vlgmr.msra.gmra.mrb[0].mxu0 %v235_v22 }
  0x27   : > { %751 = vmatmul.mubr.bf16.vlgmr.msra.gmra.mrb[0].mxu1 %v243_v23  ;;  %738 = vmatprep.mubr.bf16.mxu0 %v236_v24 }
  0x28   : > { %754 = vmatprep.mubr.bf16.mxu1 %v244_v25 }
  0x2e   : > { %739 = vmatmul.mubr.bf16.gmra.mrb[4].mxu0 %v237_v34 }
  0x2f   : > { %755 = vmatmul.mubr.bf16.gmra.mrb[4].mxu1 %v245_v35  ;;  %742 = vmatprep.mubr.bf16.mxu0 %v238_v36 }
  0x30   : > { %758 = vmatprep.mubr.bf16.mxu1 %v246_v37 }
  0x36   : > { %743 = vmatmul.mubr.bf16.gmra.mrb[8].mxu0 %v239_v46 }
  0x37   : > { %759 = vmatmul.mubr.bf16.gmra.mrb[8].mxu1 %v247_v47  ;;  %746 = vmatprep.mubr.bf16.mxu0 %v240_v48 }
  0x38   : > { %762 = vmatprep.mubr.bf16.mxu1 %v248_v49 }
  0x3e   : > { %747 = vmatmul.mubr.bf16.gmra.mrb[12].mxu0 %v241_v54 }
  0x3f   : > { %763 = vmatmul.mubr.bf16.gmra.mrb[12].mxu1 %v249_v55 }
  0xf9   : > { %v736_v57 = vpop.f32.mrb[0].mxu0 }
  0xfa   : > { %v752_v59 = vpop.f32.mrb[0].mxu1  ;;  %v484_v60 = vmul.f32 %v736_v57, %v908_v56  ;;  %v348_v62 = vpop.f32.mrb[1].mxu0 }
  0xfb   : > { %v500_v61 = vmul.f32 %v752_v59, %v908_v56  ;;  %v412_v63 = vpop.f32.mrb[1].mxu1  ;;  %v482_v0 = vmul.f32 %v908_v56, %v348_v62  ;;  %v737_v2 = vpop.f32.mrb[2].mxu0 }
  0xfc   : > { %v498_v1 = vmul.f32 %v908_v56, %v412_v63  ;;  %v753_v3 = vpop.f32.mrb[2].mxu1  ;;  %v523_v4 = vadd.f32 %v913_v58, %v484_v60  ;;  %v485_v6 = vmul.f32 %v737_v2, %v908_v56  ;;  %v351_v8 = vpop.f32.mrb[3].mxu0 }
  0xfd   : > { %v539_v5 = vadd.f32 %v913_v58, %v500_v61  ;;  %v501_v7 = vmul.f32 %v753_v3, %v908_v56  ;;  %v415_v9 = vpop.f32.mrb[3].mxu1  ;;  %v521_v10 = vadd.f32 %v913_v58, %v482_v0  ;;  %v483_v12 = vmul.f32 %v908_v56, %v351_v8 }
  0xfe   : > { %v537_v11 = vadd.f32 %v913_v58, %v498_v1  ;;  %v499_v13 = vmul.f32 %v908_v56, %v415_v9  ;;  %v555_v14 = vmax.f32 %v523_v4, 0.0  ;;  %v524_v16 = vadd.f32 %v913_v58, %v485_v6 }
  0xff   : > { %v571_v15 = vmax.f32 %v539_v5, 0.0  ;;  %v540_v17 = vadd.f32 %v913_v58, %v501_v7  ;;  %v553_v18 = vmax.f32 %v521_v10, 0.0  ;;  %v522_v20 = vadd.f32 %v913_v58, %v483_v12 }
 0x100   : > { %v569_v19 = vmax.f32 %v537_v11, 0.0  ;;  %v538_v21 = vadd.f32 %v913_v58, %v499_v13  ;;  %587 = vst [vmem:[%s928_s20 + $0x10] sm:$0xff] %v555_v14  ;;  %v556_v22 = vmax.f32 %v524_v16, 0.0 }
 0x101   : > { %603 = vst [vmem:[%s928_s20 + $0x90] sm:$0xff] %v571_v15  ;;  %v572_v23 = vmax.f32 %v540_v17, 0.0  ;;  %585 = vst [vmem:[%s928_s20] sm:$0xff] %v553_v18  ;;  %v554_v24 = vmax.f32 %v522_v20, 0.0  ;;  %v740_v26 = vpop.f32.mrb[4].mxu0 }
 0x102   : > { %601 = vst [vmem:[%s928_s20 + $0x80] sm:$0xff] %v569_v19  ;;  %v570_v25 = vmax.f32 %v538_v21, 0.0  ;;  %v756_v27 = vpop.f32.mrb[4].mxu1  ;;  %588 = vst [vmem:[%s928_s20 + $0x18] sm:$0xff] %v556_v22  ;;  %v488_v28 = vmul.f32 %v740_v26, %v908_v56  ;;  %v364_v30 = vpop.f32.mrb[5].mxu0 }
 0x103   : > { %604 = vst [vmem:[%s928_s20 + $0x98] sm:$0xff] %v572_v23  ;;  %v504_v29 = vmul.f32 %v756_v27, %v908_v56  ;;  %v428_v31 = vpop.f32.mrb[5].mxu1  ;;  %586 = vst [vmem:[%s928_s20 + $0x8] sm:$0xff] %v554_v24  ;;  %v486_v32 = vmul.f32 %v908_v56, %v364_v30  ;;  %v741_v34 = vpop.f32.mrb[6].mxu0 }
 0x104   : > { %602 = vst [vmem:[%s928_s20 + $0x88] sm:$0xff] %v570_v25  ;;  %v502_v33 = vmul.f32 %v908_v56, %v428_v31  ;;  %v757_v35 = vpop.f32.mrb[6].mxu1  ;;  %v527_v36 = vadd.f32 %v913_v58, %v488_v28  ;;  %v489_v38 = vmul.f32 %v741_v34, %v908_v56  ;;  %v367_v40 = vpop.f32.mrb[7].mxu0 }
 0x105   : > { %v543_v37 = vadd.f32 %v913_v58, %v504_v29  ;;  %v505_v39 = vmul.f32 %v757_v35, %v908_v56  ;;  %v431_v41 = vpop.f32.mrb[7].mxu1  ;;  %v525_v42 = vadd.f32 %v913_v58, %v486_v32  ;;  %v487_v44 = vmul.f32 %v908_v56, %v367_v40 }
 0x106   : > { %v541_v43 = vadd.f32 %v913_v58, %v502_v33  ;;  %v503_v45 = vmul.f32 %v908_v56, %v431_v41  ;;  %v559_v46 = vmax.f32 %v527_v36, 0.0  ;;  %v528_v48 = vadd.f32 %v913_v58, %v489_v38 }
 0x107   : > { %v575_v47 = vmax.f32 %v543_v37, 0.0  ;;  %v544_v49 = vadd.f32 %v913_v58, %v505_v39  ;;  %v557_v50 = vmax.f32 %v525_v42, 0.0  ;;  %v526_v52 = vadd.f32 %v913_v58, %v487_v44 }
 0x108   : > { %v573_v51 = vmax.f32 %v541_v43, 0.0  ;;  %v542_v53 = vadd.f32 %v913_v58, %v503_v45  ;;  %591 = vst [vmem:[%s928_s20 + $0x30] sm:$0xff] %v559_v46  ;;  %v560_v54 = vmax.f32 %v528_v48, 0.0 }
 0x109   : > { %607 = vst [vmem:[%s928_s20 + $0xb0] sm:$0xff] %v575_v47  ;;  %v576_v55 = vmax.f32 %v544_v49, 0.0  ;;  %589 = vst [vmem:[%s928_s20 + $0x20] sm:$0xff] %v557_v50  ;;  %v558_v57 = vmax.f32 %v526_v52, 0.0  ;;  %v744_v60 = vpop.f32.mrb[8].mxu0 }
 0x10a   : > { %605 = vst [vmem:[%s928_s20 + $0xa0] sm:$0xff] %v573_v51  ;;  %v574_v59 = vmax.f32 %v542_v53, 0.0  ;;  %v760_v61 = vpop.f32.mrb[8].mxu1  ;;  %592 = vst [vmem:[%s928_s20 + $0x38] sm:$0xff] %v560_v54  ;;  %v492_v62 = vmul.f32 %v744_v60, %v908_v56  ;;  %v380_v0 = vpop.f32.mrb[9].mxu0 }
 0x10b   : > { %608 = vst [vmem:[%s928_s20 + $0xb8] sm:$0xff] %v576_v55  ;;  %v508_v63 = vmul.f32 %v760_v61, %v908_v56  ;;  %v444_v1 = vpop.f32.mrb[9].mxu1  ;;  %590 = vst [vmem:[%s928_s20 + $0x28] sm:$0xff] %v558_v57  ;;  %v490_v2 = vmul.f32 %v908_v56, %v380_v0  ;;  %v745_v4 = vpop.f32.mrb[10].mxu0 }
 0x10c   : > { %606 = vst [vmem:[%s928_s20 + $0xa8] sm:$0xff] %v574_v59  ;;  %v506_v3 = vmul.f32 %v908_v56, %v444_v1  ;;  %v761_v5 = vpop.f32.mrb[10].mxu1  ;;  %v531_v6 = vadd.f32 %v913_v58, %v492_v62  ;;  %v493_v8 = vmul.f32 %v745_v4, %v908_v56  ;;  %v383_v10 = vpop.f32.mrb[11].mxu0 }
 0x10d   : > { %v547_v7 = vadd.f32 %v913_v58, %v508_v63  ;;  %v509_v9 = vmul.f32 %v761_v5, %v908_v56  ;;  %v447_v11 = vpop.f32.mrb[11].mxu1  ;;  %v529_v12 = vadd.f32 %v913_v58, %v490_v2  ;;  %v491_v14 = vmul.f32 %v908_v56, %v383_v10 }
 0x10e   : > { %v545_v13 = vadd.f32 %v913_v58, %v506_v3  ;;  %v507_v15 = vmul.f32 %v908_v56, %v447_v11  ;;  %v563_v16 = vmax.f32 %v531_v6, 0.0  ;;  %v532_v18 = vadd.f32 %v913_v58, %v493_v8 }
 0x10f   : > { %v579_v17 = vmax.f32 %v547_v7, 0.0  ;;  %v548_v19 = vadd.f32 %v913_v58, %v509_v9  ;;  %v561_v20 = vmax.f32 %v529_v12, 0.0  ;;  %v530_v22 = vadd.f32 %v913_v58, %v491_v14 }
 0x110   : > { %v577_v21 = vmax.f32 %v545_v13, 0.0  ;;  %v546_v23 = vadd.f32 %v913_v58, %v507_v15  ;;  %595 = vst [vmem:[%s928_s20 + $0x50] sm:$0xff] %v563_v16  ;;  %v564_v24 = vmax.f32 %v532_v18, 0.0 }
 0x111   : > { %611 = vst [vmem:[%s928_s20 + $0xd0] sm:$0xff] %v579_v17  ;;  %v580_v25 = vmax.f32 %v548_v19, 0.0  ;;  %593 = vst [vmem:[%s928_s20 + $0x40] sm:$0xff] %v561_v20  ;;  %v562_v26 = vmax.f32 %v530_v22, 0.0  ;;  %v748_v28 = vpop.f32.mrb[12].mxu0 }
 0x112   : > { %609 = vst [vmem:[%s928_s20 + $0xc0] sm:$0xff] %v577_v21  ;;  %v578_v27 = vmax.f32 %v546_v23, 0.0  ;;  %v764_v29 = vpop.f32.mrb[12].mxu1  ;;  %596 = vst [vmem:[%s928_s20 + $0x58] sm:$0xff] %v564_v24  ;;  %v496_v30 = vmul.f32 %v748_v28, %v908_v56  ;;  %v396_v32 = vpop.f32.mrb[13].mxu0 }
 0x113   : > { %612 = vst [vmem:[%s928_s20 + $0xd8] sm:$0xff] %v580_v25  ;;  %v512_v31 = vmul.f32 %v764_v29, %v908_v56  ;;  %v460_v33 = vpop.f32.mrb[13].mxu1  ;;  %594 = vst [vmem:[%s928_s20 + $0x48] sm:$0xff] %v562_v26  ;;  %v494_v34 = vmul.f32 %v908_v56, %v396_v32  ;;  %v749_v36 = vpop.f32.mrb[14].mxu0 }
 0x114   : > { %610 = vst [vmem:[%s928_s20 + $0xc8] sm:$0xff] %v578_v27  ;;  %v510_v35 = vmul.f32 %v908_v56, %v460_v33  ;;  %v765_v37 = vpop.f32.mrb[14].mxu1  ;;  %v535_v38 = vadd.f32 %v913_v58, %v496_v30  ;;  %v497_v40 = vmul.f32 %v749_v36, %v908_v56  ;;  %v399_v42 = vpop.f32.mrb[15].mxu0 }
 0x115   : > { %v551_v39 = vadd.f32 %v913_v58, %v512_v31  ;;  %v513_v41 = vmul.f32 %v765_v37, %v908_v56  ;;  %v463_v43 = vpop.f32.mrb[15].mxu1  ;;  %v533_v44 = vadd.f32 %v913_v58, %v494_v34  ;;  %v495_v46 = vmul.f32 %v908_v56, %v399_v42 }
 0x116   : > { %v549_v45 = vadd.f32 %v913_v58, %v510_v35  ;;  %v511_v47 = vmul.f32 %v908_v56, %v463_v43  ;;  %v567_v48 = vmax.f32 %v535_v38, 0.0  ;;  %v536_v50 = vadd.f32 %v913_v58, %v497_v40 }
 0x117   : > { %v583_v49 = vmax.f32 %v551_v39, 0.0  ;;  %v552_v51 = vadd.f32 %v913_v58, %v513_v41  ;;  %v565_v52 = vmax.f32 %v533_v44, 0.0  ;;  %v534_v54 = vadd.f32 %v913_v58, %v495_v46 }
 0x118   : > { %v581_v53 = vmax.f32 %v549_v45, 0.0  ;;  %v550_v55 = vadd.f32 %v913_v58, %v511_v47  ;;  %599 = vst [vmem:[%s928_s20 + $0x70] sm:$0xff] %v567_v48  ;;  %v568_v57 = vmax.f32 %v536_v50, 0.0 }
 0x119   : > { %615 = vst [vmem:[%s928_s20 + $0xf0] sm:$0xff] %v583_v49  ;;  %v584_v56 = vmax.f32 %v552_v51, 0.0  ;;  %597 = vst [vmem:[%s928_s20 + $0x60] sm:$0xff] %v565_v52  ;;  %v566_v59 = vmax.f32 %v534_v54, 0.0 }
 0x11a   : > { %613 = vst [vmem:[%s928_s20 + $0xe0] sm:$0xff] %v581_v53  ;;  %v582_v60 = vmax.f32 %v550_v55, 0.0  ;;  %600 = vst [vmem:[%s928_s20 + $0x78] sm:$0xff] %v568_v57 }
 0x11b   : > { %616 = vst [vmem:[%s928_s20 + $0xf8] sm:$0xff] %v584_v56  ;;  %598 = vst [vmem:[%s928_s20 + $0x68] sm:$0xff] %v566_v59 }
 0x11c   : > { %614 = vst [vmem:[%s928_s20 + $0xe8] sm:$0xff] %v582_v60 }
 0x11d PF: > { %s14_s15 = sadd.s32 1, %s804_s15  }
 0x11e   : > { %p11_p4 = scmp.ge.s32.totalorder %s14_s15, 4  }
 0x120   :  { %13 = sbr.rel (!%p11_p4) target bundleno = 1 (0x1), region = 66 }

// kernel: forward.10
= control target key start
LH: loop header
LB: loop body
LE: loop exit
PB: predicated region body
PF: predicated region fallthrough
CT: control target
= control target key end

     0   :  { %s806_s15 = smov 0   ;;  %s994_s0 = inlined_call_operand.vmem [shape: f32[512,32], index: 0, kind: input, shape index: {}]   ;;  %s995_s1 = inlined_call_operand.vmem [shape: bf16[32,128], index: 1, kind: input, shape index: {}]   ;;  %s996_s2 = inlined_call_operand.vmem [shape: f32[1,128], index: 2, kind: input, shape index: {}]   ;;  %s997_s3 = inlined_call_operand.vmem [shape: f32[1,128], index: 3, kind: input, shape index: {}]   ;;  %s998_s4 = inlined_call_operand.vmem [shape: f32[512,128], index: 4, kind: output, shape index: {}]  }
   0x1 LB: > { %s674_s16 = sadd.s32 4294967295, %s779_s15   ;;  %p678_p0 = scmp.ge.s32.totalorder %s779_s15, 1  ;;  %s779_s15 = sphi %s806_s15, %s14_s15  }
   0x2   : > { %p163_p1 = scmp.lt.s32.totalorder %s779_s15, 3 }
   0x4   : > { %p164_p2 = pnand %p678_p0, %p163_p1 }
   0x5   : > { %v771_v0 = vld [vmem:[%s995_s1] sm:$0xff] (!%p164_p2)   ;;  %s679_s19 = sshll.u32 (!%p164_p2), %s674_s16, 5  ;;  %v772_v1 = vld [vmem:[%s995_s1 + $0x8] sm:$0xff] (!%p164_p2)   ;;  %vm266_vm0 = vcmask (!%p164_p2), 261120  }
   0x6   : > { %167 = sbr.rel (%p164_p2) target bundleno = 267 (0x10b), region = 36  ;;  %p190_p3 = scmp.lt.s32.totalorder (!%p164_p2), %s679_s19, 63  ;;  %723 = vmatprep.subr.bf16.mxu0 (!%p164_p2), %v771_v0  ;;  %759 = vmatprep.subr.bf16.mxu1 (!%p164_p2), %v771_v0  ;;  %v881_v50 = vld [vmem:[%s996_s2] ss:$0 sm:$0xff] (!%p164_p2) }
   0x7   : > { %724 = vmatpush3.bf16.msra.mxu0 (!%p164_p2), %v771_v0  ;;  %761 = vmatpush3.bf16.msra.mxu1 (!%p164_p2), %v771_v0  ;;  %v886_v52 = vld [vmem:[%s997_s3] ss:$0 sm:$0xff] (!%p164_p2) }
   0x8   : > { %725 = vmatprep.subr.bf16.mxu0 (!%p164_p2), %v772_v1  ;;  %760 = vmatprep.subr.bf16.mxu1 (!%p164_p2), %v772_v1 }
   0xb   : > { %726 = vmatpush3.bf16.msra.mxu0 (!%p164_p2), %v772_v1  ;;  %762 = vmatpush3.bf16.msra.mxu1 (!%p164_p2), %v772_v1 }
   0xd   : > { %s1000_s19 = smov (!%p190_p3, %s679_s19), 63 }
   0xe   : > { %s680_s22 = sshll.u32 %s1000_s19, 3 }
   0xf   : > { %s828_s25 = scalar_lea.vmem %s994_s0, %s680_s22  ;;  %s899_s6 = scalar_lea.vmem %s998_s4, %s680_s22 }
  0x10   : > { %v202_v2 = vld [vmem:[%s828_s25] sm:$0xff]  ;;  %v203_v3 = vld [vmem:[%s828_s25 + $0x8] sm:$0xff]  ;;  %v204_v7 = vld [vmem:[%s828_s25 + $0x10] sm:$0xff] }
  0x11   : > { %v218_v4 = vld [vmem:[%s828_s25 + $0x80] sm:$0xff]  ;;  %v234_v5 = vpack.c.bf16 %v203_v3, %v202_v2  ;;  %v219_v6 = vld [vmem:[%s828_s25 + $0x88] sm:$0xff]  ;;  %v205_v8 = vld [vmem:[%s828_s25 + $0x18] sm:$0xff] }
  0x12   : > { %v242_v9 = vpack.c.bf16 %v219_v6, %v218_v4  ;;  %v235_v10 = vpack.c.bf16 %v205_v8, %v204_v7  ;;  %v220_v11 = vld [vmem:[%s828_s25 + $0x90] sm:$0xff]  ;;  %v221_v12 = vld [vmem:[%s828_s25 + $0x98] sm:$0xff]  ;;  %v206_v13 = vld [vmem:[%s828_s25 + $0x20] sm:$0xff] }
  0x13   : > { %727 = vmatprep.mubr.msk.bf16.mxu0 %vm266_vm0, %v234_v5  ;;  %v243_v14 = vpack.c.bf16 %v221_v12, %v220_v11  ;;  %v207_v15 = vld [vmem:[%s828_s25 + $0x28] sm:$0xff]  ;;  %v222_v16 = vld [vmem:[%s828_s25 + $0xa0] sm:$0xff]  ;;  %v208_v20 = vld [vmem:[%s828_s25 + $0x30] sm:$0xff] }
  0x14   : > { %v223_v17 = vld [vmem:[%s828_s25 + $0xa8] sm:$0xff]  ;;  %743 = vmatprep.mubr.msk.bf16.mxu1 %vm266_vm0, %v242_v9  ;;  %728 = vmatmul.mubr.msk.bf16.vlgmr.msra.gmra.mrb[0].mxu0 %vm266_vm0, %v235_v10  ;;  %v236_v18 = vpack.c.bf16 %v207_v15, %v206_v13  ;;  %v209_v21 = vld [vmem:[%s828_s25 + $0x38] sm:$0xff]  ;;  %v224_v22 = vld [vmem:[%s828_s25 + $0xb0] sm:$0xff] }
  0x15   : > { %v244_v19 = vpack.c.bf16 %v223_v17, %v222_v16  ;;  %744 = vmatmul.mubr.msk.bf16.vlgmr.msra.gmra.mrb[0].mxu1 %vm266_vm0, %v243_v14  ;;  %v225_v23 = vld [vmem:[%s828_s25 + $0xb8] sm:$0xff]  ;;  %v210_v24 = vld [vmem:[%s828_s25 + $0x40] sm:$0xff]  ;;  %v211_v25 = vld [vmem:[%s828_s25 + $0x48] sm:$0xff]  ;;  %v237_v28 = vpack.c.bf16 %v209_v21, %v208_v20 }
  0x16   : > { %731 = vmatprep.mubr.msk.bf16.mxu0 %vm266_vm0, %v236_v18  ;;  %v226_v26 = vld [vmem:[%s828_s25 + $0xc0] sm:$0xff]  ;;  %v227_v27 = vld [vmem:[%s828_s25 + $0xc8] sm:$0xff]  ;;  %v245_v29 = vpack.c.bf16 %v225_v23, %v224_v22  ;;  %v238_v30 = vpack.c.bf16 %v211_v25, %v210_v24  ;;  %v212_v32 = vld [vmem:[%s828_s25 + $0x50] sm:$0xff] }
  0x17   : > { %747 = vmatprep.mubr.msk.bf16.mxu1 %vm266_vm0, %v244_v19  ;;  %v246_v31 = vpack.c.bf16 %v227_v27, %v226_v26  ;;  %v213_v33 = vld [vmem:[%s828_s25 + $0x58] sm:$0xff]  ;;  %v228_v34 = vld [vmem:[%s828_s25 + $0xd0] sm:$0xff]  ;;  %v214_v36 = vld [vmem:[%s828_s25 + $0x60] sm:$0xff] }
  0x18   : > { %v229_v35 = vld [vmem:[%s828_s25 + $0xd8] sm:$0xff]  ;;  %v215_v37 = vld [vmem:[%s828_s25 + $0x68] sm:$0xff]  ;;  %v230_v38 = vld [vmem:[%s828_s25 + $0xe0] sm:$0xff]  ;;  %v239_v40 = vpack.c.bf16 %v213_v33, %v212_v32 }
  0x19   : > { %v231_v39 = vld [vmem:[%s828_s25 + $0xe8] sm:$0xff]  ;;  %v247_v41 = vpack.c.bf16 %v229_v35, %v228_v34  ;;  %v240_v42 = vpack.c.bf16 %v215_v37, %v214_v36  ;;  %v216_v44 = vld [vmem:[%s828_s25 + $0x70] sm:$0xff]  ;;  %v217_v45 = vld [vmem:[%s828_s25 + $0x78] sm:$0xff] }
  0x1a   : > { %v248_v43 = vpack.c.bf16 %v231_v39, %v230_v38  ;;  %v232_v46 = vld [vmem:[%s828_s25 + $0xf0] sm:$0xff]  ;;  %v233_v47 = vld [vmem:[%s828_s25 + $0xf8] sm:$0xff]  ;;  %v241_v48 = vpack.c.bf16 %v217_v45, %v216_v44 }
  0x1b   : > { %v249_v49 = vpack.c.bf16 %v233_v47, %v232_v46 }
  0x1c   : > { %732 = vmatmul.mubr.msk.bf16.gmra.mrb[4].mxu0 %vm266_vm0, %v237_v28 }
  0x1d   : > { %748 = vmatmul.mubr.msk.bf16.gmra.mrb[4].mxu1 %vm266_vm0, %v245_v29  ;;  %735 = vmatprep.mubr.msk.bf16.mxu0 %vm266_vm0, %v238_v30 }
  0x1e   : > { %751 = vmatprep.mubr.msk.bf16.mxu1 %vm266_vm0, %v246_v31 }
  0x24   : > { %736 = vmatmul.mubr.msk.bf16.gmra.mrb[8].mxu0 %vm266_vm0, %v239_v40 }
  0x25   : > { %752 = vmatmul.mubr.msk.bf16.gmra.mrb[8].mxu1 %vm266_vm0, %v247_v41  ;;  %739 = vmatprep.mubr.msk.bf16.mxu0 %vm266_vm0, %v240_v42 }
  0x26   : > { %755 = vmatprep.mubr.msk.bf16.mxu1 %vm266_vm0, %v248_v43 }
  0x2c   : > { %740 = vmatmul.mubr.msk.bf16.gmra.mrb[12].mxu0 %vm266_vm0, %v241_v48 }
  0x2d   : > { %756 = vmatmul.mubr.msk.bf16.gmra.mrb[12].mxu1 %vm266_vm0, %v249_v49 }
  0xe7   : > { %v729_v51 = vpop.f32.mrb[0].mxu0 }
  0xe8   : > { %v485_v53 = vmul.f32 %v729_v51, %v881_v50  ;;  %v745_v54 = vpop.f32.mrb[0].mxu1  ;;  %v349_v55 = vpop.f32.mrb[1].mxu0 }
  0xe9   : > { %v501_v56 = vmul.f32 %v745_v54, %v881_v50  ;;  %v483_v57 = vmul.f32 %v881_v50, %v349_v55  ;;  %v413_v58 = vpop.f32.mrb[1].mxu1  ;;  %v730_v59 = vpop.f32.mrb[2].mxu0 }
  0xea   : > { %v524_v60 = vadd.f32 %v886_v52, %v485_v53  ;;  %v499_v61 = vmul.f32 %v881_v50, %v413_v58  ;;  %v486_v62 = vmul.f32 %v730_v59, %v881_v50  ;;  %v746_v63 = vpop.f32.mrb[2].mxu1  ;;  %v352_v0 = vpop.f32.mrb[3].mxu0 }
  0xeb   : > { %v540_v1 = vadd.f32 %v886_v52, %v501_v56  ;;  %v522_v2 = vadd.f32 %v886_v52, %v483_v57  ;;  %v502_v3 = vmul.f32 %v746_v63, %v881_v50  ;;  %v484_v4 = vmul.f32 %v881_v50, %v352_v0  ;;  %v416_v5 = vpop.f32.mrb[3].mxu1 }
  0xec   : > { %v556_v6 = vmax.f32 %v524_v60, 0.0  ;;  %v538_v7 = vadd.f32 %v886_v52, %v499_v61  ;;  %v525_v8 = vadd.f32 %v886_v52, %v486_v62  ;;  %v500_v9 = vmul.f32 %v881_v50, %v416_v5 }
  0xed   : > { %v572_v10 = vmax.f32 %v540_v1, 0.0  ;;  %v554_v11 = vmax.f32 %v522_v2, 0.0  ;;  %v541_v12 = vadd.f32 %v886_v52, %v502_v3  ;;  %v523_v13 = vadd.f32 %v886_v52, %v484_v4 }
  0xee   : > { %588 = vst [vmem:[%s899_s6 + $0x10] sm:$0xff] %v556_v6  ;;  %v570_v14 = vmax.f32 %v538_v7, 0.0  ;;  %v557_v15 = vmax.f32 %v525_v8, 0.0  ;;  %v539_v16 = vadd.f32 %v886_v52, %v500_v9 }
  0xef   : > { %604 = vst [vmem:[%s899_s6 + $0x90] sm:$0xff] %v572_v10  ;;  %586 = vst [vmem:[%s899_s6] sm:$0xff] %v554_v11  ;;  %v573_v17 = vmax.f32 %v541_v12, 0.0  ;;  %v555_v18 = vmax.f32 %v523_v13, 0.0  ;;  %v733_v19 = vpop.f32.mrb[4].mxu0 }
  0xf0   : > { %602 = vst [vmem:[%s899_s6 + $0x80] sm:$0xff] %v570_v14  ;;  %589 = vst [vmem:[%s899_s6 + $0x18] sm:$0xff] %v557_v15  ;;  %v571_v20 = vmax.f32 %v539_v16, 0.0  ;;  %v489_v21 = vmul.f32 %v733_v19, %v881_v50  ;;  %v749_v22 = vpop.f32.mrb[4].mxu1  ;;  %v365_v23 = vpop.f32.mrb[5].mxu0 }
  0xf1   : > { %605 = vst [vmem:[%s899_s6 + $0x98] sm:$0xff] %v573_v17  ;;  %587 = vst [vmem:[%s899_s6 + $0x8] sm:$0xff] %v555_v18  ;;  %v505_v24 = vmul.f32 %v749_v22, %v881_v50  ;;  %v487_v25 = vmul.f32 %v881_v50, %v365_v23  ;;  %v429_v26 = vpop.f32.mrb[5].mxu1  ;;  %v734_v27 = vpop.f32.mrb[6].mxu0 }
  0xf2   : > { %603 = vst [vmem:[%s899_s6 + $0x88] sm:$0xff] %v571_v20  ;;  %v528_v28 = vadd.f32 %v886_v52, %v489_v21  ;;  %v503_v29 = vmul.f32 %v881_v50, %v429_v26  ;;  %v490_v30 = vmul.f32 %v734_v27, %v881_v50  ;;  %v750_v31 = vpop.f32.mrb[6].mxu1  ;;  %v368_v32 = vpop.f32.mrb[7].mxu0 }
  0xf3   : > { %v544_v33 = vadd.f32 %v886_v52, %v505_v24  ;;  %v526_v34 = vadd.f32 %v886_v52, %v487_v25  ;;  %v506_v35 = vmul.f32 %v750_v31, %v881_v50  ;;  %v488_v36 = vmul.f32 %v881_v50, %v368_v32  ;;  %v432_v37 = vpop.f32.mrb[7].mxu1 }
  0xf4   : > { %v560_v38 = vmax.f32 %v528_v28, 0.0  ;;  %v542_v39 = vadd.f32 %v886_v52, %v503_v29  ;;  %v529_v40 = vadd.f32 %v886_v52, %v490_v30  ;;  %v504_v41 = vmul.f32 %v881_v50, %v432_v37 }
  0xf5   : > { %v576_v42 = vmax.f32 %v544_v33, 0.0  ;;  %v558_v43 = vmax.f32 %v526_v34, 0.0  ;;  %v545_v44 = vadd.f32 %v886_v52, %v506_v35  ;;  %v527_v45 = vadd.f32 %v886_v52, %v488_v36 }
  0xf6   : > { %592 = vst [vmem:[%s899_s6 + $0x30] sm:$0xff] %v560_v38  ;;  %v574_v46 = vmax.f32 %v542_v39, 0.0  ;;  %v561_v47 = vmax.f32 %v529_v40, 0.0  ;;  %v543_v48 = vadd.f32 %v886_v52, %v504_v41 }
  0xf7   : > { %608 = vst [vmem:[%s899_s6 + $0xb0] sm:$0xff] %v576_v42  ;;  %590 = vst [vmem:[%s899_s6 + $0x20] sm:$0xff] %v558_v43  ;;  %v577_v49 = vmax.f32 %v545_v44, 0.0  ;;  %v559_v51 = vmax.f32 %v527_v45, 0.0  ;;  %v737_v53 = vpop.f32.mrb[8].mxu0 }
  0xf8   : > { %606 = vst [vmem:[%s899_s6 + $0xa0] sm:$0xff] %v574_v46  ;;  %593 = vst [vmem:[%s899_s6 + $0x38] sm:$0xff] %v561_v47  ;;  %v575_v54 = vmax.f32 %v543_v48, 0.0  ;;  %v493_v55 = vmul.f32 %v737_v53, %v881_v50  ;;  %v753_v56 = vpop.f32.mrb[8].mxu1  ;;  %v381_v57 = vpop.f32.mrb[9].mxu0 }
  0xf9   : > { %609 = vst [vmem:[%s899_s6 + $0xb8] sm:$0xff] %v577_v49  ;;  %591 = vst [vmem:[%s899_s6 + $0x28] sm:$0xff] %v559_v51  ;;  %v509_v58 = vmul.f32 %v753_v56, %v881_v50  ;;  %v491_v59 = vmul.f32 %v881_v50, %v381_v57  ;;  %v445_v60 = vpop.f32.mrb[9].mxu1  ;;  %v738_v61 = vpop.f32.mrb[10].mxu0 }
  0xfa   : > { %607 = vst [vmem:[%s899_s6 + $0xa8] sm:$0xff] %v575_v54  ;;  %v532_v62 = vadd.f32 %v886_v52, %v493_v55  ;;  %v507_v63 = vmul.f32 %v881_v50, %v445_v60  ;;  %v494_v0 = vmul.f32 %v738_v61, %v881_v50  ;;  %v754_v1 = vpop.f32.mrb[10].mxu1  ;;  %v384_v2 = vpop.f32.mrb[11].mxu0 }
  0xfb   : > { %v548_v3 = vadd.f32 %v886_v52, %v509_v58  ;;  %v530_v4 = vadd.f32 %v886_v52, %v491_v59  ;;  %v510_v5 = vmul.f32 %v754_v1, %v881_v50  ;;  %v492_v6 = vmul.f32 %v881_v50, %v384_v2  ;;  %v448_v7 = vpop.f32.mrb[11].mxu1 }
  0xfc   : > { %v564_v8 = vmax.f32 %v532_v62, 0.0  ;;  %v546_v9 = vadd.f32 %v886_v52, %v507_v63  ;;  %v533_v10 = vadd.f32 %v886_v52, %v494_v0  ;;  %v508_v11 = vmul.f32 %v881_v50, %v448_v7 }
  0xfd   : > { %v580_v12 = vmax.f32 %v548_v3, 0.0  ;;  %v562_v13 = vmax.f32 %v530_v4, 0.0  ;;  %v549_v14 = vadd.f32 %v886_v52, %v510_v5  ;;  %v531_v15 = vadd.f32 %v886_v52, %v492_v6 }
  0xfe   : > { %596 = vst [vmem:[%s899_s6 + $0x50] sm:$0xff] %v564_v8  ;;  %v578_v16 = vmax.f32 %v546_v9, 0.0  ;;  %v565_v17 = vmax.f32 %v533_v10, 0.0  ;;  %v547_v18 = vadd.f32 %v886_v52, %v508_v11 }
  0xff   : > { %612 = vst [vmem:[%s899_s6 + $0xd0] sm:$0xff] %v580_v12  ;;  %594 = vst [vmem:[%s899_s6 + $0x40] sm:$0xff] %v562_v13  ;;  %v581_v19 = vmax.f32 %v549_v14, 0.0  ;;  %v563_v20 = vmax.f32 %v531_v15, 0.0  ;;  %v741_v21 = vpop.f32.mrb[12].mxu0 }
 0x100   : > { %610 = vst [vmem:[%s899_s6 + $0xc0] sm:$0xff] %v578_v16  ;;  %597 = vst [vmem:[%s899_s6 + $0x58] sm:$0xff] %v565_v17  ;;  %v579_v22 = vmax.f32 %v547_v18, 0.0  ;;  %v497_v23 = vmul.f32 %v741_v21, %v881_v50  ;;  %v757_v24 = vpop.f32.mrb[12].mxu1  ;;  %v397_v25 = vpop.f32.mrb[13].mxu0 }
 0x101   : > { %613 = vst [vmem:[%s899_s6 + $0xd8] sm:$0xff] %v581_v19  ;;  %595 = vst [vmem:[%s899_s6 + $0x48] sm:$0xff] %v563_v20  ;;  %v513_v26 = vmul.f32 %v757_v24, %v881_v50  ;;  %v495_v27 = vmul.f32 %v881_v50, %v397_v25  ;;  %v461_v28 = vpop.f32.mrb[13].mxu1  ;;  %v742_v29 = vpop.f32.mrb[14].mxu0 }
 0x102   : > { %611 = vst [vmem:[%s899_s6 + $0xc8] sm:$0xff] %v579_v22  ;;  %v536_v30 = vadd.f32 %v886_v52, %v497_v23  ;;  %v511_v31 = vmul.f32 %v881_v50, %v461_v28  ;;  %v498_v32 = vmul.f32 %v742_v29, %v881_v50  ;;  %v758_v33 = vpop.f32.mrb[14].mxu1  ;;  %v400_v34 = vpop.f32.mrb[15].mxu0 }
 0x103   : > { %v552_v35 = vadd.f32 %v886_v52, %v513_v26  ;;  %v534_v36 = vadd.f32 %v886_v52, %v495_v27  ;;  %v514_v37 = vmul.f32 %v758_v33, %v881_v50  ;;  %v496_v38 = vmul.f32 %v881_v50, %v400_v34  ;;  %v464_v39 = vpop.f32.mrb[15].mxu1 }
 0x104   : > { %v568_v40 = vmax.f32 %v536_v30, 0.0  ;;  %v550_v41 = vadd.f32 %v886_v52, %v511_v31  ;;  %v537_v42 = vadd.f32 %v886_v52, %v498_v32  ;;  %v512_v43 = vmul.f32 %v881_v50, %v464_v39 }
 0x105   : > { %v584_v44 = vmax.f32 %v552_v35, 0.0  ;;  %v566_v45 = vmax.f32 %v534_v36, 0.0  ;;  %v553_v46 = vadd.f32 %v886_v52, %v514_v37  ;;  %v535_v47 = vadd.f32 %v886_v52, %v496_v38 }
 0x106   : > { %600 = vst [vmem:[%s899_s6 + $0x70] sm:$0xff] %v568_v40  ;;  %v582_v48 = vmax.f32 %v550_v41, 0.0  ;;  %v569_v49 = vmax.f32 %v537_v42, 0.0  ;;  %v551_v51 = vadd.f32 %v886_v52, %v512_v43 }
 0x107   : > { %616 = vst [vmem:[%s899_s6 + $0xf0] sm:$0xff] %v584_v44  ;;  %598 = vst [vmem:[%s899_s6 + $0x60] sm:$0xff] %v566_v45  ;;  %v585_v53 = vmax.f32 %v553_v46, 0.0  ;;  %v567_v54 = vmax.f32 %v535_v47, 0.0 }
 0x108   : > { %614 = vst [vmem:[%s899_s6 + $0xe0] sm:$0xff] %v582_v48  ;;  %601 = vst [vmem:[%s899_s6 + $0x78] sm:$0xff] %v569_v49  ;;  %v583_v50 = vmax.f32 %v551_v51, 0.0 }
 0x109   : > { %617 = vst [vmem:[%s899_s6 + $0xf8] sm:$0xff] %v585_v53  ;;  %599 = vst [vmem:[%s899_s6 + $0x68] sm:$0xff] %v567_v54 }
 0x10a   : > { %615 = vst [vmem:[%s899_s6 + $0xe8] sm:$0xff] %v583_v50 }
 0x10b PF: > { %s14_s15 = sadd.s32 1, %s779_s15  }
 0x10c   : > { %p11_p4 = scmp.ge.s32.totalorder %s14_s15, 4  }
 0x10e   :  { %13 = sbr.rel (!%p11_p4) target bundleno = 1 (0x1), region = 66 }

// kernel: forward.12
= control target key start
LH: loop header
LB: loop body
LE: loop exit
PB: predicated region body
PF: predicated region fallthrough
CT: control target
= control target key end

     0   :  { %v389_v0 = vmov 0   ;;  %vm138_vm0 = vcmask 130048   ;;  %s636_s1 = inlined_call_operand.vmem [shape: bf16[144,128], index: 1, kind: input, shape index: {}]   ;;  %s637_s0 = inlined_call_operand.vmem [shape: f32[128,144], index: 0, kind: input, shape index: {}]   ;;  %s638_s2 = inlined_call_operand.vmem [shape: f32[1,128], index: 2, kind: input, shape index: {}]   ;;  %s639_s3 = inlined_call_operand.vmem [shape: f32[1,128], index: 3, kind: input, shape index: {}]   ;;  %s640_s4 = inlined_call_operand.vmem [shape: f32[128,128], index: 4, kind: output, shape index: {}]  }
   0x1   :  { %163 = vmatprep.subr.bf16.mxu0 %v389_v0  ;;  %361 = vmatprep.subr.bf16.mxu1 %v389_v0  ;;  %v380_v1 = vld [vmem:[%s636_s1] sm:$0xff]   ;;  %v381_v2 = vld [vmem:[%s636_s1 + $0x8] sm:$0xff]   ;;  %v382_v3 = vld [vmem:[%s636_s1 + $0x10] sm:$0xff]  }
   0x2   :  { %164 = vmatpush1.bf16.msra.mxu0 %v380_v1  ;;  %370 = vmatpush1.bf16.msra.mxu1 %v380_v1  ;;  %v19_v4 = vld [vmem:[%s637_s0 + $0x8] sm:$0xff]  ;;  %v21_v5 = vld [vmem:[%s637_s0 + $0x18] sm:$0xff]  ;;  %v384_v11 = vld [vmem:[%s636_s1 + $0x20] sm:$0xff]  }
   0x3   :  { %165 = vmatprep.subr.bf16.mxu0 %v389_v0  ;;  %362 = vmatprep.subr.bf16.mxu1 %v389_v0  ;;  %v35_v6 = vld [vmem:[%s637_s0 + $0x88] sm:$0xff]  ;;  %v383_v7 = vld [vmem:[%s636_s1 + $0x18] sm:$0xff]   ;;  %v51_v8 = vpack.c.bf16 %v21_v5, %v19_v4  ;;  %v386_v13 = vld [vmem:[%s636_s1 + $0x30] sm:$0xff]  }
   0x4   :  { %v37_v9 = vld [vmem:[%s637_s0 + $0x98] sm:$0xff]  ;;  %v385_v12 = vld [vmem:[%s636_s1 + $0x28] sm:$0xff]   ;;  %v388_v15 = vld [vmem:[%s636_s1 + $0x40] sm:$0xff]  }
   0x5   :  { %v59_v10 = vpack.c.bf16 %v37_v9, %v35_v6  ;;  %351 = vmatprep.mubr.msk.bf16.mxu0 %vm138_vm0, %v51_v8  ;;  %v387_v14 = vld [vmem:[%s636_s1 + $0x38] sm:$0xff]   ;;  %v18_v16 = vld [vmem:[%s637_s0] sm:$0xff]  ;;  %v20_v17 = vld [vmem:[%s637_s0 + $0x10] sm:$0xff] }
   0x6   :  { %166 = vmatpush1.bf16.msra.mxu0 %v381_v2  ;;  %371 = vmatpush1.bf16.msra.mxu1 %v381_v2  ;;  %v34_v18 = vld [vmem:[%s637_s0 + $0x80] sm:$0xff]  ;;  %v36_v19 = vld [vmem:[%s637_s0 + $0x90] sm:$0xff]  ;;  %v23_v20 = vld [vmem:[%s637_s0 + $0x28] sm:$0xff]  ;;  %v50_v24 = vpack.c.bf16 %v20_v17, %v18_v16 }
   0x7   :  { %167 = vmatprep.subr.bf16.mxu0 %v389_v0  ;;  %363 = vmatprep.subr.bf16.mxu1 %v389_v0  ;;  %v25_v21 = vld [vmem:[%s637_s0 + $0x38] sm:$0xff]  ;;  %v39_v22 = vld [vmem:[%s637_s0 + $0xa8] sm:$0xff]  ;;  %v58_v25 = vpack.c.bf16 %v36_v19, %v34_v18  ;;  %v22_v28 = vld [vmem:[%s637_s0 + $0x20] sm:$0xff] }
   0x8   :  { %355 = vmatprep.mubr.msk.bf16.mxu1 %vm138_vm0, %v59_v10  ;;  %v41_v23 = vld [vmem:[%s637_s0 + $0xb8] sm:$0xff]  ;;  %v53_v26 = vpack.c.bf16 %v25_v21, %v23_v20  ;;  %v24_v29 = vld [vmem:[%s637_s0 + $0x30] sm:$0xff]  ;;  %v38_v30 = vld [vmem:[%s637_s0 + $0xa0] sm:$0xff] }
   0x9   :  { %v61_v27 = vpack.c.bf16 %v41_v23, %v39_v22  ;;  %v40_v31 = vld [vmem:[%s637_s0 + $0xb0] sm:$0xff]  ;;  %v27_v32 = vld [vmem:[%s637_s0 + $0x48] sm:$0xff]  ;;  %v29_v33 = vld [vmem:[%s637_s0 + $0x58] sm:$0xff]  ;;  %v52_v36 = vpack.c.bf16 %v24_v29, %v22_v28 }
   0xa   :  { %168 = vmatpush1.bf16.msra.mxu0 %v382_v3  ;;  %372 = vmatpush1.bf16.msra.mxu1 %v382_v3  ;;  %v43_v34 = vld [vmem:[%s637_s0 + $0xc8] sm:$0xff]  ;;  %v45_v35 = vld [vmem:[%s637_s0 + $0xd8] sm:$0xff]  ;;  %v60_v37 = vpack.c.bf16 %v40_v31, %v38_v30  ;;  %v55_v38 = vpack.c.bf16 %v29_v33, %v27_v32  ;;  %v26_v40 = vld [vmem:[%s637_s0 + $0x40] sm:$0xff] }
   0xb   :  { %169 = vmatprep.subr.bf16.mxu0 %v389_v0  ;;  %364 = vmatprep.subr.bf16.mxu1 %v389_v0  ;;  %v63_v39 = vpack.c.bf16 %v45_v35, %v43_v34  ;;  %v28_v41 = vld [vmem:[%s637_s0 + $0x50] sm:$0xff]  ;;  %v42_v42 = vld [vmem:[%s637_s0 + $0xc0] sm:$0xff]  ;;  %v31_v44 = vld [vmem:[%s637_s0 + $0x68] sm:$0xff] }
   0xc   :  { %v44_v43 = vld [vmem:[%s637_s0 + $0xd0] sm:$0xff]  ;;  %v33_v45 = vld [vmem:[%s637_s0 + $0x78] sm:$0xff]  ;;  %v47_v46 = vld [vmem:[%s637_s0 + $0xe8] sm:$0xff]  ;;  %v54_v48 = vpack.c.bf16 %v28_v41, %v26_v40 }
   0xd   :  { %v49_v47 = vld [vmem:[%s637_s0 + $0xf8] sm:$0xff]  ;;  %v62_v49 = vpack.c.bf16 %v44_v43, %v42_v42  ;;  %v57_v50 = vpack.c.bf16 %v33_v45, %v31_v44  ;;  %v30_v52 = vld [vmem:[%s637_s0 + $0x60] sm:$0xff]  ;;  %v32_v53 = vld [vmem:[%s637_s0 + $0x70] sm:$0xff] }
   0xe   :  { %170 = vmatpush1.bf16.msra.mxu0 %v383_v7  ;;  %373 = vmatpush1.bf16.msra.mxu1 %v383_v7  ;;  %v65_v51 = vpack.c.bf16 %v49_v47, %v47_v46  ;;  %v46_v54 = vld [vmem:[%s637_s0 + $0xe0] sm:$0xff]  ;;  %v48_v55 = vld [vmem:[%s637_s0 + $0xf0] sm:$0xff]  ;;  %v56_v56 = vpack.c.bf16 %v32_v53, %v30_v52 }
   0xf   :  { %171 = vmatprep.subr.bf16.mxu0 %v389_v0  ;;  %365 = vmatprep.subr.bf16.mxu1 %v389_v0  ;;  %v64_v57 = vpack.c.bf16 %v48_v55, %v46_v54  ;;  %v549_v58 = vld [vmem:[%s638_s2] ss:$0 sm:$0xff] }
  0x10   :  { %v554_v60 = vld [vmem:[%s639_s3] ss:$0 sm:$0xff] }
  0x12   :  { %172 = vmatpush1.bf16.msra.mxu0 %v384_v11  ;;  %374 = vmatpush1.bf16.msra.mxu1 %v384_v11 }
  0x13   :  { %173 = vmatprep.subr.bf16.mxu0 %v389_v0  ;;  %366 = vmatprep.subr.bf16.mxu1 %v389_v0 }
  0x16   :  { %174 = vmatpush1.bf16.msra.mxu0 %v385_v12  ;;  %375 = vmatpush1.bf16.msra.mxu1 %v385_v12 }
  0x17   :  { %175 = vmatprep.subr.bf16.mxu0 %v389_v0  ;;  %367 = vmatprep.subr.bf16.mxu1 %v389_v0 }
  0x1a   :  { %176 = vmatpush1.bf16.msra.mxu0 %v386_v13  ;;  %376 = vmatpush1.bf16.msra.mxu1 %v386_v13 }
  0x1b   :  { %177 = vmatprep.subr.bf16.mxu0 %v389_v0  ;;  %368 = vmatprep.subr.bf16.mxu1 %v389_v0 }
  0x1e   :  { %178 = vmatpush1.bf16.msra.mxu0 %v387_v14  ;;  %377 = vmatpush1.bf16.msra.mxu1 %v387_v14 }
  0x1f   :  { %179 = vmatprep.subr.bf16.mxu0 %v389_v0  ;;  %369 = vmatprep.subr.bf16.mxu1 %v389_v0 }
  0x22   :  { %180 = vmatpush1.bf16.msra.mxu0 %v388_v15  ;;  %378 = vmatpush1.bf16.msra.mxu1 %v388_v15 }
  0x25   :  { %196 = vmatmul.mubr.bf16.vlgmr.msra.gmra.mrb[0].mxu0 %v50_v24  ;;  %228 = vmatmul.mubr.bf16.vlgmr.msra.gmra.mrb[0].mxu1 %v58_v25 }
  0x26   :  { %352 = vmatprep.mubr.msk.bf16.mxu0 %vm138_vm0, %v53_v26  ;;  %356 = vmatprep.mubr.msk.bf16.mxu1 %vm138_vm0, %v61_v27 }
  0x2d   :  { %204 = vmatmul.mubr.bf16.gmra.mrb[4].mxu0 %v52_v36  ;;  %236 = vmatmul.mubr.bf16.gmra.mrb[4].mxu1 %v60_v37 }
  0x2e   :  { %353 = vmatprep.mubr.msk.bf16.mxu0 %vm138_vm0, %v55_v38  ;;  %357 = vmatprep.mubr.msk.bf16.mxu1 %vm138_vm0, %v63_v39 }
  0x35   :  { %212 = vmatmul.mubr.bf16.gmra.mrb[8].mxu0 %v54_v48  ;;  %244 = vmatmul.mubr.bf16.gmra.mrb[8].mxu1 %v62_v49 }
  0x36   :  { %354 = vmatprep.mubr.msk.bf16.mxu0 %vm138_vm0, %v57_v50  ;;  %358 = vmatprep.mubr.msk.bf16.mxu1 %vm138_vm0, %v65_v51 }
  0x3d   :  { %220 = vmatmul.mubr.bf16.gmra.mrb[12].mxu0 %v56_v56  ;;  %252 = vmatmul.mubr.bf16.gmra.mrb[12].mxu1 %v64_v57 }
  0xf8   :  { %v197_v59 = vpop.f32.mrb[0].mxu0  ;;  %v229_v61 = vpop.f32.mrb[0].mxu1 }
  0xf9   :  { %v267_v62 = vmul.f32 %v549_v58, %v197_v59  ;;  %v275_v63 = vmul.f32 %v549_v58, %v229_v61  ;;  %v199_v0 = vpop.f32.mrb[1].mxu0  ;;  %v231_v1 = vpop.f32.mrb[1].mxu1 }
  0xfa   :  { %v200_v2 = vpop.f32.mrb[2].mxu0  ;;  %v232_v3 = vpop.f32.mrb[2].mxu1 }
  0xfb   :  { %v290_v4 = vadd.f32 %v554_v60, %v267_v62  ;;  %v298_v5 = vadd.f32 %v554_v60, %v275_v63  ;;  %v268_v6 = vmul.f32 %v549_v58, %v200_v2  ;;  %v276_v7 = vmul.f32 %v549_v58, %v232_v3  ;;  %v202_v8 = vpop.f32.mrb[3].mxu0  ;;  %v234_v9 = vpop.f32.mrb[3].mxu1 }
  0xfd   :  { %v306_v10 = vmax.f32 %v290_v4, 0.0  ;;  %v314_v11 = vmax.f32 %v298_v5, 0.0  ;;  %v291_v12 = vadd.f32 %v554_v60, %v268_v6  ;;  %v299_v13 = vadd.f32 %v554_v60, %v276_v7 }
  0xff   :  { %322 = vst [vmem:[%s640_s4] sm:$0xff] %v306_v10  ;;  %330 = vst [vmem:[%s640_s4 + $0x40] sm:$0xff] %v314_v11  ;;  %v307_v14 = vmax.f32 %v291_v12, 0.0  ;;  %v315_v15 = vmax.f32 %v299_v13, 0.0 }
 0x100   :  { %v205_v16 = vpop.f32.mrb[4].mxu0  ;;  %v237_v17 = vpop.f32.mrb[4].mxu1 }
 0x101   :  { %323 = vst [vmem:[%s640_s4 + $0x8] sm:$0xff] %v307_v14  ;;  %331 = vst [vmem:[%s640_s4 + $0x48] sm:$0xff] %v315_v15  ;;  %v269_v18 = vmul.f32 %v549_v58, %v205_v16  ;;  %v277_v19 = vmul.f32 %v549_v58, %v237_v17  ;;  %v207_v20 = vpop.f32.mrb[5].mxu0  ;;  %v239_v21 = vpop.f32.mrb[5].mxu1 }
 0x102   :  { %v208_v22 = vpop.f32.mrb[6].mxu0  ;;  %v240_v23 = vpop.f32.mrb[6].mxu1 }
 0x103   :  { %v292_v24 = vadd.f32 %v554_v60, %v269_v18  ;;  %v300_v25 = vadd.f32 %v554_v60, %v277_v19  ;;  %v270_v26 = vmul.f32 %v549_v58, %v208_v22  ;;  %v278_v27 = vmul.f32 %v549_v58, %v240_v23  ;;  %v210_v28 = vpop.f32.mrb[7].mxu0  ;;  %v242_v29 = vpop.f32.mrb[7].mxu1 }
 0x105   :  { %v308_v30 = vmax.f32 %v292_v24, 0.0  ;;  %v316_v31 = vmax.f32 %v300_v25, 0.0  ;;  %v293_v32 = vadd.f32 %v554_v60, %v270_v26  ;;  %v301_v33 = vadd.f32 %v554_v60, %v278_v27 }
 0x107   :  { %324 = vst [vmem:[%s640_s4 + $0x10] sm:$0xff] %v308_v30  ;;  %332 = vst [vmem:[%s640_s4 + $0x50] sm:$0xff] %v316_v31  ;;  %v309_v34 = vmax.f32 %v293_v32, 0.0  ;;  %v317_v35 = vmax.f32 %v301_v33, 0.0 }
 0x108   :  { %v213_v36 = vpop.f32.mrb[8].mxu0  ;;  %v245_v37 = vpop.f32.mrb[8].mxu1 }
 0x109   :  { %325 = vst [vmem:[%s640_s4 + $0x18] sm:$0xff] %v309_v34  ;;  %333 = vst [vmem:[%s640_s4 + $0x58] sm:$0xff] %v317_v35  ;;  %v271_v38 = vmul.f32 %v549_v58, %v213_v36  ;;  %v279_v39 = vmul.f32 %v549_v58, %v245_v37  ;;  %v215_v40 = vpop.f32.mrb[9].mxu0  ;;  %v247_v41 = vpop.f32.mrb[9].mxu1 }
 0x10a   :  { %v216_v42 = vpop.f32.mrb[10].mxu0  ;;  %v248_v43 = vpop.f32.mrb[10].mxu1 }
 0x10b   :  { %v294_v44 = vadd.f32 %v554_v60, %v271_v38  ;;  %v302_v45 = vadd.f32 %v554_v60, %v279_v39  ;;  %v272_v46 = vmul.f32 %v549_v58, %v216_v42  ;;  %v280_v47 = vmul.f32 %v549_v58, %v248_v43  ;;  %v218_v48 = vpop.f32.mrb[11].mxu0  ;;  %v250_v49 = vpop.f32.mrb[11].mxu1 }
 0x10d   :  { %v310_v50 = vmax.f32 %v294_v44, 0.0  ;;  %v318_v51 = vmax.f32 %v302_v45, 0.0  ;;  %v295_v52 = vadd.f32 %v554_v60, %v272_v46  ;;  %v303_v53 = vadd.f32 %v554_v60, %v280_v47 }
 0x10f   :  { %326 = vst [vmem:[%s640_s4 + $0x20] sm:$0xff] %v310_v50  ;;  %334 = vst [vmem:[%s640_s4 + $0x60] sm:$0xff] %v318_v51  ;;  %v311_v54 = vmax.f32 %v295_v52, 0.0  ;;  %v319_v55 = vmax.f32 %v303_v53, 0.0 }
 0x110   :  { %v221_v56 = vpop.f32.mrb[12].mxu0  ;;  %v253_v57 = vpop.f32.mrb[12].mxu1 }
 0x111   :  { %327 = vst [vmem:[%s640_s4 + $0x28] sm:$0xff] %v311_v54  ;;  %335 = vst [vmem:[%s640_s4 + $0x68] sm:$0xff] %v319_v55  ;;  %v273_v59 = vmul.f32 %v549_v58, %v221_v56  ;;  %v281_v61 = vmul.f32 %v549_v58, %v253_v57  ;;  %v223_v62 = vpop.f32.mrb[13].mxu0  ;;  %v255_v63 = vpop.f32.mrb[13].mxu1 }
 0x112   :  { %v224_v0 = vpop.f32.mrb[14].mxu0  ;;  %v256_v1 = vpop.f32.mrb[14].mxu1 }
 0x113   :  { %v296_v2 = vadd.f32 %v554_v60, %v273_v59  ;;  %v304_v3 = vadd.f32 %v554_v60, %v281_v61  ;;  %v274_v4 = vmul.f32 %v549_v58, %v224_v0  ;;  %v282_v5 = vmul.f32 %v549_v58, %v256_v1  ;;  %v226_v6 = vpop.f32.mrb[15].mxu0  ;;  %v258_v7 = vpop.f32.mrb[15].mxu1 }
 0x115   :  { %v312_v8 = vmax.f32 %v296_v2, 0.0  ;;  %v320_v9 = vmax.f32 %v304_v3, 0.0  ;;  %v297_v10 = vadd.f32 %v554_v60, %v274_v4  ;;  %v305_v11 = vadd.f32 %v554_v60, %v282_v5 }
 0x117   :  { %328 = vst [vmem:[%s640_s4 + $0x30] sm:$0xff] %v312_v8  ;;  %336 = vst [vmem:[%s640_s4 + $0x70] sm:$0xff] %v320_v9  ;;  %v313_v12 = vmax.f32 %v297_v10, 0.0  ;;  %v321_v13 = vmax.f32 %v305_v11, 0.0 }
 0x119   :  { %329 = vst [vmem:[%s640_s4 + $0x38] sm:$0xff] %v313_v12  ;;  %337 = vst [vmem:[%s640_s4 + $0x78] sm:$0xff] %v321_v13 }

// kernel: forward.14
= control target key start
LH: loop header
LB: loop body
LE: loop exit
PB: predicated region body
PF: predicated region fallthrough
CT: control target
= control target key end

     0   :  { %s642_s1 = inlined_call_operand.vmem [shape: bf16[128,128], index: 1, kind: input, shape index: {}]   ;;  %s643_s0 = inlined_call_operand.vmem [shape: f32[128,128], index: 0, kind: input, shape index: {}]   ;;  %s644_s2 = inlined_call_operand.vmem [shape: f32[1,128], index: 2, kind: input, shape index: {}]   ;;  %s645_s3 = inlined_call_operand.vmem [shape: f32[1,128], index: 3, kind: input, shape index: {}]   ;;  %s646_s4 = inlined_call_operand.vmem [shape: f32[128,128], index: 4, kind: input, shape index: {}]   ;;  %s647_s5 = inlined_call_operand.vmem [shape: f32[128,128], index: 5, kind: output, shape index: {}]  }
   0x1   :  { %v394_v0 = vld [vmem:[%s642_s1] sm:$0xff]   ;;  %v395_v1 = vld [vmem:[%s642_s1 + $0x8] sm:$0xff]   ;;  %v396_v2 = vld [vmem:[%s642_s1 + $0x10] sm:$0xff]  }
   0x2   :  { %346 = vmatprep.subr.bf16.mxu0 %v394_v0  ;;  %378 = vmatprep.subr.bf16.mxu1 %v394_v0  ;;  %v397_v3 = vld [vmem:[%s642_s1 + $0x18] sm:$0xff]   ;;  %v21_v4 = vld [vmem:[%s643_s0] sm:$0xff]  ;;  %v22_v5 = vld [vmem:[%s643_s0 + $0x8] sm:$0xff] }
   0x3   :  { %347 = vmatpush3.bf16.msra.mxu0 %v394_v0  ;;  %386 = vmatpush3.bf16.msra.mxu1 %v394_v0  ;;  %v29_v6 = vld [vmem:[%s643_s0 + $0x40] sm:$0xff]  ;;  %v37_v7 = vpack.c.bf16 %v22_v5, %v21_v4  ;;  %v30_v8 = vld [vmem:[%s643_s0 + $0x48] sm:$0xff]  ;;  %v400_v12 = vld [vmem:[%s642_s1 + $0x30] sm:$0xff]  }
   0x4   :  { %348 = vmatprep.subr.bf16.mxu0 %v395_v1  ;;  %379 = vmatprep.subr.bf16.mxu1 %v395_v1  ;;  %v41_v9 = vpack.c.bf16 %v30_v8, %v29_v6  ;;  %v398_v10 = vld [vmem:[%s642_s1 + $0x20] sm:$0xff]   ;;  %v399_v11 = vld [vmem:[%s642_s1 + $0x28] sm:$0xff]   ;;  %v401_v13 = vld [vmem:[%s642_s1 + $0x38] sm:$0xff]  }
   0x5   :  { %362 = vmatprep.mubr.bf16.mxu0 %v37_v7  ;;  %v23_v14 = vld [vmem:[%s643_s0 + $0x10] sm:$0xff]  ;;  %v24_v15 = vld [vmem:[%s643_s0 + $0x18] sm:$0xff]  ;;  %v25_v18 = vld [vmem:[%s643_s0 + $0x20] sm:$0xff] }
   0x6   :  { %370 = vmatprep.mubr.bf16.mxu1 %v41_v9  ;;  %v31_v16 = vld [vmem:[%s643_s0 + $0x50] sm:$0xff]  ;;  %v32_v17 = vld [vmem:[%s643_s0 + $0x58] sm:$0xff]  ;;  %v26_v19 = vld [vmem:[%s643_s0 + $0x28] sm:$0xff]  ;;  %v38_v22 = vpack.c.bf16 %v24_v15, %v23_v14 }
   0x7   :  { %349 = vmatpush3.bf16.msra.mxu0 %v395_v1  ;;  %387 = vmatpush3.bf16.msra.mxu1 %v395_v1  ;;  %v33_v20 = vld [vmem:[%s643_s0 + $0x60] sm:$0xff]  ;;  %v34_v21 = vld [vmem:[%s643_s0 + $0x68] sm:$0xff]  ;;  %v42_v23 = vpack.c.bf16 %v32_v17, %v31_v16  ;;  %v39_v24 = vpack.c.bf16 %v26_v19, %v25_v18  ;;  %v27_v26 = vld [vmem:[%s643_s0 + $0x30] sm:$0xff] }
   0x8   :  { %350 = vmatprep.subr.bf16.mxu0 %v396_v2  ;;  %380 = vmatprep.subr.bf16.mxu1 %v396_v2  ;;  %v43_v25 = vpack.c.bf16 %v34_v21, %v33_v20  ;;  %v28_v27 = vld [vmem:[%s643_s0 + $0x38] sm:$0xff]  ;;  %v35_v28 = vld [vmem:[%s643_s0 + $0x70] sm:$0xff]  ;;  %v507_v32 = vld [vmem:[%s644_s2] ss:$0 sm:$0xff] }
   0x9   :  { %v36_v29 = vld [vmem:[%s643_s0 + $0x78] sm:$0xff]  ;;  %v40_v30 = vpack.c.bf16 %v28_v27, %v27_v26  ;;  %v512_v34 = vld [vmem:[%s645_s3] ss:$0 sm:$0xff]  ;;  %v254_v40 = vld [vmem:[%s646_s4 + $0x10] sm:$0xff] }
   0xa   :  { %v44_v31 = vpack.c.bf16 %v36_v29, %v35_v28  ;;  %v262_v41 = vld [vmem:[%s646_s4 + $0x50] sm:$0xff]  ;;  %v252_v48 = vld [vmem:[%s646_s4] sm:$0xff]  ;;  %v255_v56 = vld [vmem:[%s646_s4 + $0x18] sm:$0xff] }
   0xb   :  { %351 = vmatpush3.bf16.msra.mxu0 %v396_v2  ;;  %388 = vmatpush3.bf16.msra.mxu1 %v396_v2  ;;  %v260_v49 = vld [vmem:[%s646_s4 + $0x40] sm:$0xff]  ;;  %v263_v57 = vld [vmem:[%s646_s4 + $0x58] sm:$0xff]  ;;  %v253_v0 = vld [vmem:[%s646_s4 + $0x8] sm:$0xff] }
   0xc   :  { %352 = vmatprep.subr.bf16.mxu0 %v397_v3  ;;  %381 = vmatprep.subr.bf16.mxu1 %v397_v3  ;;  %v261_v1 = vld [vmem:[%s646_s4 + $0x48] sm:$0xff] }
   0xf   :  { %353 = vmatpush3.bf16.msra.mxu0 %v397_v3  ;;  %389 = vmatpush3.bf16.msra.mxu1 %v397_v3 }
  0x10   :  { %354 = vmatprep.subr.bf16.mxu0 %v398_v10  ;;  %382 = vmatprep.subr.bf16.mxu1 %v398_v10 }
  0x13   :  { %355 = vmatpush3.bf16.msra.mxu0 %v398_v10  ;;  %390 = vmatpush3.bf16.msra.mxu1 %v398_v10 }
  0x14   :  { %356 = vmatprep.subr.bf16.mxu0 %v399_v11  ;;  %383 = vmatprep.subr.bf16.mxu1 %v399_v11 }
  0x17   :  { %357 = vmatpush3.bf16.msra.mxu0 %v399_v11  ;;  %391 = vmatpush3.bf16.msra.mxu1 %v399_v11 }
  0x18   :  { %358 = vmatprep.subr.bf16.mxu0 %v400_v12  ;;  %384 = vmatprep.subr.bf16.mxu1 %v400_v12 }
  0x1b   :  { %359 = vmatpush3.bf16.msra.mxu0 %v400_v12  ;;  %392 = vmatpush3.bf16.msra.mxu1 %v400_v12 }
  0x1c   :  { %360 = vmatprep.subr.bf16.mxu0 %v401_v13  ;;  %385 = vmatprep.subr.bf16.mxu1 %v401_v13 }
  0x1f   :  { %361 = vmatpush3.bf16.msra.mxu0 %v401_v13  ;;  %393 = vmatpush3.bf16.msra.mxu1 %v401_v13 }
  0x22   :  { %363 = vmatmul.mubr.bf16.vlgmr.msra.gmra.mrb[0].mxu0 %v38_v22  ;;  %371 = vmatmul.mubr.bf16.vlgmr.msra.gmra.mrb[0].mxu1 %v42_v23 }
  0x23   :  { %366 = vmatprep.mubr.bf16.mxu0 %v39_v24  ;;  %374 = vmatprep.mubr.bf16.mxu1 %v43_v25  ;;  %v258_v24 = vld [vmem:[%s646_s4 + $0x30] sm:$0xff] }
  0x24   :  { %v266_v25 = vld [vmem:[%s646_s4 + $0x70] sm:$0xff] }
  0x2a   :  { %367 = vmatmul.mubr.bf16.gmra.mrb[4].mxu0 %v40_v30  ;;  %375 = vmatmul.mubr.bf16.gmra.mrb[4].mxu1 %v44_v31 }
  0xf5   :  { %v364_v33 = vpop.f32.mrb[0].mxu0  ;;  %v372_v35 = vpop.f32.mrb[0].mxu1 }
  0xf6   :  { %v215_v36 = vmul.f32 %v364_v33, %v507_v32  ;;  %v223_v37 = vmul.f32 %v372_v35, %v507_v32  ;;  %v143_v38 = vpop.f32.mrb[1].mxu0  ;;  %v175_v39 = vpop.f32.mrb[1].mxu1  ;;  %v256_v33 = vld [vmem:[%s646_s4 + $0x20] sm:$0xff] }
  0xf7   :  { %v213_v42 = vmul.f32 %v507_v32, %v143_v38  ;;  %v221_v43 = vmul.f32 %v507_v32, %v175_v39  ;;  %v365_v44 = vpop.f32.mrb[2].mxu0  ;;  %v373_v45 = vpop.f32.mrb[2].mxu1  ;;  %v264_v35 = vld [vmem:[%s646_s4 + $0x60] sm:$0xff] }
  0xf8   :  { %v238_v46 = vadd.f32 %v512_v34, %v215_v36  ;;  %v246_v47 = vadd.f32 %v512_v34, %v223_v37  ;;  %v216_v50 = vmul.f32 %v365_v44, %v507_v32  ;;  %v224_v51 = vmul.f32 %v373_v45, %v507_v32  ;;  %v146_v52 = vpop.f32.mrb[3].mxu0  ;;  %v178_v53 = vpop.f32.mrb[3].mxu1 }
  0xf9   :  { %v236_v54 = vadd.f32 %v512_v34, %v213_v42  ;;  %v244_v55 = vadd.f32 %v512_v34, %v221_v43  ;;  %v214_v58 = vmul.f32 %v507_v32, %v146_v52  ;;  %v222_v59 = vmul.f32 %v507_v32, %v178_v53  ;;  %v259_v42 = vld [vmem:[%s646_s4 + $0x38] sm:$0xff] }
  0xfa   :  { %v270_v60 = vadd.f32 %v254_v40, %v238_v46  ;;  %v278_v61 = vadd.f32 %v262_v41, %v246_v47  ;;  %v239_v62 = vadd.f32 %v512_v34, %v216_v50  ;;  %v247_v63 = vadd.f32 %v512_v34, %v224_v51  ;;  %v267_v43 = vld [vmem:[%s646_s4 + $0x78] sm:$0xff]  ;;  %v257_v50 = vld [vmem:[%s646_s4 + $0x28] sm:$0xff] }
  0xfb   :  { %v268_v2 = vadd.f32 %v252_v48, %v236_v54  ;;  %v276_v3 = vadd.f32 %v260_v49, %v244_v55  ;;  %v237_v4 = vadd.f32 %v512_v34, %v214_v58  ;;  %v245_v5 = vadd.f32 %v512_v34, %v222_v59  ;;  %v265_v51 = vld [vmem:[%s646_s4 + $0x68] sm:$0xff] }
  0xfc   :  { %v286_v6 = vmax.f32 %v270_v60, 0.0  ;;  %v294_v7 = vmax.f32 %v278_v61, 0.0  ;;  %v271_v8 = vadd.f32 %v255_v56, %v239_v62  ;;  %v279_v9 = vadd.f32 %v263_v57, %v247_v63 }
  0xfd   :  { %v284_v10 = vmax.f32 %v268_v2, 0.0  ;;  %v292_v11 = vmax.f32 %v276_v3, 0.0  ;;  %v269_v12 = vadd.f32 %v253_v0, %v237_v4  ;;  %v277_v13 = vadd.f32 %v261_v1, %v245_v5  ;;  %v368_v14 = vpop.f32.mrb[4].mxu0  ;;  %v376_v15 = vpop.f32.mrb[4].mxu1 }
  0xfe   :  { %302 = vst [vmem:[%s647_s5 + $0x10] sm:$0xff] %v286_v6  ;;  %310 = vst [vmem:[%s647_s5 + $0x50] sm:$0xff] %v294_v7  ;;  %v287_v16 = vmax.f32 %v271_v8, 0.0  ;;  %v295_v17 = vmax.f32 %v279_v9, 0.0  ;;  %v219_v18 = vmul.f32 %v368_v14, %v507_v32  ;;  %v227_v19 = vmul.f32 %v376_v15, %v507_v32  ;;  %v159_v20 = vpop.f32.mrb[5].mxu0  ;;  %v191_v21 = vpop.f32.mrb[5].mxu1 }
  0xff   :  { %300 = vst [vmem:[%s647_s5] sm:$0xff] %v284_v10  ;;  %308 = vst [vmem:[%s647_s5 + $0x40] sm:$0xff] %v292_v11  ;;  %v285_v22 = vmax.f32 %v269_v12, 0.0  ;;  %v293_v23 = vmax.f32 %v277_v13, 0.0  ;;  %v217_v26 = vmul.f32 %v507_v32, %v159_v20  ;;  %v225_v27 = vmul.f32 %v507_v32, %v191_v21  ;;  %v369_v28 = vpop.f32.mrb[6].mxu0  ;;  %v377_v29 = vpop.f32.mrb[6].mxu1 }
 0x100   :  { %303 = vst [vmem:[%s647_s5 + $0x18] sm:$0xff] %v287_v16  ;;  %311 = vst [vmem:[%s647_s5 + $0x58] sm:$0xff] %v295_v17  ;;  %v242_v30 = vadd.f32 %v512_v34, %v219_v18  ;;  %v250_v31 = vadd.f32 %v512_v34, %v227_v19  ;;  %v220_v36 = vmul.f32 %v369_v28, %v507_v32  ;;  %v162_v38 = vpop.f32.mrb[7].mxu0  ;;  %v194_v39 = vpop.f32.mrb[7].mxu1 }
 0x101   :  { %v228_v37 = vmul.f32 %v377_v29, %v507_v32  ;;  %301 = vst [vmem:[%s647_s5 + $0x8] sm:$0xff] %v285_v22  ;;  %309 = vst [vmem:[%s647_s5 + $0x48] sm:$0xff] %v293_v23  ;;  %v240_v40 = vadd.f32 %v512_v34, %v217_v26  ;;  %v248_v41 = vadd.f32 %v512_v34, %v225_v27 }
 0x102   :  { %v218_v44 = vmul.f32 %v507_v32, %v162_v38  ;;  %v226_v45 = vmul.f32 %v507_v32, %v194_v39  ;;  %v274_v46 = vadd.f32 %v258_v24, %v242_v30  ;;  %v282_v47 = vadd.f32 %v266_v25, %v250_v31 }
 0x103   :  { %v243_v48 = vadd.f32 %v512_v34, %v220_v36  ;;  %v251_v49 = vadd.f32 %v512_v34, %v228_v37  ;;  %v272_v52 = vadd.f32 %v256_v33, %v240_v40  ;;  %v280_v53 = vadd.f32 %v264_v35, %v248_v41 }
 0x104   :  { %v241_v54 = vadd.f32 %v512_v34, %v218_v44  ;;  %v249_v32 = vadd.f32 %v512_v34, %v226_v45  ;;  %v290_v55 = vmax.f32 %v274_v46, 0.0  ;;  %v298_v56 = vmax.f32 %v282_v47, 0.0 }
 0x105   :  { %v275_v57 = vadd.f32 %v259_v42, %v243_v48  ;;  %v283_v58 = vadd.f32 %v267_v43, %v251_v49  ;;  %v288_v59 = vmax.f32 %v272_v52, 0.0  ;;  %v296_v60 = vmax.f32 %v280_v53, 0.0 }
 0x106   :  { %v273_v61 = vadd.f32 %v257_v50, %v241_v54  ;;  %v281_v62 = vadd.f32 %v265_v51, %v249_v32  ;;  %306 = vst [vmem:[%s647_s5 + $0x30] sm:$0xff] %v290_v55  ;;  %314 = vst [vmem:[%s647_s5 + $0x70] sm:$0xff] %v298_v56 }
 0x107   :  { %v291_v63 = vmax.f32 %v275_v57, 0.0  ;;  %v299_v0 = vmax.f32 %v283_v58, 0.0  ;;  %304 = vst [vmem:[%s647_s5 + $0x20] sm:$0xff] %v288_v59  ;;  %312 = vst [vmem:[%s647_s5 + $0x60] sm:$0xff] %v296_v60 }
 0x108   :  { %v289_v34 = vmax.f32 %v273_v61, 0.0  ;;  %v297_v1 = vmax.f32 %v281_v62, 0.0 }
 0x109   :  { %307 = vst [vmem:[%s647_s5 + $0x38] sm:$0xff] %v291_v63  ;;  %315 = vst [vmem:[%s647_s5 + $0x78] sm:$0xff] %v299_v0 }
 0x10a   :  { %305 = vst [vmem:[%s647_s5 + $0x28] sm:$0xff] %v289_v34  ;;  %313 = vst [vmem:[%s647_s5 + $0x68] sm:$0xff] %v297_v1 }

// kernel: forward.17
= control target key start
LH: loop header
LB: loop body
LE: loop exit
PB: predicated region body
PF: predicated region fallthrough
CT: control target
= control target key end

     0   :  { %s294_s1 = inlined_call_operand.vmem [shape: bf16[128,128], index: 1, kind: input, shape index: {}]   ;;  %s295_s0 = inlined_call_operand.vmem [shape: f32[32,128], index: 0, kind: input, shape index: {}]   ;;  %s296_s2 = inlined_call_operand.vmem [shape: f32[1,128], index: 2, kind: input, shape index: {}]   ;;  %s297_s3 = inlined_call_operand.vmem [shape: f32[1,128], index: 3, kind: input, shape index: {}]   ;;  %s298_s4 = inlined_call_operand.vmem [shape: f32[32,128], index: 4, kind: output, shape index: {}]  }
   0x1   :  { %v207_v0 = vld [vmem:[%s294_s1] sm:$0xff]   ;;  %v208_v1 = vld [vmem:[%s294_s1 + $0x8] sm:$0xff]   ;;  %v209_v2 = vld [vmem:[%s294_s1 + $0x10] sm:$0xff]  }
   0x2   :  { %187 = vmatprep.subr.bf16.mxu0 %v207_v0  ;;  %v210_v3 = vld [vmem:[%s294_s1 + $0x18] sm:$0xff]   ;;  %v18_v4 = vld [vmem:[%s295_s0] sm:$0xff]  ;;  %v19_v5 = vld [vmem:[%s295_s0 + $0x8] sm:$0xff] }
   0x3   :  { %188 = vmatpush3.bf16.msra.mxu0 %v207_v0  ;;  %v22_v6 = vpack.c.bf16 %v19_v5, %v18_v4  ;;  %v211_v7 = vld [vmem:[%s294_s1 + $0x20] sm:$0xff]   ;;  %v212_v8 = vld [vmem:[%s294_s1 + $0x28] sm:$0xff]   ;;  %v213_v9 = vld [vmem:[%s294_s1 + $0x30] sm:$0xff]  }
   0x4   :  { %189 = vmatprep.subr.bf16.mxu0 %v208_v1  ;;  %v214_v10 = vld [vmem:[%s294_s1 + $0x38] sm:$0xff]   ;;  %v20_v11 = vld [vmem:[%s295_s0 + $0x10] sm:$0xff]  ;;  %v175_v14 = vld [vmem:[%s296_s2] ss:$0 sm:$0xff] }
   0x5   :  { %203 = vmatprep.mubr.bf16.mxu0 %v22_v6  ;;  %v21_v12 = vld [vmem:[%s295_s0 + $0x18] sm:$0xff]  ;;  %v176_v16 = vld [vmem:[%s297_s3] ss:$0 sm:$0xff] }
   0x6   :  { %v23_v13 = vpack.c.bf16 %v21_v12, %v20_v11 }
   0x7   :  { %190 = vmatpush3.bf16.msra.mxu0 %v208_v1 }
   0x8   :  { %191 = vmatprep.subr.bf16.mxu0 %v209_v2 }
   0xb   :  { %192 = vmatpush3.bf16.msra.mxu0 %v209_v2 }
   0xc   :  { %193 = vmatprep.subr.bf16.mxu0 %v210_v3 }
   0xf   :  { %194 = vmatpush3.bf16.msra.mxu0 %v210_v3 }
  0x10   :  { %195 = vmatprep.subr.bf16.mxu0 %v211_v7 }
  0x13   :  { %196 = vmatpush3.bf16.msra.mxu0 %v211_v7 }
  0x14   :  { %197 = vmatprep.subr.bf16.mxu0 %v212_v8 }
  0x17   :  { %198 = vmatpush3.bf16.msra.mxu0 %v212_v8 }
  0x18   :  { %199 = vmatprep.subr.bf16.mxu0 %v213_v9 }
  0x1b   :  { %200 = vmatpush3.bf16.msra.mxu0 %v213_v9 }
  0x1c   :  { %201 = vmatprep.subr.bf16.mxu0 %v214_v10 }
  0x1f   :  { %202 = vmatpush3.bf16.msra.mxu0 %v214_v10 }
  0x22   :  { %204 = vmatmul.mubr.bf16.vlgmr.msra.gmra.mrb[0].mxu0 %v23_v13 }
  0xf5   :  { %v205_v15 = vpop.f32.mrb[0].mxu0 }
  0xf6   :  { %v146_v17 = vmul.f32 %v205_v15, %v175_v14  ;;  %v122_v18 = vpop.f32.mrb[1].mxu0 }
  0xf7   :  { %v144_v19 = vmul.f32 %v175_v14, %v122_v18  ;;  %v206_v20 = vpop.f32.mrb[2].mxu0 }
  0xf8   :  { %v157_v21 = vadd.f32 %v176_v16, %v146_v17  ;;  %v147_v22 = vmul.f32 %v206_v20, %v175_v14  ;;  %v125_v23 = vpop.f32.mrb[3].mxu0 }
  0xf9   :  { %v155_v24 = vadd.f32 %v176_v16, %v144_v19  ;;  %v145_v25 = vmul.f32 %v175_v14, %v125_v23 }
  0xfa   :  { %161 = vst [vmem:[%s298_s4 + $0x10] sm:$0xff] %v157_v21  ;;  %v158_v26 = vadd.f32 %v176_v16, %v147_v22 }
  0xfb   :  { %159 = vst [vmem:[%s298_s4] sm:$0xff] %v155_v24  ;;  %v156_v27 = vadd.f32 %v176_v16, %v145_v25 }
  0xfc   :  { %162 = vst [vmem:[%s298_s4 + $0x18] sm:$0xff] %v158_v26 }
  0xfd   :  { %160 = vst [vmem:[%s298_s4 + $0x8] sm:$0xff] %v156_v27 }

// kernel: forward.15
= control target key start
LH: loop header
LB: loop body
LE: loop exit
PB: predicated region body
PF: predicated region fallthrough
CT: control target
= control target key end

     0   :  { %s536_s1 = inlined_call_operand.vmem [shape: bf16[128,128], index: 1, kind: input, shape index: {}]   ;;  %s537_s0 = inlined_call_operand.vmem [shape: f32[128,128], index: 0, kind: input, shape index: {}]   ;;  %s538_s2 = inlined_call_operand.vmem [shape: f32[1,128], index: 2, kind: input, shape index: {}]   ;;  %s539_s3 = inlined_call_operand.vmem [shape: f32[1,128], index: 3, kind: input, shape index: {}]   ;;  %s540_s4 = inlined_call_operand.vmem [shape: f32[128,128], index: 4, kind: output, shape index: {}]  }
   0x1   :  { %v359_v0 = vld [vmem:[%s536_s1] sm:$0xff]   ;;  %v360_v1 = vld [vmem:[%s536_s1 + $0x8] sm:$0xff]   ;;  %v361_v2 = vld [vmem:[%s536_s1 + $0x10] sm:$0xff]  }
   0x2   :  { %311 = vmatprep.subr.bf16.mxu0 %v359_v0  ;;  %343 = vmatprep.subr.bf16.mxu1 %v359_v0  ;;  %v362_v3 = vld [vmem:[%s536_s1 + $0x18] sm:$0xff]   ;;  %v18_v4 = vld [vmem:[%s537_s0] sm:$0xff]  ;;  %v19_v5 = vld [vmem:[%s537_s0 + $0x8] sm:$0xff] }
   0x3   :  { %312 = vmatpush3.bf16.msra.mxu0 %v359_v0  ;;  %351 = vmatpush3.bf16.msra.mxu1 %v359_v0  ;;  %v26_v6 = vld [vmem:[%s537_s0 + $0x40] sm:$0xff]  ;;  %v34_v7 = vpack.c.bf16 %v19_v5, %v18_v4  ;;  %v27_v8 = vld [vmem:[%s537_s0 + $0x48] sm:$0xff]  ;;  %v365_v12 = vld [vmem:[%s536_s1 + $0x30] sm:$0xff]  }
   0x4   :  { %313 = vmatprep.subr.bf16.mxu0 %v360_v1  ;;  %344 = vmatprep.subr.bf16.mxu1 %v360_v1  ;;  %v38_v9 = vpack.c.bf16 %v27_v8, %v26_v6  ;;  %v363_v10 = vld [vmem:[%s536_s1 + $0x20] sm:$0xff]   ;;  %v364_v11 = vld [vmem:[%s536_s1 + $0x28] sm:$0xff]   ;;  %v366_v13 = vld [vmem:[%s536_s1 + $0x38] sm:$0xff]  }
   0x5   :  { %327 = vmatprep.mubr.bf16.mxu0 %v34_v7  ;;  %v20_v14 = vld [vmem:[%s537_s0 + $0x10] sm:$0xff]  ;;  %v21_v15 = vld [vmem:[%s537_s0 + $0x18] sm:$0xff]  ;;  %v22_v18 = vld [vmem:[%s537_s0 + $0x20] sm:$0xff] }
   0x6   :  { %335 = vmatprep.mubr.bf16.mxu1 %v38_v9  ;;  %v28_v16 = vld [vmem:[%s537_s0 + $0x50] sm:$0xff]  ;;  %v29_v17 = vld [vmem:[%s537_s0 + $0x58] sm:$0xff]  ;;  %v23_v19 = vld [vmem:[%s537_s0 + $0x28] sm:$0xff]  ;;  %v35_v22 = vpack.c.bf16 %v21_v15, %v20_v14 }
   0x7   :  { %314 = vmatpush3.bf16.msra.mxu0 %v360_v1  ;;  %352 = vmatpush3.bf16.msra.mxu1 %v360_v1  ;;  %v30_v20 = vld [vmem:[%s537_s0 + $0x60] sm:$0xff]  ;;  %v31_v21 = vld [vmem:[%s537_s0 + $0x68] sm:$0xff]  ;;  %v39_v23 = vpack.c.bf16 %v29_v17, %v28_v16  ;;  %v36_v24 = vpack.c.bf16 %v23_v19, %v22_v18  ;;  %v24_v26 = vld [vmem:[%s537_s0 + $0x30] sm:$0xff] }
   0x8   :  { %315 = vmatprep.subr.bf16.mxu0 %v361_v2  ;;  %345 = vmatprep.subr.bf16.mxu1 %v361_v2  ;;  %v40_v25 = vpack.c.bf16 %v31_v21, %v30_v20  ;;  %v25_v27 = vld [vmem:[%s537_s0 + $0x38] sm:$0xff]  ;;  %v32_v28 = vld [vmem:[%s537_s0 + $0x70] sm:$0xff]  ;;  %v293_v32 = vld [vmem:[%s538_s2] ss:$0 sm:$0xff] }
   0x9   :  { %v33_v29 = vld [vmem:[%s537_s0 + $0x78] sm:$0xff]  ;;  %v37_v30 = vpack.c.bf16 %v25_v27, %v24_v26  ;;  %v470_v34 = vld [vmem:[%s539_s3] ss:$0 sm:$0xff] }
   0xa   :  { %v41_v31 = vpack.c.bf16 %v33_v29, %v32_v28 }
   0xb   :  { %316 = vmatpush3.bf16.msra.mxu0 %v361_v2  ;;  %353 = vmatpush3.bf16.msra.mxu1 %v361_v2 }
   0xc   :  { %317 = vmatprep.subr.bf16.mxu0 %v362_v3  ;;  %346 = vmatprep.subr.bf16.mxu1 %v362_v3 }
   0xf   :  { %318 = vmatpush3.bf16.msra.mxu0 %v362_v3  ;;  %354 = vmatpush3.bf16.msra.mxu1 %v362_v3 }
  0x10   :  { %319 = vmatprep.subr.bf16.mxu0 %v363_v10  ;;  %347 = vmatprep.subr.bf16.mxu1 %v363_v10 }
  0x13   :  { %320 = vmatpush3.bf16.msra.mxu0 %v363_v10  ;;  %355 = vmatpush3.bf16.msra.mxu1 %v363_v10 }
  0x14   :  { %321 = vmatprep.subr.bf16.mxu0 %v364_v11  ;;  %348 = vmatprep.subr.bf16.mxu1 %v364_v11 }
  0x17   :  { %322 = vmatpush3.bf16.msra.mxu0 %v364_v11  ;;  %356 = vmatpush3.bf16.msra.mxu1 %v364_v11 }
  0x18   :  { %323 = vmatprep.subr.bf16.mxu0 %v365_v12  ;;  %349 = vmatprep.subr.bf16.mxu1 %v365_v12 }
  0x1b   :  { %324 = vmatpush3.bf16.msra.mxu0 %v365_v12  ;;  %357 = vmatpush3.bf16.msra.mxu1 %v365_v12 }
  0x1c   :  { %325 = vmatprep.subr.bf16.mxu0 %v366_v13  ;;  %350 = vmatprep.subr.bf16.mxu1 %v366_v13 }
  0x1f   :  { %326 = vmatpush3.bf16.msra.mxu0 %v366_v13  ;;  %358 = vmatpush3.bf16.msra.mxu1 %v366_v13 }
  0x22   :  { %328 = vmatmul.mubr.bf16.vlgmr.msra.gmra.mrb[0].mxu0 %v35_v22  ;;  %336 = vmatmul.mubr.bf16.vlgmr.msra.gmra.mrb[0].mxu1 %v39_v23 }
  0x23   :  { %331 = vmatprep.mubr.bf16.mxu0 %v36_v24  ;;  %339 = vmatprep.mubr.bf16.mxu1 %v40_v25 }
  0x2a   :  { %332 = vmatmul.mubr.bf16.gmra.mrb[4].mxu0 %v37_v30  ;;  %340 = vmatmul.mubr.bf16.gmra.mrb[4].mxu1 %v41_v31 }
  0xf5   :  { %v329_v33 = vpop.f32.mrb[0].mxu0  ;;  %v337_v35 = vpop.f32.mrb[0].mxu1 }
  0xf6   :  { %v212_v36 = vmul.f32 %v329_v33, %v293_v32  ;;  %v220_v37 = vmul.f32 %v337_v35, %v293_v32  ;;  %v140_v38 = vpop.f32.mrb[1].mxu0  ;;  %v172_v39 = vpop.f32.mrb[1].mxu1 }
  0xf7   :  { %v210_v40 = vmul.f32 %v293_v32, %v140_v38  ;;  %v218_v41 = vmul.f32 %v293_v32, %v172_v39  ;;  %v330_v42 = vpop.f32.mrb[2].mxu0  ;;  %v338_v43 = vpop.f32.mrb[2].mxu1 }
  0xf8   :  { %v235_v44 = vadd.f32 %v470_v34, %v212_v36  ;;  %v243_v45 = vadd.f32 %v470_v34, %v220_v37  ;;  %v213_v46 = vmul.f32 %v330_v42, %v293_v32  ;;  %v221_v47 = vmul.f32 %v338_v43, %v293_v32  ;;  %v143_v48 = vpop.f32.mrb[3].mxu0  ;;  %v175_v49 = vpop.f32.mrb[3].mxu1 }
  0xf9   :  { %v233_v50 = vadd.f32 %v470_v34, %v210_v40  ;;  %v241_v51 = vadd.f32 %v470_v34, %v218_v41  ;;  %v211_v52 = vmul.f32 %v293_v32, %v143_v48  ;;  %v219_v53 = vmul.f32 %v293_v32, %v175_v49 }
  0xfa   :  { %v251_v54 = vmax.f32 %v235_v44, 0.0  ;;  %v259_v55 = vmax.f32 %v243_v45, 0.0  ;;  %v236_v56 = vadd.f32 %v470_v34, %v213_v46  ;;  %v244_v57 = vadd.f32 %v470_v34, %v221_v47 }
  0xfb   :  { %v249_v58 = vmax.f32 %v233_v50, 0.0  ;;  %v257_v59 = vmax.f32 %v241_v51, 0.0  ;;  %v234_v60 = vadd.f32 %v470_v34, %v211_v52  ;;  %v242_v61 = vadd.f32 %v470_v34, %v219_v53 }
  0xfc   :  { %267 = vst [vmem:[%s540_s4 + $0x10] sm:$0xff] %v251_v54  ;;  %275 = vst [vmem:[%s540_s4 + $0x50] sm:$0xff] %v259_v55  ;;  %v252_v62 = vmax.f32 %v236_v56, 0.0  ;;  %v260_v63 = vmax.f32 %v244_v57, 0.0 }
  0xfd   :  { %265 = vst [vmem:[%s540_s4] sm:$0xff] %v249_v58  ;;  %273 = vst [vmem:[%s540_s4 + $0x40] sm:$0xff] %v257_v59  ;;  %v250_v0 = vmax.f32 %v234_v60, 0.0  ;;  %v258_v1 = vmax.f32 %v242_v61, 0.0  ;;  %v333_v2 = vpop.f32.mrb[4].mxu0  ;;  %v341_v3 = vpop.f32.mrb[4].mxu1 }
  0xfe   :  { %268 = vst [vmem:[%s540_s4 + $0x18] sm:$0xff] %v252_v62  ;;  %276 = vst [vmem:[%s540_s4 + $0x58] sm:$0xff] %v260_v63  ;;  %v216_v4 = vmul.f32 %v333_v2, %v293_v32  ;;  %v224_v5 = vmul.f32 %v341_v3, %v293_v32  ;;  %v156_v6 = vpop.f32.mrb[5].mxu0  ;;  %v188_v7 = vpop.f32.mrb[5].mxu1 }
  0xff   :  { %266 = vst [vmem:[%s540_s4 + $0x8] sm:$0xff] %v250_v0  ;;  %274 = vst [vmem:[%s540_s4 + $0x48] sm:$0xff] %v258_v1  ;;  %v214_v8 = vmul.f32 %v293_v32, %v156_v6  ;;  %v222_v9 = vmul.f32 %v293_v32, %v188_v7  ;;  %v334_v10 = vpop.f32.mrb[6].mxu0  ;;  %v342_v11 = vpop.f32.mrb[6].mxu1 }
 0x100   :  { %v239_v12 = vadd.f32 %v470_v34, %v216_v4  ;;  %v247_v13 = vadd.f32 %v470_v34, %v224_v5  ;;  %v217_v14 = vmul.f32 %v334_v10, %v293_v32  ;;  %v225_v15 = vmul.f32 %v342_v11, %v293_v32  ;;  %v159_v16 = vpop.f32.mrb[7].mxu0  ;;  %v191_v17 = vpop.f32.mrb[7].mxu1 }
 0x101   :  { %v237_v18 = vadd.f32 %v470_v34, %v214_v8  ;;  %v245_v19 = vadd.f32 %v470_v34, %v222_v9  ;;  %v215_v20 = vmul.f32 %v293_v32, %v159_v16  ;;  %v223_v21 = vmul.f32 %v293_v32, %v191_v17 }
 0x102   :  { %v255_v22 = vmax.f32 %v239_v12, 0.0  ;;  %v263_v23 = vmax.f32 %v247_v13, 0.0  ;;  %v240_v24 = vadd.f32 %v470_v34, %v217_v14  ;;  %v248_v25 = vadd.f32 %v470_v34, %v225_v15 }
 0x103   :  { %v253_v26 = vmax.f32 %v237_v18, 0.0  ;;  %v261_v27 = vmax.f32 %v245_v19, 0.0  ;;  %v238_v28 = vadd.f32 %v470_v34, %v215_v20  ;;  %v246_v29 = vadd.f32 %v470_v34, %v223_v21 }
 0x104   :  { %271 = vst [vmem:[%s540_s4 + $0x30] sm:$0xff] %v255_v22  ;;  %279 = vst [vmem:[%s540_s4 + $0x70] sm:$0xff] %v263_v23  ;;  %v256_v30 = vmax.f32 %v240_v24, 0.0  ;;  %v264_v31 = vmax.f32 %v248_v25, 0.0 }
 0x105   :  { %269 = vst [vmem:[%s540_s4 + $0x20] sm:$0xff] %v253_v26  ;;  %277 = vst [vmem:[%s540_s4 + $0x60] sm:$0xff] %v261_v27  ;;  %v254_v32 = vmax.f32 %v238_v28, 0.0  ;;  %v262_v33 = vmax.f32 %v246_v29, 0.0 }
 0x106   :  { %272 = vst [vmem:[%s540_s4 + $0x38] sm:$0xff] %v256_v30  ;;  %280 = vst [vmem:[%s540_s4 + $0x78] sm:$0xff] %v264_v31 }
 0x107   :  { %270 = vst [vmem:[%s540_s4 + $0x28] sm:$0xff] %v254_v32  ;;  %278 = vst [vmem:[%s540_s4 + $0x68] sm:$0xff] %v262_v33 }

// kernel: forward.18
= control target key start
LH: loop header
LB: loop body
LE: loop exit
PB: predicated region body
PF: predicated region fallthrough
CT: control target
= control target key end

     0   :  { %s326_s1 = inlined_call_operand.vmem [shape: bf16[128,128], index: 1, kind: input, shape index: {}]   ;;  %s327_s0 = inlined_call_operand.vmem [shape: f32[32,128], index: 0, kind: input, shape index: {}]   ;;  %s328_s2 = inlined_call_operand.vmem [shape: f32[1,128], index: 2, kind: input, shape index: {}]   ;;  %s329_s3 = inlined_call_operand.vmem [shape: f32[1,128], index: 3, kind: input, shape index: {}]   ;;  %s330_s4 = inlined_call_operand.vmem [shape: f32[32,128], index: 4, kind: input, shape index: {}]   ;;  %s331_s5 = inlined_call_operand.vmem [shape: f32[32,128], index: 5, kind: output, shape index: {}]  }
   0x1   :  { %v222_v0 = vld [vmem:[%s326_s1] sm:$0xff]   ;;  %v223_v1 = vld [vmem:[%s326_s1 + $0x8] sm:$0xff]   ;;  %v224_v2 = vld [vmem:[%s326_s1 + $0x10] sm:$0xff]  }
   0x2   :  { %202 = vmatprep.subr.bf16.mxu0 %v222_v0  ;;  %v225_v3 = vld [vmem:[%s326_s1 + $0x18] sm:$0xff]   ;;  %v21_v4 = vld [vmem:[%s327_s0] sm:$0xff]  ;;  %v22_v5 = vld [vmem:[%s327_s0 + $0x8] sm:$0xff] }
   0x3   :  { %203 = vmatpush3.bf16.msra.mxu0 %v222_v0  ;;  %v25_v6 = vpack.c.bf16 %v22_v5, %v21_v4  ;;  %v226_v7 = vld [vmem:[%s326_s1 + $0x20] sm:$0xff]   ;;  %v227_v8 = vld [vmem:[%s326_s1 + $0x28] sm:$0xff]   ;;  %v228_v9 = vld [vmem:[%s326_s1 + $0x30] sm:$0xff]  }
   0x4   :  { %204 = vmatprep.subr.bf16.mxu0 %v223_v1  ;;  %v229_v10 = vld [vmem:[%s326_s1 + $0x38] sm:$0xff]   ;;  %v23_v11 = vld [vmem:[%s327_s0 + $0x10] sm:$0xff]  ;;  %v190_v14 = vld [vmem:[%s328_s2] ss:$0 sm:$0xff] }
   0x5   :  { %218 = vmatprep.mubr.bf16.mxu0 %v25_v6  ;;  %v24_v12 = vld [vmem:[%s327_s0 + $0x18] sm:$0xff]  ;;  %v191_v16 = vld [vmem:[%s329_s3] ss:$0 sm:$0xff]  ;;  %v164_v19 = vld [vmem:[%s330_s4 + $0x10] sm:$0xff] }
   0x6   :  { %v26_v13 = vpack.c.bf16 %v24_v12, %v23_v11  ;;  %v162_v23 = vld [vmem:[%s330_s4] sm:$0xff]  ;;  %v165_v27 = vld [vmem:[%s330_s4 + $0x18] sm:$0xff]  ;;  %v163_v31 = vld [vmem:[%s330_s4 + $0x8] sm:$0xff] }
   0x7   :  { %205 = vmatpush3.bf16.msra.mxu0 %v223_v1 }
   0x8   :  { %206 = vmatprep.subr.bf16.mxu0 %v224_v2 }
   0xb   :  { %207 = vmatpush3.bf16.msra.mxu0 %v224_v2 }
   0xc   :  { %208 = vmatprep.subr.bf16.mxu0 %v225_v3 }
   0xf   :  { %209 = vmatpush3.bf16.msra.mxu0 %v225_v3 }
  0x10   :  { %210 = vmatprep.subr.bf16.mxu0 %v226_v7 }
  0x13   :  { %211 = vmatpush3.bf16.msra.mxu0 %v226_v7 }
  0x14   :  { %212 = vmatprep.subr.bf16.mxu0 %v227_v8 }
  0x17   :  { %213 = vmatpush3.bf16.msra.mxu0 %v227_v8 }
  0x18   :  { %214 = vmatprep.subr.bf16.mxu0 %v228_v9 }
  0x1b   :  { %215 = vmatpush3.bf16.msra.mxu0 %v228_v9 }
  0x1c   :  { %216 = vmatprep.subr.bf16.mxu0 %v229_v10 }
  0x1f   :  { %217 = vmatpush3.bf16.msra.mxu0 %v229_v10 }
  0x22   :  { %219 = vmatmul.mubr.bf16.vlgmr.msra.gmra.mrb[0].mxu0 %v26_v13 }
  0xf5   :  { %v220_v15 = vpop.f32.mrb[0].mxu0 }
  0xf6   :  { %v149_v17 = vmul.f32 %v220_v15, %v190_v14  ;;  %v125_v18 = vpop.f32.mrb[1].mxu0 }
  0xf7   :  { %v147_v20 = vmul.f32 %v190_v14, %v125_v18  ;;  %v221_v21 = vpop.f32.mrb[2].mxu0 }
  0xf8   :  { %v160_v22 = vadd.f32 %v191_v16, %v149_v17  ;;  %v150_v24 = vmul.f32 %v221_v21, %v190_v14  ;;  %v128_v25 = vpop.f32.mrb[3].mxu0 }
  0xf9   :  { %v158_v26 = vadd.f32 %v191_v16, %v147_v20  ;;  %v148_v28 = vmul.f32 %v190_v14, %v128_v25 }
  0xfa   :  { %v168_v29 = vadd.f32 %v164_v19, %v160_v22  ;;  %v161_v30 = vadd.f32 %v191_v16, %v150_v24 }
  0xfb   :  { %v166_v32 = vadd.f32 %v162_v23, %v158_v26  ;;  %v159_v33 = vadd.f32 %v191_v16, %v148_v28 }
  0xfc   :  { %v172_v34 = vmax.f32 %v168_v29, 0.0  ;;  %v169_v35 = vadd.f32 %v165_v27, %v161_v30 }
  0xfd   :  { %v170_v36 = vmax.f32 %v166_v32, 0.0  ;;  %v167_v37 = vadd.f32 %v163_v31, %v159_v33 }
  0xfe   :  { %176 = vst [vmem:[%s331_s5 + $0x10] sm:$0xff] %v172_v34  ;;  %v173_v38 = vmax.f32 %v169_v35, 0.0 }
  0xff   :  { %174 = vst [vmem:[%s331_s5] sm:$0xff] %v170_v36  ;;  %v171_v39 = vmax.f32 %v167_v37, 0.0 }
 0x100   :  { %177 = vst [vmem:[%s331_s5 + $0x18] sm:$0xff] %v173_v38 }
 0x101   :  { %175 = vst [vmem:[%s331_s5 + $0x8] sm:$0xff] %v171_v39 }

// kernel: forward.16
= control target key start
LH: loop header
LB: loop body
LE: loop exit
PB: predicated region body
PF: predicated region fallthrough
CT: control target
= control target key end

     0   :  { %vm180_vm0 = vcmask 261120   ;;  %s532_s1 = inlined_call_operand.vmem [shape: bf16[288,128], index: 1, kind: input, shape index: {}]   ;;  %s533_s0 = inlined_call_operand.vmem [shape: f32[32,288], index: 0, kind: input, shape index: {}]   ;;  %s534_s2 = inlined_call_operand.vmem [shape: f32[1,128], index: 2, kind: input, shape index: {}]   ;;  %s535_s3 = inlined_call_operand.vmem [shape: f32[1,128], index: 3, kind: input, shape index: {}]   ;;  %s536_s4 = inlined_call_operand.vmem [shape: f32[32,128], index: 4, kind: output, shape index: {}]  }
   0x1   :  { %v381_v0 = vld [vmem:[%s532_s1 + $0x40] sm:$0xff]   ;;  %v383_v2 = vld [vmem:[%s532_s1 + $0x48] sm:$0xff]   ;;  %v385_v4 = vld [vmem:[%s532_s1 + $0x50] sm:$0xff]  }
   0x2   :  { %v382_v1 = vld [vmem:[%s532_s1] sm:$0xff]   ;;  %341 = vmatprep.subr.bf16.mxu0 %v381_v0  ;;  %v384_v3 = vld [vmem:[%s532_s1 + $0x8] sm:$0xff]   ;;  %v386_v5 = vld [vmem:[%s532_s1 + $0x10] sm:$0xff]  }
   0x3   :  { %342 = vmatpush3.bf16.msra.mxu0 %v382_v1  ;;  %v387_v6 = vld [vmem:[%s532_s1 + $0x58] sm:$0xff]   ;;  %v389_v8 = vld [vmem:[%s532_s1 + $0x60] sm:$0xff]   ;;  %v391_v11 = vld [vmem:[%s532_s1 + $0x68] sm:$0xff]  }
   0x4   :  { %343 = vmatprep.subr.bf16.mxu0 %v383_v2  ;;  %v388_v7 = vld [vmem:[%s532_s1 + $0x18] sm:$0xff]   ;;  %v395_v9 = vld [vmem:[%s532_s1 + $0x80] sm:$0xff]   ;;  %v398_v12 = vld [vmem:[%s532_s1 + $0x88] sm:$0xff]  }
   0x5   :  { %v390_v10 = vld [vmem:[%s532_s1 + $0x20] sm:$0xff]   ;;  %373 = vmatprep.subr.bf16.mxu1 %v395_v9  ;;  %v19_v13 = vld [vmem:[%s533_s0 + $0x8] sm:$0xff]  ;;  %v20_v17 = vld [vmem:[%s533_s0 + $0x10] sm:$0xff] }
   0x6   :  { %374 = vmatpush3.bf16.msra.mxu1 %v395_v9  ;;  %v22_v14 = vld [vmem:[%s533_s0 + $0x20] sm:$0xff]  ;;  %v392_v15 = vld [vmem:[%s532_s1 + $0x28] sm:$0xff]   ;;  %v393_v19 = vld [vmem:[%s532_s1 + $0x70] sm:$0xff]  }
   0x7   :  { %344 = vmatpush3.bf16.msra.mxu0 %v384_v3  ;;  %375 = vmatprep.subr.bf16.mxu1 %v398_v12  ;;  %v31_v16 = vpack.c.bf16 %v22_v14, %v19_v13  ;;  %v23_v18 = vld [vmem:[%s533_s0 + $0x28] sm:$0xff]  ;;  %v26_v21 = vld [vmem:[%s533_s0 + $0x40] sm:$0xff]  ;;  %v29_v22 = vld [vmem:[%s533_s0 + $0x58] sm:$0xff] }
   0x8   :  { %345 = vmatprep.subr.bf16.mxu0 %v385_v4  ;;  %v32_v20 = vpack.c.bf16 %v23_v18, %v20_v17  ;;  %v35_v23 = vpack.c.bf16 %v29_v22, %v26_v21  ;;  %v394_v24 = vld [vmem:[%s532_s1 + $0x30] sm:$0xff]   ;;  %v396_v25 = vld [vmem:[%s532_s1 + $0x78] sm:$0xff]   ;;  %v18_v27 = vld [vmem:[%s533_s0] sm:$0xff] }
   0x9   :  { %219 = vmatprep.mubr.bf16.mxu0 %v31_v16  ;;  %v397_v26 = vld [vmem:[%s532_s1 + $0x38] sm:$0xff]   ;;  %v28_v30 = vld [vmem:[%s533_s0 + $0x50] sm:$0xff]  ;;  %v27_v34 = vld [vmem:[%s533_s0 + $0x48] sm:$0xff] }
   0xa   :  { %376 = vmatpush3.bf16.msra.mxu1 %v398_v12  ;;  %377 = vmatprep.mubr.msk.bf16.mxu1 %vm180_vm0, %v32_v20  ;;  %v21_v28 = vld [vmem:[%s533_s0 + $0x18] sm:$0xff]  ;;  %v24_v33 = vld [vmem:[%s533_s0 + $0x30] sm:$0xff]  ;;  %v339_v45 = vld [vmem:[%s534_s2] ss:$0 sm:$0xff] }
   0xb   :  { %346 = vmatpush3.bf16.msra.mxu0 %v386_v5  ;;  %v25_v29 = vld [vmem:[%s533_s0 + $0x38] sm:$0xff]  ;;  %v30_v31 = vpack.c.bf16 %v21_v28, %v18_v27  ;;  %v33_v35 = vpack.c.bf16 %v27_v34, %v24_v33  ;;  %v340_v48 = vld [vmem:[%s535_s3] ss:$0 sm:$0xff] }
   0xc   :  { %347 = vmatprep.subr.bf16.mxu0 %v387_v6  ;;  %v34_v32 = vpack.c.bf16 %v28_v30, %v25_v29 }
   0xd   :  { %378 = vmatmul.mubr.msk.bf16.vlgmr.msra.gmra.mrb[0].mxu1 %vm180_vm0, %v35_v23 }
   0xf   :  { %348 = vmatpush3.bf16.msra.mxu0 %v388_v7 }
  0x10   :  { %349 = vmatprep.subr.bf16.mxu0 %v389_v8 }
  0x13   :  { %350 = vmatpush3.bf16.msra.mxu0 %v390_v10 }
  0x14   :  { %351 = vmatprep.subr.bf16.mxu0 %v391_v11 }
  0x17   :  { %352 = vmatpush3.bf16.msra.mxu0 %v392_v15 }
  0x18   :  { %353 = vmatprep.subr.bf16.mxu0 %v393_v19 }
  0x1b   :  { %354 = vmatpush3.bf16.msra.mxu0 %v394_v24 }
  0x1c   :  { %355 = vmatprep.subr.bf16.mxu0 %v396_v25 }
  0x1f   :  { %356 = vmatpush3.bf16.msra.mxu0 %v397_v26 }
  0x22   :  { %220 = vmatmul.mubr.bf16.vlgmr.msra.gmra.mrb[0].mxu0 %v30_v31 }
  0x23   :  { %227 = vmatprep.mubr.bf16.mxu0 %v34_v32 }
  0x2a   :  { %228 = vmatmul.mubr.bf16.gmra.mrb[4].mxu0 %v33_v35 }
  0xe0   :  { %v379_v36 = vpop.f32.mrb[0].mxu1 }
  0xe1   :  { %v270_v37 = vpop.f32.mrb[1].mxu1 }
  0xe2   :  { %v380_v38 = vpop.f32.mrb[2].mxu1 }
  0xe3   :  { %v273_v39 = vpop.f32.mrb[3].mxu1 }
  0xf5   :  { %v357_v40 = vpop.f32.mrb[0].mxu0 }
  0xf6   :  { %v358_v41 = vpop.f32.mrb[1].mxu0 }
  0xf7   :  { %v359_v42 = vadd.f32 %v358_v41, %v357_v40  ;;  %v360_v43 = vpop.f32.mrb[2].mxu0 }
  0xf8   :  { %v361_v44 = vpop.f32.mrb[3].mxu0 }
  0xf9   :  { %v362_v46 = vadd.f32 %v361_v44, %v360_v43  ;;  %v271_v47 = vadd.f32 %v359_v42, %v270_v37 }
  0xfb   :  { %v292_v49 = vmul.f32 %v339_v45, %v271_v47  ;;  %v274_v50 = vadd.f32 %v362_v46, %v273_v39 }
  0xfd   :  { %v303_v51 = vadd.f32 %v340_v48, %v292_v49  ;;  %v293_v52 = vmul.f32 %v339_v45, %v274_v50  ;;  %v363_v53 = vpop.f32.mrb[4].mxu0 }
  0xfe   :  { %v364_v54 = vpop.f32.mrb[5].mxu0 }
  0xff   :  { %v307_v55 = vmax.f32 %v303_v51, 0.0  ;;  %v304_v56 = vadd.f32 %v340_v48, %v293_v52  ;;  %v365_v57 = vadd.f32 %v364_v54, %v363_v53  ;;  %v366_v58 = vpop.f32.mrb[6].mxu0 }
 0x100   :  { %v367_v59 = vpop.f32.mrb[7].mxu0 }
 0x101   :  { %311 = vst [vmem:[%s536_s4] sm:$0xff] %v307_v55  ;;  %v308_v60 = vmax.f32 %v304_v56, 0.0  ;;  %v279_v61 = vadd.f32 %v379_v36, %v365_v57  ;;  %v368_v62 = vadd.f32 %v367_v59, %v366_v58 }
 0x103   :  { %312 = vst [vmem:[%s536_s4 + $0x8] sm:$0xff] %v308_v60  ;;  %v294_v63 = vmul.f32 %v339_v45, %v279_v61  ;;  %v282_v0 = vadd.f32 %v380_v38, %v368_v62 }
 0x105   :  { %v305_v1 = vadd.f32 %v340_v48, %v294_v63  ;;  %v295_v2 = vmul.f32 %v339_v45, %v282_v0 }
 0x107   :  { %v309_v3 = vmax.f32 %v305_v1, 0.0  ;;  %v306_v4 = vadd.f32 %v340_v48, %v295_v2 }
 0x109   :  { %313 = vst [vmem:[%s536_s4 + $0x10] sm:$0xff] %v309_v3  ;;  %v310_v5 = vmax.f32 %v306_v4, 0.0 }
 0x10b   :  { %314 = vst [vmem:[%s536_s4 + $0x18] sm:$0xff] %v310_v5 }

// kernel: forward.19
= control target key start
LH: loop header
LB: loop body
LE: loop exit
PB: predicated region body
PF: predicated region fallthrough
CT: control target
= control target key end

     0   :  { %v254_v3 = vmov 0.0|0.0   ;;  %vm255_vm0 = vmmov 0   ;;  %v256_v6 = vmov 0.0   ;;  %s353_s0 = inlined_call_operand.vmem [shape: f32[2,16,128], index: 0, kind: input, shape index: {}]   ;;  %s354_s1 = inlined_call_operand.vmem [shape: f32[128,128], index: 1, kind: input, shape index: {}]   ;;  %s355_s2 = inlined_call_operand.vmem [shape: f32[1,128], index: 2, kind: input, shape index: {}]   ;;  %s356_s3 = inlined_call_operand.hbm [shape: f32[2,128], index: 3, kind: output, shape index: {}]  }
   0x1   :  { %v36_v0 = vld [vmem:[%s354_s1] sm:$0xff]  ;;  %v37_v1 = vld [vmem:[%s354_s1 + $0x8] sm:$0xff]  ;;  %v38_v2 = vld [vmem:[%s354_s1 + $0x10] sm:$0xff]  ;;  %202 = vmatprep.subr.bf16.mxu0 %v254_v3  ;;  %199 = vmatprep.mubr.msk.f32.mxu0 %vm255_vm0, %v256_v6 }
   0x2   :  { %v203_v4 = vpack.c.bf16 %v37_v1, %v36_v0  ;;  %v39_v5 = vld [vmem:[%s354_s1 + $0x18] sm:$0xff]  ;;  %v40_v8 = vld [vmem:[%s354_s1 + $0x20] sm:$0xff]  ;;  %v41_v9 = vld [vmem:[%s354_s1 + $0x28] sm:$0xff] }
   0x3   :  { %v206_v7 = vpack.c.bf16 %v39_v5, %v38_v2  ;;  %v15_v10 = vld [vmem:[%s353_s0] sm:$0xff]  ;;  %v16_v11 = vld [vmem:[%s353_s0 + $0x8] sm:$0xff]  ;;  %v17_v12 = vld [vmem:[%s353_s0 + $0x10] sm:$0xff]  ;;  %v209_v15 = vpack.c.bf16 %v41_v9, %v40_v8 }
   0x4   :  { %204 = vmatpush3.bf16.msra.mxu0 %v203_v4  ;;  %v18_v13 = vld [vmem:[%s353_s0 + $0x18] sm:$0xff]  ;;  %v19_v14 = vadd.f32 %v16_v11, %v15_v10 }
   0x5   :  { %205 = vmatprep.subr.bf16.mxu0 %v254_v3  ;;  %v26_v16 = vadd.f32 %v18_v13, %v17_v12 }
   0x8   :  { %207 = vmatpush3.bf16.msra.mxu0 %v206_v7 }
   0x9   :  { %8 = vsyncpa [#allocation3], 0  ;;  %208 = vmatprep.subr.bf16.mxu0 %v254_v3  ;;  %v42_v17 = vld [vmem:[%s354_s1 + $0x30] sm:$0xff]  ;;  %v43_v18 = vld [vmem:[%s354_s1 + $0x38] sm:$0xff]  ;;  %v20_v19 = vrot.slane %v19_v14, 4  ;;  %v27_v20 = vrot.slane %v26_v16, 4 }
   0xa   :  { %v212_v22 = vpack.c.bf16 %v43_v18, %v42_v17  ;;  %v44_v24 = vld [vmem:[%s354_s1 + $0x40] sm:$0xff]  ;;  %v45_v25 = vld [vmem:[%s354_s1 + $0x48] sm:$0xff]  ;;  %v46_v31 = vld [vmem:[%s354_s1 + $0x50] sm:$0xff]  ;;  %vm61_vm1 = vcmask 1041409   ;;  %s257_s26 = smov [#allocation2]  }
   0xb   :  { %v21_v21 = vadd.f32 %v20_v19, %v19_v14  ;;  %v28_v23 = vadd.f32 %v27_v20, %v26_v16  ;;  %v215_v28 = vpack.c.bf16 %v45_v25, %v44_v24  ;;  %v47_v32 = vld [vmem:[%s354_s1 + $0x58] sm:$0xff]  ;;  %v48_v36 = vld [vmem:[%s354_s1 + $0x60] sm:$0xff]  ;;  %v49_v37 = vld [vmem:[%s354_s1 + $0x68] sm:$0xff]  ;;  %s141_s27 = sshll.u32 %s257_s26, 4  ;;  %s142_s27 = int_to_ptr.vmem [resolvable:$true] %s141_s27 }
   0xc   :  { %210 = vmatpush3.bf16.msra.mxu0 %v209_v15  ;;  %v218_v33 = vpack.c.bf16 %v47_v32, %v46_v31  ;;  %v221_v38 = vpack.c.bf16 %v49_v37, %v48_v36  ;;  %v50_v41 = vld [vmem:[%s354_s1 + $0x70] sm:$0xff]  ;;  %v51_v42 = vld [vmem:[%s354_s1 + $0x78] sm:$0xff]  ;;  %v149_v47 = vld [vmem:[%s355_s2] ss:$0 sm:$0xff]  ;;  %s230_s1 = scalar_lea.vmem %s142_s27, 32  ;;  %p235_p1 = scmp.lt.s32.totalorder %s142_s27, %s142_s27 }
   0xd   :  { %211 = vmatprep.subr.bf16.mxu0 %v254_v3  ;;  %v22_v26 = vrot.slane %v21_v21, 2  ;;  %v29_v27 = vrot.slane %v28_v23, 2  ;;  %v224_v43 = vpack.c.bf16 %v51_v42, %v50_v41  ;;  %p231_p0 = scmp.ne.s32.totalorder %s142_s27, %s230_s1  ;;  %p236_p2 = scmp.lt.s32.totalorder %s230_s1, %s230_s1 }
   0xf   :  { %v23_v29 = vadd.f32 %v22_v26, %v21_v21  ;;  %v30_v30 = vadd.f32 %v29_v27, %v28_v23  ;;  %p237_p3 = por %p236_p2, %p235_p1 }
  0x10   :  { %213 = vmatpush3.bf16.msra.mxu0 %v212_v22 }
  0x11   :  { %214 = vmatprep.subr.bf16.mxu0 %v254_v3  ;;  %v24_v34 = vrot.slane %v23_v29, 1  ;;  %v31_v35 = vrot.slane %v30_v30, 1  ;;  %p238_p4 = pnand %p237_p3, %p231_p0 }
  0x13   :  { %v25_v39 = vadd.f32 %v24_v34, %v23_v29  ;;  %v32_v40 = vadd.f32 %v31_v35, %v30_v30 }
  0x14   :  { %216 = vmatpush3.bf16.msra.mxu0 %v215_v28 }
  0x15   :  { %217 = vmatprep.subr.bf16.mxu0 %v254_v3  ;;  %v34_v44 = vmul.f32 0.0625, %v25_v39  ;;  %v35_v45 = vmul.f32 0.0625, %v32_v40 }
  0x17   :  { %v62_v46 = vsel %vm61_vm1, %v35_v45, %v34_v44 }
  0x18   :  { %219 = vmatpush3.bf16.msra.mxu0 %v218_v33 }
  0x19   :  { %220 = vmatprep.subr.bf16.mxu0 %v254_v3 }
  0x1c   :  { %222 = vmatpush3.bf16.msra.mxu0 %v221_v38 }
  0x1d   :  { %223 = vmatprep.subr.bf16.mxu0 %v254_v3 }
  0x20   :  { %225 = vmatpush3.bf16.msra.mxu0 %v224_v43 }
  0x23   :  { %200 = vmatmul.mubr.f32.vlgmr.msra.gmra.mrb[0].mxu0 %v62_v46 }
  0xf6   :  { %v130_v48 = vpop.f32.mrb[0].mxu0 }
  0xf7   :  { %v131_v49 = vadd.f32 %v149_v47, %v130_v48  ;;  %v201_v50 = vpop.f32.mrb[1].mxu0 }
  0xf9   :  { %134 = vst [vmem:[#allocation2] sm:$0x3] %v131_v49 }
  0xfa   :  { %241 = shalt.err (!%p238_p4)
}
  0xfb   :  { %s242_s30 = scalar_lea.hbm %s356_s3, 32 }
  0xfc   :  { %p243_p5 = scmp.ne.s32.totalorder %s356_s3, %s242_s30  ;;  %p246_p6 = scmp.lt.u32.totalorder %s242_s30, %s356_s3 }
  0xfe   :  { %p248_p7 = pnand %p246_p6, %p243_p5 }
 0x100   :  { %251 = shalt.err (!%p248_p7)
}
 0x101   :  { %144 = dma.vmem_to_hbm [thread:$0]  %s142_s27, 32, %s356_s3, [#allocation3]  }
 0x102   :  { %252 = dma.done.wait [#allocation3], 32  }
 0x103   :  { %253 = vsyncadd [#allocation3], 4294967264 }
 0x104   :  { %148 = vsyncpa [#allocation3], 1 }

</bundles_post_ra>
